<compile_context>
chip_gen: v5e
topology: v5e:2x2
jax: 0.10.0
libtpu: 0.0.40
codegen_flags: <defaults>
</compile_context>

<pallas_src>
import functools

import jax
import jax.numpy as jnp
from jax.experimental import pallas as pl
from jax.experimental.pallas import tpu as pltpu

EPS = 1e-5  # PyTorch BatchNorm2d default


def _conv_im2col_kernel(x_ref, w_ref, scale_ref, shift_ref,      # inputs
                        y_ref, stats_ref,                        # outputs
                        pad_s, patch_s,                          # scratch
                        *, H, W, C, apply_bn_relu, compute_dtype):
    """Per-image: (optional folded-BN + ReLU) -> 3x3 conv (pad=1) -> stats.

    x_ref     : (1, H*W, C)  f32, rows in (h, w) row-major order
    w_ref     : (9*C, C)     im2col weights, row = (kh*3+kw)*C + cin
    scale_ref : (1, C)       folded BN scale   (unused if not apply_bn_relu)
    shift_ref : (1, C)       folded BN shift
    y_ref     : (1, H*W, C)  f32 raw conv output
    stats_ref : (1, 2, C)    f32 per-image [sum, sum_of_squares]
    pad_s     : (H+2, W+2, C) f32 scratch (only halo is zeroed)
    patch_s   : (H*W, 9*C)    f32 scratch (im2col matrix)
    """
    HP, WP = H + 2, W + 2

    x = x_ref[0]                                            # (H*W, C) f32
    if apply_bn_relu:
        # BN folded into y*scale + shift (stats reduced outside), then ReLU.
        x = jnp.maximum(x * scale_ref[...] + shift_ref[...], 0.0)
    a = x.reshape(H, W, C)

    # Zero only the 1-element halo, then write the interior once.
    pad_s[0:1, :, :] = jnp.zeros((1, WP, C), jnp.float32)
    pad_s[HP - 1:HP, :, :] = jnp.zeros((1, WP, C), jnp.float32)
    pad_s[:, 0:1, :] = jnp.zeros((HP, 1, C), jnp.float32)
    pad_s[:, WP - 1:WP, :] = jnp.zeros((HP, 1, C), jnp.float32)
    pad_s[1:H + 1, 1:W + 1, :] = a

    # im2col: column block t holds the (kh, kw)-shifted image.
    for kh in range(3):
        for kw in range(3):
            t = kh * 3 + kw
            patch_s[:, t * C:(t + 1) * C] = (
                pad_s[kh:kh + H, kw:kw + W, :].reshape(H * W, C))

    # Single MXU matmul with K = 9*C; operands optionally bf16, accum f32.
    acc = jnp.dot(patch_s[...].astype(compute_dtype), w_ref[...],
                  preferred_element_type=jnp.float32)       # (H*W, C) f32
    y_ref[0] = acc

    # One-pass partial BN statistics while acc is live in VMEM.
    stats_ref[0:1, 0:1, :] = (
        jnp.sum(acc, axis=0, keepdims=True).reshape(1, 1, C))
    stats_ref[0:1, 1:2, :] = (
        jnp.sum(acc * acc, axis=0, keepdims=True).reshape(1, 1, C))


def _bn_add_relu_kernel(y_ref, x_ref, scale_ref, shift_ref, out_ref):
    """Lane-dense elementwise tail: relu(bn2(conv2_out) + identity)."""
    out_ref[...] = jnp.maximum(
        y_ref[...] * scale_ref[...] + shift_ref[...] + x_ref[...], 0.0)


def _conv_bn_stats(x_rows, w_mat, scale, shift, *, N, H, W, C,
                   apply_bn_relu, compute_dtype):
    kernel = functools.partial(
        _conv_im2col_kernel, H=H, W=W, C=C,
        apply_bn_relu=apply_bn_relu, compute_dtype=compute_dtype)
    return pl.pallas_call(
        kernel,
        out_shape=(jax.ShapeDtypeStruct((N, H * W, C), jnp.float32),
                   jax.ShapeDtypeStruct((N, 2, C), jnp.float32)),
        grid=(N,),
        in_specs=[
            pl.BlockSpec((1, H * W, C), lambda i: (i, 0, 0)),
            pl.BlockSpec((9 * C, C), lambda i: (0, 0)),
            pl.BlockSpec((1, C), lambda i: (0, 0)),
            pl.BlockSpec((1, C), lambda i: (0, 0)),
        ],
        out_specs=(
            pl.BlockSpec((1, H * W, C), lambda i: (i, 0, 0)),
            pl.BlockSpec((1, 2, C), lambda i: (i, 0, 0)),
        ),
        scratch_shapes=[
            pltpu.VMEM((H + 2, W + 2, C), jnp.float32),
            pltpu.VMEM((H * W, 9 * C), jnp.float32),
        ],
        compiler_params=pltpu.CompilerParams(
            dimension_semantics=("parallel",)),
    )(x_rows, w_mat, scale, shift)


def _fold_bn(stats, gamma, beta, count):
    """stats (N, 2, C) of per-image [sum, sum_sq] -> folded (scale, shift)."""
    s = jnp.sum(stats[:, 0, :], axis=0)
    ss = jnp.sum(stats[:, 1, :], axis=0)
    mean = s / count
    var = jnp.maximum(ss / count - mean * mean, 0.0)   # biased (training) var
    scale = gamma * jax.lax.rsqrt(var + EPS)
    shift = beta - mean * scale
    return scale.reshape(1, -1), shift.reshape(1, -1)


def _im2col_weights(w_oihw, dtype):
    cout, cin, kh, kw = w_oihw.shape
    # (Cout, Cin, 3, 3) -> (3, 3, Cin, Cout) -> (9*Cin, Cout)
    return jnp.transpose(w_oihw, (2, 3, 1, 0)).reshape(
        kh * kw * cin, cout).astype(dtype)


@functools.partial(jax.jit, static_argnames=("matmul_dtype",))
def basic_block_forward(x_nchw, w1_oihw, g1, b1, w2_oihw, g2, b2,
                        matmul_dtype=jnp.float32):
    """BasicBlock forward (stride=1, no downsample), training-mode BN.

    x_nchw: (N, C, H, W) f32; conv weights OIHW; returns NCHW f32.
    matmul_dtype: dtype of the MXU matmul operands (f32 or bf16).  BN stats,
    normalization and the residual path always stay in f32.
    """
    N, C, H, W = x_nchw.shape

    # NCHW -> NHWC (channels on lanes).  Required by the NCHW module API.
    # The reshapes below are free (row-major relabels of the same HBM bytes).
    # TODO(synk): drop both transposes if the caller can use NHWC directly.
    x_nhwc = jnp.transpose(x_nchw, (0, 2, 3, 1)).astype(jnp.float32)
    x_rows = x_nhwc.reshape(N, H * W, C)

    w1m = _im2col_weights(w1_oihw, matmul_dtype)
    w2m = _im2col_weights(w2_oihw, matmul_dtype)

    ones = jnp.ones((1, C), jnp.float32)
    zeros = jnp.zeros((1, C), jnp.float32)
    count = float(N * H * W)

    # Phase 1: conv1 (+ partial BN1 stats), grid over batch.
    y1, st1 = _conv_bn_stats(x_rows, w1m, ones, zeros, N=N, H=H, W=W, C=C,
                             apply_bn_relu=False, compute_dtype=matmul_dtype)
    scale1, shift1 = _fold_bn(st1, g1, b1, count)

    # Phase 2: bn1 + relu + conv2 (+ partial BN2 stats).
    y2, st2 = _conv_bn_stats(y1, w2m, scale1, shift1, N=N, H=H, W=W, C=C,
                             apply_bn_relu=True, compute_dtype=matmul_dtype)
    scale2, shift2 = _fold_bn(st2, g2, b2, count)

    # Phase 3: bn2 + residual + relu on a lane-dense (rows, W*C) layout so the
    # final stores are full-width vst instead of masked C-wide partial stores.
    y2_2d = y2.reshape(N * H, W * C)
    x_2d = x_nhwc.reshape(N * H, W * C)
    sc2 = jnp.tile(scale2, (1, W))          # per-channel params repeated over W
    sh2 = jnp.tile(shift2, (1, W))

    row_block = H if H % 8 == 0 else N * H  # keep (8,128) block rule satisfied
    grid_rows = (N * H) // row_block
    out_2d = pl.pallas_call(
        _bn_add_relu_kernel,
        out_shape=jax.ShapeDtypeStruct((N * H, W * C), jnp.float32),
        grid=(grid_rows,),
        in_specs=[
            pl.BlockSpec((row_block, W * C), lambda i: (i, 0)),
            pl.BlockSpec((row_block, W * C), lambda i: (i, 0)),
            pl.BlockSpec((1, W * C), lambda i: (0, 0)),
            pl.BlockSpec((1, W * C), lambda i: (0, 0)),
        ],
        out_specs=pl.BlockSpec((row_block, W * C), lambda i: (i, 0)),
        compiler_params=pltpu.CompilerParams(
            dimension_semantics=("parallel",)),
    )(y2_2d, x_2d, sc2, sh2)

    out_nhwc = out_2d.reshape(N, H, W, C)
    return jnp.transpose(out_nhwc, (0, 3, 1, 2))   # back to NCHW


def _reference_forward(x, w1, g1, b1, w2, g2, b2):
    """Pure-JAX reference mirroring PyTorch BasicBlock in .train() mode."""
    def conv(xx, ww):
        return jax.lax.conv_general_dilated(
            xx, ww, window_strides=(1, 1), padding=((1, 1), (1, 1)),
            dimension_numbers=('NCHW', 'OIHW', 'NCHW'))

    def bn(y, g, b):
        mean = y.mean(axis=(0, 2, 3), keepdims=True)
        var = ((y - mean) ** 2).mean(axis=(0, 2, 3), keepdims=True)
        return ((y - mean) * jax.lax.rsqrt(var + EPS)
                * g.reshape(1, -1, 1, 1) + b.reshape(1, -1, 1, 1))

    out = jax.nn.relu(bn(conv(x, w1), g1, b1))
    out = bn(conv(out, w2), g2, b2)
    return jax.nn.relu(out + x)


if __name__ == "__main__":
    # Small shapes consistent with BasicBlock(inplanes=planes, stride=1).
    N, C, H, W = 2, 8, 16, 16

    key = jax.random.PRNGKey(0)
    kx, kw1, kw2, kg1, kb1, kg2, kb2 = jax.random.split(key, 7)

    x = jax.random.normal(kx, (N, C, H, W), jnp.float32)
    w1 = jax.random.normal(kw1, (C, C, 3, 3), jnp.float32) * 0.1
    w2 = jax.random.normal(kw2, (C, C, 3, 3), jnp.float32) * 0.1
    g1 = 1.0 + 0.1 * jax.random.normal(kg1, (C,), jnp.float32)
    b1 = 0.1 * jax.random.normal(kb1, (C,), jnp.float32)
    g2 = 1.0 + 0.1 * jax.random.normal(kg2, (C,), jnp.float32)
    b2 = 0.1 * jax.random.normal(kb2, (C,), jnp.float32)

    ref = _reference_forward(x, w1, g1, b1, w2, g2, b2)

    # f32 MXU-operand path: must match the reference tightly.
    out = basic_block_forward(x, w1, g1, b1, w2, g2, b2,
                              matmul_dtype=jnp.float32)
    out = jax.block_until_ready(out)
    assert out.shape == (N, C, H, W)
    err = float(jnp.max(jnp.abs(out - ref)))
    assert jnp.allclose(out, ref, atol=1e-4, rtol=1e-4), err

    # bf16 MXU-operand path: looser tolerance from bf16 input quantization
    # (BN stats / normalization / residual remain f32).
    out_bf16 = basic_block_forward(x, w1, g1, b1, w2, g2, b2,
                                   matmul_dtype=jnp.bfloat16)
    out_bf16 = jax.block_until_ready(out_bf16)
    err_bf16 = float(jnp.max(jnp.abs(out_bf16 - ref)))
    assert jnp.allclose(out_bf16, ref, atol=5e-2, rtol=5e-2), err_bf16

    print("KERNEL_OK")
</pallas_src>

<mosaic_0001>
module attributes {stable_mosaic.version = 11 : i64} {
  func.func @_conv_im2col_kernel(%arg0: i32, %arg1: memref<1x256x8xf32, #tpu.memory_space<vmem>>, %arg2: memref<72x8xf32, #tpu.memory_space<vmem>>, %arg3: memref<1x8xf32, #tpu.memory_space<vmem>>, %arg4: memref<1x8xf32, #tpu.memory_space<vmem>>, %arg5: memref<1x256x8xf32, #tpu.memory_space<vmem>>, %arg6: memref<1x2x8xf32, #tpu.memory_space<vmem>>, %arg7: memref<18x18x8xf32, #tpu.memory_space<vmem>>, %arg8: memref<256x72xf32, #tpu.memory_space<vmem>>) attributes {dimension_semantics = [#tpu.dimension_semantics<parallel>], iteration_bounds = array<i64: 2>, scalar_prefetch = 0 : i64, scratch_operands = 2 : i64, tpu.core_type = #tpu.core_type<tc>, window_params = [{transform_indices = @transform_0, window_bounds = array<i64: 1, 256, 8>}, {pipeline_mode = #tpu.pipeline_mode<synchronous>, transform_indices = @transform_1, window_bounds = array<i64: 72, 8>}, {pipeline_mode = #tpu.pipeline_mode<synchronous>, transform_indices = @transform_2, window_bounds = array<i64: 1, 8>}, {pipeline_mode = #tpu.pipeline_mode<synchronous>, transform_indices = @transform_3, window_bounds = array<i64: 1, 8>}, {transform_indices = @transform_4, window_bounds = array<i64: 1, 256, 8>}, {transform_indices = @transform_5, window_bounds = array<i64: 1, 2, 8>}]} {
    %c0 = arith.constant 0 : index
    %c0_0 = arith.constant 0 : index
    %c0_1 = arith.constant 0 : index
    %0 = vector.load %arg1[%c0, %c0_0, %c0_1] : memref<1x256x8xf32, #tpu.memory_space<vmem>>, vector<1x256x8xf32>
    %1 = vector.shape_cast %0 : vector<1x256x8xf32> to vector<256x8xf32>
    %2 = vector.shape_cast %1 : vector<256x8xf32> to vector<16x16x8xf32>
    %cst = arith.constant 0.000000e+00 : f32
    %3 = vector.broadcast %cst : f32 to vector<1x18x8xf32>
    %c0_2 = arith.constant 0 : index
    %c0_3 = arith.constant 0 : index
    %c0_4 = arith.constant 0 : index
    %4 = vector.load %arg7[%c0_2, %c0_3, %c0_4] : memref<18x18x8xf32, #tpu.memory_space<vmem>>, vector<1x18x8xf32>
    tpu.vector_store %arg7[%c0_2, %c0_3, %c0_4], %3 {strides = array<i32>} : memref<18x18x8xf32, #tpu.memory_space<vmem>>, vector<1x18x8xf32>,
    %cst_5 = arith.constant 0.000000e+00 : f32
    %5 = vector.broadcast %cst_5 : f32 to vector<1x18x8xf32>
    %c17 = arith.constant 17 : index
    %c0_6 = arith.constant 0 : index
    %c0_7 = arith.constant 0 : index
    %6 = vector.load %arg7[%c17, %c0_6, %c0_7] : memref<18x18x8xf32, #tpu.memory_space<vmem>>, vector<1x18x8xf32>
    tpu.vector_store %arg7[%c17, %c0_6, %c0_7], %5 {strides = array<i32>} : memref<18x18x8xf32, #tpu.memory_space<vmem>>, vector<1x18x8xf32>,
    %cst_8 = arith.constant 0.000000e+00 : f32
    %7 = vector.broadcast %cst_8 : f32 to vector<18x1x8xf32>
    %c0_9 = arith.constant 0 : index
    %c0_10 = arith.constant 0 : index
    %c0_11 = arith.constant 0 : index
    %8 = vector.load %arg7[%c0_9, %c0_10, %c0_11] : memref<18x18x8xf32, #tpu.memory_space<vmem>>, vector<18x1x8xf32>
    tpu.vector_store %arg7[%c0_9, %c0_10, %c0_11], %7 {strides = array<i32>} : memref<18x18x8xf32, #tpu.memory_space<vmem>>, vector<18x1x8xf32>,
    %cst_12 = arith.constant 0.000000e+00 : f32
    %9 = vector.broadcast %cst_12 : f32 to vector<18x1x8xf32>
    %c0_13 = arith.constant 0 : index
    %c17_14 = arith.constant 17 : index
    %c0_15 = arith.constant 0 : index
    %10 = vector.load %arg7[%c0_13, %c17_14, %c0_15] : memref<18x18x8xf32, #tpu.memory_space<vmem>>, vector<18x1x8xf32>
    tpu.vector_store %arg7[%c0_13, %c17_14, %c0_15], %9 {strides = array<i32>} : memref<18x18x8xf32, #tpu.memory_space<vmem>>, vector<18x1x8xf32>,
    %c1 = arith.constant 1 : index
    %c1_16 = arith.constant 1 : index
    %c0_17 = arith.constant 0 : index
    %11 = vector.load %arg7[%c1, %c1_16, %c0_17] : memref<18x18x8xf32, #tpu.memory_space<vmem>>, vector<16x16x8xf32>
    tpu.vector_store %arg7[%c1, %c1_16, %c0_17], %2 {strides = array<i32>} : memref<18x18x8xf32, #tpu.memory_space<vmem>>, vector<16x16x8xf32>,
    %c0_18 = arith.constant 0 : index
    %c0_19 = arith.constant 0 : index
    %c0_20 = arith.constant 0 : index
    %12 = vector.load %arg7[%c0_18, %c0_19, %c0_20] : memref<18x18x8xf32, #tpu.memory_space<vmem>>, vector<16x16x8xf32>
    %13 = vector.shape_cast %12 : vector<16x16x8xf32> to vector<256x8xf32>
    %c0_21 = arith.constant 0 : index
    %c0_22 = arith.constant 0 : index
    %14 = vector.load %arg8[%c0_21, %c0_22] : memref<256x72xf32, #tpu.memory_space<vmem>>, vector<256x8xf32>
    tpu.vector_store %arg8[%c0_21, %c0_22], %13 {strides = array<i32>} : memref<256x72xf32, #tpu.memory_space<vmem>>, vector<256x8xf32>,
    %c0_23 = arith.constant 0 : index
    %c1_24 = arith.constant 1 : index
    %c0_25 = arith.constant 0 : index
    %15 = vector.load %arg7[%c0_23, %c1_24, %c0_25] : memref<18x18x8xf32, #tpu.memory_space<vmem>>, vector<16x16x8xf32>
    %16 = vector.shape_cast %15 : vector<16x16x8xf32> to vector<256x8xf32>
    %c0_26 = arith.constant 0 : index
    %c8 = arith.constant 8 : index
    %17 = vector.load %arg8[%c0_26, %c8] : memref<256x72xf32, #tpu.memory_space<vmem>>, vector<256x8xf32>
    tpu.vector_store %arg8[%c0_26, %c8], %16 {strides = array<i32>} : memref<256x72xf32, #tpu.memory_space<vmem>>, vector<256x8xf32>,
    %c0_27 = arith.constant 0 : index
    %c2 = arith.constant 2 : index
    %c0_28 = arith.constant 0 : index
    %18 = vector.load %arg7[%c0_27, %c2, %c0_28] : memref<18x18x8xf32, #tpu.memory_space<vmem>>, vector<16x16x8xf32>
    %19 = vector.shape_cast %18 : vector<16x16x8xf32> to vector<256x8xf32>
    %c0_29 = arith.constant 0 : index
    %c16 = arith.constant 16 : index
    %20 = vector.load %arg8[%c0_29, %c16] : memref<256x72xf32, #tpu.memory_space<vmem>>, vector<256x8xf32>
    tpu.vector_store %arg8[%c0_29, %c16], %19 {strides = array<i32>} : memref<256x72xf32, #tpu.memory_space<vmem>>, vector<256x8xf32>,
    %c1_30 = arith.constant 1 : index
    %c0_31 = arith.constant 0 : index
    %c0_32 = arith.constant 0 : index
    %21 = vector.load %arg7[%c1_30, %c0_31, %c0_32] : memref<18x18x8xf32, #tpu.memory_space<vmem>>, vector<16x16x8xf32>
    %22 = vector.shape_cast %21 : vector<16x16x8xf32> to vector<256x8xf32>
    %c0_33 = arith.constant 0 : index
    %c24 = arith.constant 24 : index
    %23 = vector.load %arg8[%c0_33, %c24] : memref<256x72xf32, #tpu.memory_space<vmem>>, vector<256x8xf32>
    tpu.vector_store %arg8[%c0_33, %c24], %22 {strides = array<i32>} : memref<256x72xf32, #tpu.memory_space<vmem>>, vector<256x8xf32>,
    %c1_34 = arith.constant 1 : index
    %c1_35 = arith.constant 1 : index
    %c0_36 = arith.constant 0 : index
    %24 = vector.load %arg7[%c1_34, %c1_35, %c0_36] : memref<18x18x8xf32, #tpu.memory_space<vmem>>, vector<16x16x8xf32>
    %25 = vector.shape_cast %24 : vector<16x16x8xf32> to vector<256x8xf32>
    %c0_37 = arith.constant 0 : index
    %c32 = arith.constant 32 : index
    %26 = vector.load %arg8[%c0_37, %c32] : memref<256x72xf32, #tpu.memory_space<vmem>>, vector<256x8xf32>
    tpu.vector_store %arg8[%c0_37, %c32], %25 {strides = array<i32>} : memref<256x72xf32, #tpu.memory_space<vmem>>, vector<256x8xf32>,
    %c1_38 = arith.constant 1 : index
    %c2_39 = arith.constant 2 : index
    %c0_40 = arith.constant 0 : index
    %27 = vector.load %arg7[%c1_38, %c2_39, %c0_40] : memref<18x18x8xf32, #tpu.memory_space<vmem>>, vector<16x16x8xf32>
    %28 = vector.shape_cast %27 : vector<16x16x8xf32> to vector<256x8xf32>
    %c0_41 = arith.constant 0 : index
    %c40 = arith.constant 40 : index
    %29 = vector.load %arg8[%c0_41, %c40] : memref<256x72xf32, #tpu.memory_space<vmem>>, vector<256x8xf32>
    tpu.vector_store %arg8[%c0_41, %c40], %28 {strides = array<i32>} : memref<256x72xf32, #tpu.memory_space<vmem>>, vector<256x8xf32>,
    %c2_42 = arith.constant 2 : index
    %c0_43 = arith.constant 0 : index
    %c0_44 = arith.constant 0 : index
    %30 = vector.load %arg7[%c2_42, %c0_43, %c0_44] : memref<18x18x8xf32, #tpu.memory_space<vmem>>, vector<16x16x8xf32>
    %31 = vector.shape_cast %30 : vector<16x16x8xf32> to vector<256x8xf32>
    %c0_45 = arith.constant 0 : index
    %c48 = arith.constant 48 : index
    %32 = vector.load %arg8[%c0_45, %c48] : memref<256x72xf32, #tpu.memory_space<vmem>>, vector<256x8xf32>
    tpu.vector_store %arg8[%c0_45, %c48], %31 {strides = array<i32>} : memref<256x72xf32, #tpu.memory_space<vmem>>, vector<256x8xf32>,
    %c2_46 = arith.constant 2 : index
    %c1_47 = arith.constant 1 : index
    %c0_48 = arith.constant 0 : index
    %33 = vector.load %arg7[%c2_46, %c1_47, %c0_48] : memref<18x18x8xf32, #tpu.memory_space<vmem>>, vector<16x16x8xf32>
    %34 = vector.shape_cast %33 : vector<16x16x8xf32> to vector<256x8xf32>
    %c0_49 = arith.constant 0 : index
    %c56 = arith.constant 56 : index
    %35 = vector.load %arg8[%c0_49, %c56] : memref<256x72xf32, #tpu.memory_space<vmem>>, vector<256x8xf32>
    tpu.vector_store %arg8[%c0_49, %c56], %34 {strides = array<i32>} : memref<256x72xf32, #tpu.memory_space<vmem>>, vector<256x8xf32>,
    %c2_50 = arith.constant 2 : index
    %c2_51 = arith.constant 2 : index
    %c0_52 = arith.constant 0 : index
    %36 = vector.load %arg7[%c2_50, %c2_51, %c0_52] : memref<18x18x8xf32, #tpu.memory_space<vmem>>, vector<16x16x8xf32>
    %37 = vector.shape_cast %36 : vector<16x16x8xf32> to vector<256x8xf32>
    %c0_53 = arith.constant 0 : index
    %c64 = arith.constant 64 : index
    %38 = vector.load %arg8[%c0_53, %c64] : memref<256x72xf32, #tpu.memory_space<vmem>>, vector<256x8xf32>
    tpu.vector_store %arg8[%c0_53, %c64], %37 {strides = array<i32>} : memref<256x72xf32, #tpu.memory_space<vmem>>, vector<256x8xf32>,
    %c0_54 = arith.constant 0 : index
    %c0_55 = arith.constant 0 : index
    %39 = vector.load %arg8[%c0_54, %c0_55] : memref<256x72xf32, #tpu.memory_space<vmem>>, vector<256x72xf32>
    %c0_56 = arith.constant 0 : index
    %c0_57 = arith.constant 0 : index
    %40 = vector.load %arg2[%c0_56, %c0_57] : memref<72x8xf32, #tpu.memory_space<vmem>>, vector<72x8xf32>
    %cst_58 = arith.constant dense<0.000000e+00> : vector<256x8xf32>
    %41 = tpu.matmul %39, %40, %cst_58 {dimension_numbers = #tpu.dot_dimension_numbers<[1], [0], [0], [1], [0, 0, 1, 1], [], []>} : vector<256x72xf32>, vector<72x8xf32>, vector<256x8xf32> -> vector<256x8xf32>
    %c0_59 = arith.constant 0 : index
    %c0_60 = arith.constant 0 : index
    %c0_61 = arith.constant 0 : index
    %42 = vector.load %arg5[%c0_59, %c0_60, %c0_61] : memref<1x256x8xf32, #tpu.memory_space<vmem>>, vector<1x256x8xf32>
    %43 = vector.shape_cast %42 : vector<1x256x8xf32> to vector<256x8xf32>
    %44 = vector.shape_cast %41 : vector<256x8xf32> to vector<1x256x8xf32>
    tpu.vector_store %arg5[%c0_59, %c0_60, %c0_61], %44 {strides = array<i32>} : memref<1x256x8xf32, #tpu.memory_space<vmem>>, vector<1x256x8xf32>,
    %cst_62 = arith.constant dense<0.000000e+00> : vector<8xf32>
    %45 = vector.multi_reduction <add>, %41, %cst_62 [0] : vector<256x8xf32> to vector<8xf32>
    %46 = vector.shape_cast %45 : vector<8xf32> to vector<1x8xf32>
    %47 = vector.shape_cast %46 : vector<1x8xf32> to vector<1x1x8xf32>
    %c0_63 = arith.constant 0 : index
    %c0_64 = arith.constant 0 : index
    %c0_65 = arith.constant 0 : index
    %48 = vector.load %arg6[%c0_63, %c0_64, %c0_65] : memref<1x2x8xf32, #tpu.memory_space<vmem>>, vector<1x1x8xf32>
    tpu.vector_store %arg6[%c0_63, %c0_64, %c0_65], %47 {strides = array<i32>} : memref<1x2x8xf32, #tpu.memory_space<vmem>>, vector<1x1x8xf32>,
    %49 = arith.mulf %41, %41 : vector<256x8xf32>
    %cst_66 = arith.constant dense<0.000000e+00> : vector<8xf32>
    %50 = vector.multi_reduction <add>, %49, %cst_66 [0] : vector<256x8xf32> to vector<8xf32>
    %51 = vector.shape_cast %50 : vector<8xf32> to vector<1x8xf32>
    %52 = vector.shape_cast %51 : vector<1x8xf32> to vector<1x1x8xf32>
    %c0_67 = arith.constant 0 : index
    %c1_68 = arith.constant 1 : index
    %c0_69 = arith.constant 0 : index
    %53 = vector.load %arg6[%c0_67, %c1_68, %c0_69] : memref<1x2x8xf32, #tpu.memory_space<vmem>>, vector<1x1x8xf32>
    tpu.vector_store %arg6[%c0_67, %c1_68, %c0_69], %52 {strides = array<i32>} : memref<1x2x8xf32, #tpu.memory_space<vmem>>, vector<1x1x8xf32>,
    return
  }
  func.func @transform_0(%arg0: i32) -> (i32, i32, i32) {
    %c0_i32 = arith.constant 0 : i32
    %c0_i32_0 = arith.constant 0 : i32
    %c0_i32_1 = arith.constant 0 : i32
    return %arg0, %c0_i32, %c0_i32_0 : i32, i32, i32
  }
  func.func @transform_1(%arg0: i32) -> (i32, i32) {
    %c0_i32 = arith.constant 0 : i32
    %c0_i32_0 = arith.constant 0 : i32
    %c0_i32_1 = arith.constant 0 : i32
    return %c0_i32, %c0_i32_0 : i32, i32
  }
  func.func @transform_2(%arg0: i32) -> (i32, i32) {
    %c0_i32 = arith.constant 0 : i32
    %c0_i32_0 = arith.constant 0 : i32
    %c0_i32_1 = arith.constant 0 : i32
    return %c0_i32, %c0_i32_0 : i32, i32
  }
  func.func @transform_3(%arg0: i32) -> (i32, i32) {
    %c0_i32 = arith.constant 0 : i32
    %c0_i32_0 = arith.constant 0 : i32
    %c0_i32_1 = arith.constant 0 : i32
    return %c0_i32, %c0_i32_0 : i32, i32
  }
  func.func @transform_4(%arg0: i32) -> (i32, i32, i32) {
    %c0_i32 = arith.constant 0 : i32
    %c0_i32_0 = arith.constant 0 : i32
    %c0_i32_1 = arith.constant 0 : i32
    return %arg0, %c0_i32, %c0_i32_0 : i32, i32, i32
  }
  func.func @transform_5(%arg0: i32) -> (i32, i32, i32) {
    %c0_i32 = arith.constant 0 : i32
    %c0_i32_0 = arith.constant 0 : i32
    %c0_i32_1 = arith.constant 0 : i32
    return %arg0, %c0_i32, %c0_i32_0 : i32, i32, i32
  }
}

module attributes {stable_mosaic.version = 11 : i64} {
  func.func @_conv_im2col_kernel(%arg0: i32, %arg1: memref<1x256x8xf32, #tpu.memory_space<vmem>>, %arg2: memref<72x8xf32, #tpu.memory_space<vmem>>, %arg3: memref<1x8xf32, #tpu.memory_space<vmem>>, %arg4: memref<1x8xf32, #tpu.memory_space<vmem>>, %arg5: memref<1x256x8xf32, #tpu.memory_space<vmem>>, %arg6: memref<1x2x8xf32, #tpu.memory_space<vmem>>, %arg7: memref<18x18x8xf32, #tpu.memory_space<vmem>>, %arg8: memref<256x72xf32, #tpu.memory_space<vmem>>) attributes {dimension_semantics = [#tpu.dimension_semantics<parallel>], iteration_bounds = array<i64: 2>, scalar_prefetch = 0 : i64, scratch_operands = 2 : i64, tpu.core_type = #tpu.core_type<tc>, window_params = [{transform_indices = @transform_0, window_bounds = array<i64: 1, 256, 8>}, {pipeline_mode = #tpu.pipeline_mode<synchronous>, transform_indices = @transform_1, window_bounds = array<i64: 72, 8>}, {pipeline_mode = #tpu.pipeline_mode<synchronous>, transform_indices = @transform_2, window_bounds = array<i64: 1, 8>}, {pipeline_mode = #tpu.pipeline_mode<synchronous>, transform_indices = @transform_3, window_bounds = array<i64: 1, 8>}, {transform_indices = @transform_4, window_bounds = array<i64: 1, 256, 8>}, {transform_indices = @transform_5, window_bounds = array<i64: 1, 2, 8>}]} {
    %c0 = arith.constant 0 : index
    %c0_0 = arith.constant 0 : index
    %c0_1 = arith.constant 0 : index
    %0 = vector.load %arg1[%c0, %c0_0, %c0_1] : memref<1x256x8xf32, #tpu.memory_space<vmem>>, vector<1x256x8xf32>
    %1 = vector.shape_cast %0 : vector<1x256x8xf32> to vector<256x8xf32>
    %c0_2 = arith.constant 0 : index
    %c0_3 = arith.constant 0 : index
    %2 = vector.load %arg3[%c0_2, %c0_3] : memref<1x8xf32, #tpu.memory_space<vmem>>, vector<1x8xf32>
    %3 = vector.broadcast %2 : vector<1x8xf32> to vector<256x8xf32>
    %4 = arith.mulf %1, %3 : vector<256x8xf32>
    %c0_4 = arith.constant 0 : index
    %c0_5 = arith.constant 0 : index
    %5 = vector.load %arg4[%c0_4, %c0_5] : memref<1x8xf32, #tpu.memory_space<vmem>>, vector<1x8xf32>
    %6 = vector.broadcast %5 : vector<1x8xf32> to vector<256x8xf32>
    %7 = arith.addf %4, %6 : vector<256x8xf32>
    %cst = arith.constant 0.000000e+00 : f32
    %8 = vector.broadcast %cst : f32 to vector<256x8xf32>
    %9 = arith.maximumf %7, %8 : vector<256x8xf32>
    %10 = vector.shape_cast %9 : vector<256x8xf32> to vector<16x16x8xf32>
    %cst_6 = arith.constant 0.000000e+00 : f32
    %11 = vector.broadcast %cst_6 : f32 to vector<1x18x8xf32>
    %c0_7 = arith.constant 0 : index
    %c0_8 = arith.constant 0 : index
    %c0_9 = arith.constant 0 : index
    %12 = vector.load %arg7[%c0_7, %c0_8, %c0_9] : memref<18x18x8xf32, #tpu.memory_space<vmem>>, vector<1x18x8xf32>
    tpu.vector_store %arg7[%c0_7, %c0_8, %c0_9], %11 {strides = array<i32>} : memref<18x18x8xf32, #tpu.memory_space<vmem>>, vector<1x18x8xf32>,
    %cst_10 = arith.constant 0.000000e+00 : f32
    %13 = vector.broadcast %cst_10 : f32 to vector<1x18x8xf32>
    %c17 = arith.constant 17 : index
    %c0_11 = arith.constant 0 : index
    %c0_12 = arith.constant 0 : index
    %14 = vector.load %arg7[%c17, %c0_11, %c0_12] : memref<18x18x8xf32, #tpu.memory_space<vmem>>, vector<1x18x8xf32>
    tpu.vector_store %arg7[%c17, %c0_11, %c0_12], %13 {strides = array<i32>} : memref<18x18x8xf32, #tpu.memory_space<vmem>>, vector<1x18x8xf32>,
    %cst_13 = arith.constant 0.000000e+00 : f32
    %15 = vector.broadcast %cst_13 : f32 to vector<18x1x8xf32>
    %c0_14 = arith.constant 0 : index
    %c0_15 = arith.constant 0 : index
    %c0_16 = arith.constant 0 : index
    %16 = vector.load %arg7[%c0_14, %c0_15, %c0_16] : memref<18x18x8xf32, #tpu.memory_space<vmem>>, vector<18x1x8xf32>
    tpu.vector_store %arg7[%c0_14, %c0_15, %c0_16], %15 {strides = array<i32>} : memref<18x18x8xf32, #tpu.memory_space<vmem>>, vector<18x1x8xf32>,
    %cst_17 = arith.constant 0.000000e+00 : f32
    %17 = vector.broadcast %cst_17 : f32 to vector<18x1x8xf32>
    %c0_18 = arith.constant 0 : index
    %c17_19 = arith.constant 17 : index
    %c0_20 = arith.constant 0 : index
    %18 = vector.load %arg7[%c0_18, %c17_19, %c0_20] : memref<18x18x8xf32, #tpu.memory_space<vmem>>, vector<18x1x8xf32>
    tpu.vector_store %arg7[%c0_18, %c17_19, %c0_20], %17 {strides = array<i32>} : memref<18x18x8xf32, #tpu.memory_space<vmem>>, vector<18x1x8xf32>,
    %c1 = arith.constant 1 : index
    %c1_21 = arith.constant 1 : index
    %c0_22 = arith.constant 0 : index
    %19 = vector.load %arg7[%c1, %c1_21, %c0_22] : memref<18x18x8xf32, #tpu.memory_space<vmem>>, vector<16x16x8xf32>
    tpu.vector_store %arg7[%c1, %c1_21, %c0_22], %10 {strides = array<i32>} : memref<18x18x8xf32, #tpu.memory_space<vmem>>, vector<16x16x8xf32>,
    %c0_23 = arith.constant 0 : index
    %c0_24 = arith.constant 0 : index
    %c0_25 = arith.constant 0 : index
    %20 = vector.load %arg7[%c0_23, %c0_24, %c0_25] : memref<18x18x8xf32, #tpu.memory_space<vmem>>, vector<16x16x8xf32>
    %21 = vector.shape_cast %20 : vector<16x16x8xf32> to vector<256x8xf32>
    %c0_26 = arith.constant 0 : index
    %c0_27 = arith.constant 0 : index
    %22 = vector.load %arg8[%c0_26, %c0_27] : memref<256x72xf32, #tpu.memory_space<vmem>>, vector<256x8xf32>
    tpu.vector_store %arg8[%c0_26, %c0_27], %21 {strides = array<i32>} : memref<256x72xf32, #tpu.memory_space<vmem>>, vector<256x8xf32>,
    %c0_28 = arith.constant 0 : index
    %c1_29 = arith.constant 1 : index
    %c0_30 = arith.constant 0 : index
    %23 = vector.load %arg7[%c0_28, %c1_29, %c0_30] : memref<18x18x8xf32, #tpu.memory_space<vmem>>, vector<16x16x8xf32>
    %24 = vector.shape_cast %23 : vector<16x16x8xf32> to vector<256x8xf32>
    %c0_31 = arith.constant 0 : index
    %c8 = arith.constant 8 : index
    %25 = vector.load %arg8[%c0_31, %c8] : memref<256x72xf32, #tpu.memory_space<vmem>>, vector<256x8xf32>
    tpu.vector_store %arg8[%c0_31, %c8], %24 {strides = array<i32>} : memref<256x72xf32, #tpu.memory_space<vmem>>, vector<256x8xf32>,
    %c0_32 = arith.constant 0 : index
    %c2 = arith.constant 2 : index
    %c0_33 = arith.constant 0 : index
    %26 = vector.load %arg7[%c0_32, %c2, %c0_33] : memref<18x18x8xf32, #tpu.memory_space<vmem>>, vector<16x16x8xf32>
    %27 = vector.shape_cast %26 : vector<16x16x8xf32> to vector<256x8xf32>
    %c0_34 = arith.constant 0 : index
    %c16 = arith.constant 16 : index
    %28 = vector.load %arg8[%c0_34, %c16] : memref<256x72xf32, #tpu.memory_space<vmem>>, vector<256x8xf32>
    tpu.vector_store %arg8[%c0_34, %c16], %27 {strides = array<i32>} : memref<256x72xf32, #tpu.memory_space<vmem>>, vector<256x8xf32>,
    %c1_35 = arith.constant 1 : index
    %c0_36 = arith.constant 0 : index
    %c0_37 = arith.constant 0 : index
    %29 = vector.load %arg7[%c1_35, %c0_36, %c0_37] : memref<18x18x8xf32, #tpu.memory_space<vmem>>, vector<16x16x8xf32>
    %30 = vector.shape_cast %29 : vector<16x16x8xf32> to vector<256x8xf32>
    %c0_38 = arith.constant 0 : index
    %c24 = arith.constant 24 : index
    %31 = vector.load %arg8[%c0_38, %c24] : memref<256x72xf32, #tpu.memory_space<vmem>>, vector<256x8xf32>
    tpu.vector_store %arg8[%c0_38, %c24], %30 {strides = array<i32>} : memref<256x72xf32, #tpu.memory_space<vmem>>, vector<256x8xf32>,
    %c1_39 = arith.constant 1 : index
    %c1_40 = arith.constant 1 : index
    %c0_41 = arith.constant 0 : index
    %32 = vector.load %arg7[%c1_39, %c1_40, %c0_41] : memref<18x18x8xf32, #tpu.memory_space<vmem>>, vector<16x16x8xf32>
    %33 = vector.shape_cast %32 : vector<16x16x8xf32> to vector<256x8xf32>
    %c0_42 = arith.constant 0 : index
    %c32 = arith.constant 32 : index
    %34 = vector.load %arg8[%c0_42, %c32] : memref<256x72xf32, #tpu.memory_space<vmem>>, vector<256x8xf32>
    tpu.vector_store %arg8[%c0_42, %c32], %33 {strides = array<i32>} : memref<256x72xf32, #tpu.memory_space<vmem>>, vector<256x8xf32>,
    %c1_43 = arith.constant 1 : index
    %c2_44 = arith.constant 2 : index
    %c0_45 = arith.constant 0 : index
    %35 = vector.load %arg7[%c1_43, %c2_44, %c0_45] : memref<18x18x8xf32, #tpu.memory_space<vmem>>, vector<16x16x8xf32>
    %36 = vector.shape_cast %35 : vector<16x16x8xf32> to vector<256x8xf32>
    %c0_46 = arith.constant 0 : index
    %c40 = arith.constant 40 : index
    %37 = vector.load %arg8[%c0_46, %c40] : memref<256x72xf32, #tpu.memory_space<vmem>>, vector<256x8xf32>
    tpu.vector_store %arg8[%c0_46, %c40], %36 {strides = array<i32>} : memref<256x72xf32, #tpu.memory_space<vmem>>, vector<256x8xf32>,
    %c2_47 = arith.constant 2 : index
    %c0_48 = arith.constant 0 : index
    %c0_49 = arith.constant 0 : index
    %38 = vector.load %arg7[%c2_47, %c0_48, %c0_49] : memref<18x18x8xf32, #tpu.memory_space<vmem>>, vector<16x16x8xf32>
    %39 = vector.shape_cast %38 : vector<16x16x8xf32> to vector<256x8xf32>
    %c0_50 = arith.constant 0 : index
    %c48 = arith.constant 48 : index
    %40 = vector.load %arg8[%c0_50, %c48] : memref<256x72xf32, #tpu.memory_space<vmem>>, vector<256x8xf32>
    tpu.vector_store %arg8[%c0_50, %c48], %39 {strides = array<i32>} : memref<256x72xf32, #tpu.memory_space<vmem>>, vector<256x8xf32>,
    %c2_51 = arith.constant 2 : index
    %c1_52 = arith.constant 1 : index
    %c0_53 = arith.constant 0 : index
    %41 = vector.load %arg7[%c2_51, %c1_52, %c0_53] : memref<18x18x8xf32, #tpu.memory_space<vmem>>, vector<16x16x8xf32>
    %42 = vector.shape_cast %41 : vector<16x16x8xf32> to vector<256x8xf32>
    %c0_54 = arith.constant 0 : index
    %c56 = arith.constant 56 : index
    %43 = vector.load %arg8[%c0_54, %c56] : memref<256x72xf32, #tpu.memory_space<vmem>>, vector<256x8xf32>
    tpu.vector_store %arg8[%c0_54, %c56], %42 {strides = array<i32>} : memref<256x72xf32, #tpu.memory_space<vmem>>, vector<256x8xf32>,
    %c2_55 = arith.constant 2 : index
    %c2_56 = arith.constant 2 : index
    %c0_57 = arith.constant 0 : index
    %44 = vector.load %arg7[%c2_55, %c2_56, %c0_57] : memref<18x18x8xf32, #tpu.memory_space<vmem>>, vector<16x16x8xf32>
    %45 = vector.shape_cast %44 : vector<16x16x8xf32> to vector<256x8xf32>
    %c0_58 = arith.constant 0 : index
    %c64 = arith.constant 64 : index
    %46 = vector.load %arg8[%c0_58, %c64] : memref<256x72xf32, #tpu.memory_space<vmem>>, vector<256x8xf32>
    tpu.vector_store %arg8[%c0_58, %c64], %45 {strides = array<i32>} : memref<256x72xf32, #tpu.memory_space<vmem>>, vector<256x8xf32>,
    %c0_59 = arith.constant 0 : index
    %c0_60 = arith.constant 0 : index
    %47 = vector.load %arg8[%c0_59, %c0_60] : memref<256x72xf32, #tpu.memory_space<vmem>>, vector<256x72xf32>
    %c0_61 = arith.constant 0 : index
    %c0_62 = arith.constant 0 : index
    %48 = vector.load %arg2[%c0_61, %c0_62] : memref<72x8xf32, #tpu.memory_space<vmem>>, vector<72x8xf32>
    %cst_63 = arith.constant dense<0.000000e+00> : vector<256x8xf32>
    %49 = tpu.matmul %47, %48, %cst_63 {dimension_numbers = #tpu.dot_dimension_numbers<[1], [0], [0], [1], [0, 0, 1, 1], [], []>} : vector<256x72xf32>, vector<72x8xf32>, vector<256x8xf32> -> vector<256x8xf32>
    %c0_64 = arith.constant 0 : index
    %c0_65 = arith.constant 0 : index
    %c0_66 = arith.constant 0 : index
    %50 = vector.load %arg5[%c0_64, %c0_65, %c0_66] : memref<1x256x8xf32, #tpu.memory_space<vmem>>, vector<1x256x8xf32>
    %51 = vector.shape_cast %50 : vector<1x256x8xf32> to vector<256x8xf32>
    %52 = vector.shape_cast %49 : vector<256x8xf32> to vector<1x256x8xf32>
    tpu.vector_store %arg5[%c0_64, %c0_65, %c0_66], %52 {strides = array<i32>} : memref<1x256x8xf32, #tpu.memory_space<vmem>>, vector<1x256x8xf32>,
    %cst_67 = arith.constant dense<0.000000e+00> : vector<8xf32>
    %53 = vector.multi_reduction <add>, %49, %cst_67 [0] : vector<256x8xf32> to vector<8xf32>
    %54 = vector.shape_cast %53 : vector<8xf32> to vector<1x8xf32>
    %55 = vector.shape_cast %54 : vector<1x8xf32> to vector<1x1x8xf32>
    %c0_68 = arith.constant 0 : index
    %c0_69 = arith.constant 0 : index
    %c0_70 = arith.constant 0 : index
    %56 = vector.load %arg6[%c0_68, %c0_69, %c0_70] : memref<1x2x8xf32, #tpu.memory_space<vmem>>, vector<1x1x8xf32>
    tpu.vector_store %arg6[%c0_68, %c0_69, %c0_70], %55 {strides = array<i32>} : memref<1x2x8xf32, #tpu.memory_space<vmem>>, vector<1x1x8xf32>,
    %57 = arith.mulf %49, %49 : vector<256x8xf32>
    %cst_71 = arith.constant dense<0.000000e+00> : vector<8xf32>
    %58 = vector.multi_reduction <add>, %57, %cst_71 [0] : vector<256x8xf32> to vector<8xf32>
    %59 = vector.shape_cast %58 : vector<8xf32> to vector<1x8xf32>
    %60 = vector.shape_cast %59 : vector<1x8xf32> to vector<1x1x8xf32>
    %c0_72 = arith.constant 0 : index
    %c1_73 = arith.constant 1 : index
    %c0_74 = arith.constant 0 : index
    %61 = vector.load %arg6[%c0_72, %c1_73, %c0_74] : memref<1x2x8xf32, #tpu.memory_space<vmem>>, vector<1x1x8xf32>
    tpu.vector_store %arg6[%c0_72, %c1_73, %c0_74], %60 {strides = array<i32>} : memref<1x2x8xf32, #tpu.memory_space<vmem>>, vector<1x1x8xf32>,
    return
  }
  func.func @transform_0(%arg0: i32) -> (i32, i32, i32) {
    %c0_i32 = arith.constant 0 : i32
    %c0_i32_0 = arith.constant 0 : i32
    %c0_i32_1 = arith.constant 0 : i32
    return %arg0, %c0_i32, %c0_i32_0 : i32, i32, i32
  }
  func.func @transform_1(%arg0: i32) -> (i32, i32) {
    %c0_i32 = arith.constant 0 : i32
    %c0_i32_0 = arith.constant 0 : i32
    %c0_i32_1 = arith.constant 0 : i32
    return %c0_i32, %c0_i32_0 : i32, i32
  }
  func.func @transform_2(%arg0: i32) -> (i32, i32) {
    %c0_i32 = arith.constant 0 : i32
    %c0_i32_0 = arith.constant 0 : i32
    %c0_i32_1 = arith.constant 0 : i32
    return %c0_i32, %c0_i32_0 : i32, i32
  }
  func.func @transform_3(%arg0: i32) -> (i32, i32) {
    %c0_i32 = arith.constant 0 : i32
    %c0_i32_0 = arith.constant 0 : i32
    %c0_i32_1 = arith.constant 0 : i32
    return %c0_i32, %c0_i32_0 : i32, i32
  }
  func.func @transform_4(%arg0: i32) -> (i32, i32, i32) {
    %c0_i32 = arith.constant 0 : i32
    %c0_i32_0 = arith.constant 0 : i32
    %c0_i32_1 = arith.constant 0 : i32
    return %arg0, %c0_i32, %c0_i32_0 : i32, i32, i32
  }
  func.func @transform_5(%arg0: i32) -> (i32, i32, i32) {
    %c0_i32 = arith.constant 0 : i32
    %c0_i32_0 = arith.constant 0 : i32
    %c0_i32_1 = arith.constant 0 : i32
    return %arg0, %c0_i32, %c0_i32_0 : i32, i32, i32
  }
}

module attributes {stable_mosaic.version = 11 : i64} {
  func.func @_bn_add_relu_kernel(%arg0: i32, %arg1: memref<16x128xf32, #tpu.memory_space<vmem>>, %arg2: memref<16x128xf32, #tpu.memory_space<vmem>>, %arg3: memref<1x128xf32, #tpu.memory_space<vmem>>, %arg4: memref<1x128xf32, #tpu.memory_space<vmem>>, %arg5: memref<16x128xf32, #tpu.memory_space<vmem>>) attributes {dimension_semantics = [#tpu.dimension_semantics<parallel>], iteration_bounds = array<i64: 2>, scalar_prefetch = 0 : i64, scratch_operands = 0 : i64, tpu.core_type = #tpu.core_type<tc>, window_params = [{transform_indices = @transform_0, window_bounds = array<i64: 16, 128>}, {transform_indices = @transform_1, window_bounds = array<i64: 16, 128>}, {pipeline_mode = #tpu.pipeline_mode<synchronous>, transform_indices = @transform_2, window_bounds = array<i64: 1, 128>}, {pipeline_mode = #tpu.pipeline_mode<synchronous>, transform_indices = @transform_3, window_bounds = array<i64: 1, 128>}, {transform_indices = @transform_4, window_bounds = array<i64: 16, 128>}]} {
    %c0 = arith.constant 0 : index
    %c0_0 = arith.constant 0 : index
    %0 = vector.load %arg1[%c0, %c0_0] : memref<16x128xf32, #tpu.memory_space<vmem>>, vector<16x128xf32>
    %c0_1 = arith.constant 0 : index
    %c0_2 = arith.constant 0 : index
    %1 = vector.load %arg3[%c0_1, %c0_2] : memref<1x128xf32, #tpu.memory_space<vmem>>, vector<1x128xf32>
    %2 = vector.broadcast %1 : vector<1x128xf32> to vector<16x128xf32>
    %3 = arith.mulf %0, %2 : vector<16x128xf32>
    %c0_3 = arith.constant 0 : index
    %c0_4 = arith.constant 0 : index
    %4 = vector.load %arg4[%c0_3, %c0_4] : memref<1x128xf32, #tpu.memory_space<vmem>>, vector<1x128xf32>
    %5 = vector.broadcast %4 : vector<1x128xf32> to vector<16x128xf32>
    %6 = arith.addf %3, %5 : vector<16x128xf32>
    %c0_5 = arith.constant 0 : index
    %c0_6 = arith.constant 0 : index
    %7 = vector.load %arg2[%c0_5, %c0_6] : memref<16x128xf32, #tpu.memory_space<vmem>>, vector<16x128xf32>
    %8 = arith.addf %6, %7 : vector<16x128xf32>
    %cst = arith.constant 0.000000e+00 : f32
    %9 = vector.broadcast %cst : f32 to vector<16x128xf32>
    %10 = arith.maximumf %8, %9 : vector<16x128xf32>
    %c0_7 = arith.constant 0 : index
    %c0_8 = arith.constant 0 : index
    %11 = vector.load %arg5[%c0_7, %c0_8] : memref<16x128xf32, #tpu.memory_space<vmem>>, vector<16x128xf32>
    tpu.vector_store %arg5[%c0_7, %c0_8], %10 {strides = array<i32>} : memref<16x128xf32, #tpu.memory_space<vmem>>, vector<16x128xf32>,
    return
  }
  func.func @transform_0(%arg0: i32) -> (i32, i32) {
    %c0_i32 = arith.constant 0 : i32
    %c0_i32_0 = arith.constant 0 : i32
    return %arg0, %c0_i32 : i32, i32
  }
  func.func @transform_1(%arg0: i32) -> (i32, i32) {
    %c0_i32 = arith.constant 0 : i32
    %c0_i32_0 = arith.constant 0 : i32
    return %arg0, %c0_i32 : i32, i32
  }
  func.func @transform_2(%arg0: i32) -> (i32, i32) {
    %c0_i32 = arith.constant 0 : i32
    %c0_i32_0 = arith.constant 0 : i32
    %c0_i32_1 = arith.constant 0 : i32
    return %c0_i32, %c0_i32_0 : i32, i32
  }
  func.func @transform_3(%arg0: i32) -> (i32, i32) {
    %c0_i32 = arith.constant 0 : i32
    %c0_i32_0 = arith.constant 0 : i32
    %c0_i32_1 = arith.constant 0 : i32
    return %c0_i32, %c0_i32_0 : i32, i32
  }
  func.func @transform_4(%arg0: i32) -> (i32, i32) {
    %c0_i32 = arith.constant 0 : i32
    %c0_i32_0 = arith.constant 0 : i32
    return %arg0, %c0_i32 : i32, i32
  }
}

</mosaic_0001>

<bundles_post_ra>
// kernel: basic_block_forward.5
= control target key start
LH: loop header
LB: loop body
LE: loop exit
PB: predicated region body
PF: predicated region fallthrough
CT: control target
= control target key end

     0   :  { %s369_s15 = smov 0   ;;  %s395_s0 = inlined_call_operand.vmem [shape: f32[32,128], index: 0, kind: input, shape index: {}]   ;;  %s396_s1 = inlined_call_operand.vmem [shape: f32[32,128], index: 1, kind: input, shape index: {}]   ;;  %s397_s2 = inlined_call_operand.vmem [shape: f32[1,128], index: 2, kind: input, shape index: {}]   ;;  %s398_s3 = inlined_call_operand.vmem [shape: f32[1,128], index: 3, kind: input, shape index: {}]   ;;  %s399_s4 = inlined_call_operand.vmem [shape: f32[32,128], index: 4, kind: output, shape index: {}]  }
   0x1 LB: > { %s313_s16 = sadd.s32 4294967295, %s342_s15   ;;  %p317_p0 = scmp.ge.s32.totalorder %s342_s15, 1  ;;  %s342_s15 = sphi %s369_s15, %s14_s15  }
   0x2   : > { %p174_p1 = scmp.lt.s32.totalorder %s342_s15, 3 }
   0x4   : > { %p175_p2 = pnand %p317_p0, %p174_p1 }
   0x5   : > { %s318_s17 = sshll.u32 (!%p175_p2), %s313_s16, 1 }
   0x6   : > { %178 = sbr.rel (%p175_p2) target bundleno = 25 (0x19), region = 36  ;;  %p206_p3 = scmp.lt.s32.totalorder (!%p175_p2), %s318_s17, 3 }
   0xb   : > { %s401_s17 = smov (!%p206_p3, %s318_s17), 3  ;;  %v334_v0 = vld [vmem:[%s397_s2] ss:$0 sm:$0xff] }
   0xc   : > { %s319_s20 = sshll.u32 %s401_s17, 3  ;;  %v335_v1 = vld [vmem:[%s398_s3] ss:$0 sm:$0xff] }
   0xd   : > { %s209_s23 = scalar_lea.vmem %s395_s0, %s319_s20  ;;  %s215_s26 = scalar_lea.vmem %s396_s1, %s319_s20 }
   0xe   : > { %v223_v2 = vld [vmem:[%s209_s23] sm:$0xff]  ;;  %v224_v3 = vld [vmem:[%s209_s23 + $0x8] sm:$0xff]  ;;  %s221_s5 = scalar_lea.vmem %s399_s4, %s319_s20 }
   0xf   : > { %v229_v4 = vmul.f32 %v334_v0, %v223_v2  ;;  %v230_v5 = vmul.f32 %v334_v0, %v224_v3  ;;  %v237_v6 = vld [vmem:[%s215_s26] sm:$0xff]  ;;  %v238_v7 = vld [vmem:[%s215_s26 + $0x8] sm:$0xff] }
  0x11   : > { %v235_v8 = vadd.f32 %v335_v1, %v229_v4  ;;  %v236_v9 = vadd.f32 %v335_v1, %v230_v5 }
  0x13   : > { %v239_v10 = vadd.f32 %v237_v6, %v235_v8  ;;  %v240_v11 = vadd.f32 %v238_v7, %v236_v9 }
  0x15   : > { %v241_v12 = vmax.f32 %v239_v10, 0.0  ;;  %v242_v13 = vmax.f32 %v240_v11, 0.0 }
  0x17   : > { %243 = vst [vmem:[%s221_s5] sm:$0xff] %v241_v12 }
  0x18   : > { %244 = vst [vmem:[%s221_s5 + $0x8] sm:$0xff] %v242_v13 }
  0x19 PF: > { %s14_s15 = sadd.s32 1, %s342_s15  }
  0x1a   : > { %p11_p4 = scmp.ge.s32.totalorder %s14_s15, 4  }
  0x1c   :  { %13 = sbr.rel (!%p11_p4) target bundleno = 1 (0x1), region = 69 }

// kernel: basic_block_forward.3
= control target key start
LH: loop header
LB: loop body
LE: loop exit
PB: predicated region body
PF: predicated region fallthrough
CT: control target
= control target key end

     0   :  { %s2634_s18 = smov 0   ;;  %s3944_s0 = inlined_call_operand.vmem [shape: f32[2,256,8], index: 0, kind: input, shape index: {}]   ;;  %s3945_s1 = inlined_call_operand.vmem [shape: f32[72,8], index: 1, kind: input, shape index: {}]   ;;  %s3946_s2 = inlined_call_operand.vmem [shape: f32[1,8], index: 2, kind: input, shape index: {}]   ;;  %s3947_s3 = inlined_call_operand.vmem [shape: f32[1,8], index: 3, kind: input, shape index: {}]   ;;  %s3948_s4 = inlined_call_operand.vmem [shape: f32[2,256,8], index: 4, kind: output, shape index: {0}]   ;;  %s3949_s5 = inlined_call_operand.vmem [shape: f32[2,2,8], index: 5, kind: output, shape index: {1}]  }
   0x1 LB: > { %s2497_s2 = sadd.s32 4294967295, %s2593_s18   ;;  %p2501_p0 = scmp.ge.s32.totalorder %s2593_s18, 1  ;;  %s2593_s18 = sphi %s2634_s18, %s16_s18  }
   0x2   : > { %p190_p1 = scmp.lt.s32.totalorder %s2593_s18, 3 }
   0x4   : > { %p191_p2 = pnand %p2501_p0, %p190_p1 }
   0x6   : > { %194 = sbr.rel (%p191_p2) target bundleno = 1004 (0x3ec), region = 36 }
   0xb   : > { %vm268_vm0 = vcmask 64512   ;;  %v2595_v0 = vmov 0.0   ;;  %vm277_vm1 = vcmask 57344   ;;  %s2596_s3 = smov 8   ;;  %p222_p3 = scmp.lt.s32.totalorder %s2497_s2, 1  ;;  %vm271_vm2 = vcmask 58368  }
   0xc   : > { %269 = vst.msk [vmem:[#allocation2] sm:$0xff] %vm268_vm0, %v2595_v0  ;;  %vm571_vm3 = vcmask 130112   ;;  %s2597_s23 = smov 16   ;;  %s2598_s24 = smov 24   ;;  %vm764_vm4 = vcmask 195712   ;;  %vm957_vm5 = vcmask 261312  }
   0xd   : > { %270 = vst.msk [vmem:[#allocation2 + $0x8] sm:$0xff] %vm268_vm0, %v2595_v0  ;;  %s4044_s2 = smov (!%p222_p3, %s2497_s2), 1  ;;  %s2599_s25 = smov 32   ;;  %vm1150_vm6 = vcmask 326912   ;;  %vm1343_vm7 = vcmask 392512   ;;  %vm1537_vm8 = vcmask 458112  }
   0xe   : > { %278 = vst.msk [vmem:[#allocation2] sm:$0x1] %vm277_vm1, %v2595_v0  ;;  %s2541_s19 = sshll.u32 %s4044_s2, 8  ;;  %s2600_s26 = smov 40   ;;  %vm1730_vm9 = vcmask 523712   ;;  %vm1923_vm10 = vcmask 589312  }
   0xf   : > { %274 = vst.msk [vmem:[#allocation2 + $0x198] sm:$0xff] %vm268_vm0, %v2595_v0  ;;  %s2687_s22 = scalar_lea.vmem %s3944_s0, %s2541_s19  ;;  %s2601_s27 = smov 56   ;;  %vm1997_vm11 = vcmask 588800  }
  0x10   : > { %275 = vst.msk [vmem:[#allocation2 + $0x1a0] sm:$0xff] %vm268_vm0, %v2595_v0  ;;  %v236_v2 = vld [vmem:[%s2687_s22] sm:$0xff]  ;;  %v237_v3 = vld [vmem:[%s2687_s22 + $0x8] sm:$0xff]  ;;  %v238_v6 = vld [vmem:[%s2687_s22 + $0x10] sm:$0xff]  ;;  %s2602_s28 = smov 64   ;;  %s2603_s29 = smov 48  }
  0x11   : > { %279 = vst.msk [vmem:[#allocation2 + $0x18] sm:$0x1] %vm277_vm1, %v2595_v0  ;;  %v240_v4 = vld [vmem:[%s2687_s22 + $0x20] sm:$0xff]  ;;  %v241_v5 = vld [vmem:[%s2687_s22 + $0x28] sm:$0xff]  ;;  %v243_v8 = vld [vmem:[%s2687_s22 + $0x38] sm:$0xff]  ;;  %s3669_s30 = scalar_lea.vmem %s3948_s4, %s2541_s19  ;;  %s2506_s19 = sshll.u32 %s4044_s2, 1 }
  0x12   : > { %280 = vst.msk [vmem:[#allocation2 + $0x30] sm:$0x1] %vm277_vm1, %v2595_v0  ;;  %v244_v9 = vld [vmem:[%s2687_s22 + $0x40] sm:$0xff]  ;;  %v239_v11 = vld [vmem:[%s2687_s22 + $0x18] sm:$0xff]  ;;  %v246_v12 = vld [vmem:[%s2687_s22 + $0x50] sm:$0xff] }
  0x13   : > { %281 = vst.msk [vmem:[#allocation2 + $0x48] sm:$0x1] %vm277_vm1, %v2595_v0  ;;  %v247_v13 = vld [vmem:[%s2687_s22 + $0x58] sm:$0xff]  ;;  %v242_v14 = vld [vmem:[%s2687_s22 + $0x30] sm:$0xff]  ;;  %v249_v16 = vld [vmem:[%s2687_s22 + $0x68] sm:$0xff] }
  0x14   : > { %v411_v1 = vld [vmem:[#allocation2 + $0x1] sm:$0xff]  ;;  %282 = vst.msk [vmem:[#allocation2 + $0x60] sm:$0x1] %vm277_vm1, %v2595_v0  ;;  %v250_v17 = vld [vmem:[%s2687_s22 + $0x70] sm:$0xff]  ;;  %v255_v24 = vld [vmem:[%s2687_s22 + $0x98] sm:$0xff] }
  0x15   : > { %475 = vrot.lane.b32.xlu0 %v411_v1, %s2596_s3  ;;  %283 = vst.msk [vmem:[#allocation2 + $0x78] sm:$0x1] %vm277_vm1, %v2595_v0  ;;  %v245_v19 = vld [vmem:[%s2687_s22 + $0x48] sm:$0xff]  ;;  %v252_v21 = vld [vmem:[%s2687_s22 + $0x80] sm:$0xff]  ;;  %v251_v29 = vld [vmem:[%s2687_s22 + $0x78] sm:$0xff] }
  0x16   : > { %284 = vst.msk [vmem:[#allocation2 + $0x90] sm:$0x1] %vm277_vm1, %v2595_v0  ;;  %v253_v22 = vld [vmem:[%s2687_s22 + $0x88] sm:$0xff]  ;;  %v248_v23 = vld [vmem:[%s2687_s22 + $0x60] sm:$0xff]  ;;  %v258_v30 = vld [vmem:[%s2687_s22 + $0xb0] sm:$0xff] }
  0x17   : > { %285 = vst.msk [vmem:[#allocation2 + $0xa8] sm:$0x1] %vm277_vm1, %v2595_v0  ;;  %v256_v28 = vld [vmem:[%s2687_s22 + $0xa0] sm:$0xff]  ;;  %v259_v34 = vld [vmem:[%s2687_s22 + $0xb8] sm:$0xff]  ;;  %v254_v35 = vld [vmem:[%s2687_s22 + $0x90] sm:$0xff] }
  0x18   : > { %286 = vst.msk [vmem:[#allocation2 + $0xc0] sm:$0x1] %vm277_vm1, %v2595_v0  ;;  %v261_v36 = vld [vmem:[%s2687_s22 + $0xc8] sm:$0xff]  ;;  %v262_v40 = vld [vmem:[%s2687_s22 + $0xd0] sm:$0xff]  ;;  %v264_v42 = vld [vmem:[%s2687_s22 + $0xe0] sm:$0xff] }
  0x19   : > { %287 = vst.msk [vmem:[#allocation2 + $0xd8] sm:$0x1] %vm277_vm1, %v2595_v0  ;;  %v257_v41 = vld [vmem:[%s2687_s22 + $0xa8] sm:$0xff]  ;;  %v260_v47 = vld [vmem:[%s2687_s22 + $0xc0] sm:$0xff]  ;;  %v263_v51 = vld [vmem:[%s2687_s22 + $0xd8] sm:$0xff] }
  0x1a   : > { %288 = vst.msk [vmem:[#allocation2 + $0xf0] sm:$0x1] %vm277_vm1, %v2595_v0  ;;  %v265_v46 = vld [vmem:[%s2687_s22 + $0xe8] sm:$0xff]  ;;  %v347_v62 = vld [vmem:[#allocation2] sm:$0xff] }
  0x1b   : > { %289 = vst.msk [vmem:[#allocation2 + $0x108] sm:$0x1] %vm277_vm1, %v2595_v0 }
  0x1c   : > { %290 = vst.msk [vmem:[#allocation2 + $0x120] sm:$0x1] %vm277_vm1, %v2595_v0 }
  0x1d   : > { %291 = vst.msk [vmem:[#allocation2 + $0x138] sm:$0x1] %vm277_vm1, %v2595_v0 }
  0x1e   : > { %292 = vst.msk [vmem:[#allocation2 + $0x150] sm:$0x1] %vm277_vm1, %v2595_v0 }
  0x1f   : > { %293 = vst.msk [vmem:[#allocation2 + $0x168] sm:$0x1] %vm277_vm1, %v2595_v0 }
  0x20   : > { %294 = vst.msk [vmem:[#allocation2 + $0x180] sm:$0x1] %vm277_vm1, %v2595_v0 }
  0x21   : > { %297 = vst.msk [vmem:[#allocation2 + $0x29] sm:$0x1] %vm277_vm1, %v2595_v0 }
  0x22   : > { %298 = vst.msk [vmem:[#allocation2 + $0x41] sm:$0x1] %vm277_vm1, %v2595_v0 }
  0x23   : > { %299 = vst.msk [vmem:[#allocation2 + $0x59] sm:$0x1] %vm277_vm1, %v2595_v0 }
  0x24   : > { %300 = vst.msk [vmem:[#allocation2 + $0x71] sm:$0x1] %vm277_vm1, %v2595_v0 }
  0x25   : > { %301 = vst.msk [vmem:[#allocation2 + $0x89] sm:$0x1] %vm277_vm1, %v2595_v0 }
  0x26   : > { %302 = vst.msk [vmem:[#allocation2 + $0xa1] sm:$0x1] %vm277_vm1, %v2595_v0 }
  0x27   : > { %303 = vst.msk [vmem:[#allocation2 + $0xb9] sm:$0x1] %vm277_vm1, %v2595_v0 }
  0x28   : > { %304 = vst.msk [vmem:[#allocation2 + $0xd1] sm:$0x1] %vm277_vm1, %v2595_v0 }
  0x29   : > { %305 = vst.msk [vmem:[#allocation2 + $0xe9] sm:$0x1] %vm277_vm1, %v2595_v0 }
  0x2a   : > { %306 = vst.msk [vmem:[#allocation2 + $0x101] sm:$0x1] %vm277_vm1, %v2595_v0 }
  0x2b   : > { %307 = vst.msk [vmem:[#allocation2 + $0x119] sm:$0x1] %vm277_vm1, %v2595_v0 }
  0x2c   : > { %308 = vst.msk [vmem:[#allocation2 + $0x131] sm:$0x1] %vm277_vm1, %v2595_v0 }
  0x2d   : > { %309 = vst.msk [vmem:[#allocation2 + $0x149] sm:$0x1] %vm277_vm1, %v2595_v0 }
  0x2e   : > { %310 = vst.msk [vmem:[#allocation2 + $0x161] sm:$0x1] %vm277_vm1, %v2595_v0 }
  0x2f   : > { %311 = vst.msk [vmem:[#allocation2 + $0x179] sm:$0x1] %vm277_vm1, %v2595_v0 }
  0x30   : > { %312 = vst.msk [vmem:[#allocation2 + $0x191] sm:$0x1] %vm277_vm1, %v2595_v0 }
  0x31   : > { %315 = vst.msk [vmem:[#allocation2 + $0x19] sm:$0xff] %vm268_vm0, %v236_v2 }
  0x32   : > { %295 = vst.msk [vmem:[#allocation2 + $0x198] sm:$0x1] %vm277_vm1, %v2595_v0 }
  0x33   : > { %272 = vst.msk [vmem:[#allocation2 + $0x10] sm:$0x3] %vm271_vm2, %v2595_v0 }
  0x34   : > { %276 = vst.msk [vmem:[#allocation2 + $0x1a8] sm:$0x3] %vm271_vm2, %v2595_v0 }
  0x35   : > { %296 = vst.msk [vmem:[#allocation2 + $0x11] sm:$0x1] %vm277_vm1, %v2595_v0 }
  0x36   : > { %316 = vst.msk [vmem:[#allocation2 + $0x21] sm:$0xff] %vm268_vm0, %v237_v3 }
  0x37   : > { %313 = vst.msk [vmem:[#allocation2 + $0x1a9] sm:$0x1] %vm277_vm1, %v2595_v0 }
  0x38   : > { %v2704_v7 = vld [vmem:[#allocation2 + $0x19] sm:$0xff]  ;;  %319 = vst.msk [vmem:[#allocation2 + $0x49] sm:$0xff] %vm268_vm0, %v240_v4 }
  0x39   : > { %479 = vrot.lane.b32.xlu1 %v2704_v7, %s2596_s3  ;;  %320 = vst.msk [vmem:[#allocation2 + $0x51] sm:$0xff] %vm268_vm0, %v241_v5  ;;  %v2884_v3 = vld [vmem:[#allocation2 + $0x18] sm:$0xff]  ;;  %v348_v5 = vld [vmem:[#allocation2 + $0x8] sm:$0xff] }
  0x3a   : > { %v412_v10 = vld [vmem:[#allocation2 + $0x9] sm:$0xff]  ;;  %317 = vst.msk [vmem:[#allocation2 + $0x31] sm:$0xff] %vm268_vm0, %v238_v6 }
  0x3b   : > { %477 = vrot.lane.b32.xlu0 %v412_v10, %s2596_s3  ;;  %322 = vst.msk [vmem:[#allocation2 + $0x69] sm:$0xff] %vm268_vm0, %v243_v8  ;;  %v604_v8 = vld [vmem:[#allocation2 + $0x2] sm:$0xff] }
  0x3c   : > { %323 = vst.msk [vmem:[#allocation2 + $0x79] sm:$0xff] %vm268_vm0, %v244_v9  ;;  %v605_v2 = vld [vmem:[#allocation2 + $0xa] sm:$0xff] }
  0x3d   : > { %318 = vst.msk [vmem:[#allocation2 + $0x39] sm:$0xff] %vm268_vm0, %v239_v11  ;;  %v2721_v15 = vld [vmem:[#allocation2 + $0x21] sm:$0xff] }
  0x3e   : > { %325 = vst.msk [vmem:[#allocation2 + $0x91] sm:$0xff] %vm268_vm0, %v246_v12  ;;  %v2893_v6 = vld [vmem:[#allocation2 + $0x1a] sm:$0xff] }
  0x3f   : > { %326 = vst.msk [vmem:[#allocation2 + $0x99] sm:$0xff] %vm268_vm0, %v247_v13  ;;  %v2727_v18 = vld [vmem:[#allocation2 + $0x49] sm:$0xff]  ;;  %v2901_v10 = vld [vmem:[#allocation2 + $0x20] sm:$0xff] }
  0x40   : > { %321 = vst.msk [vmem:[#allocation2 + $0x61] sm:$0xff] %vm268_vm0, %v242_v14  ;;  %v2748_v25 = vld [vmem:[#allocation2 + $0x51] sm:$0xff]  ;;  %v2909_v12 = vld [vmem:[#allocation2 + $0x48] sm:$0xff] }
  0x41   : > { %481 = vrot.lane.b32.xlu1 %v2721_v15, %s2596_s3  ;;  %v2733_v20 = vld [vmem:[#allocation2 + $0x31] sm:$0xff]  ;;  %328 = vst.msk [vmem:[#allocation2 + $0xb1] sm:$0xff] %vm268_vm0, %v249_v16  ;;  %v2917_v14 = vld [vmem:[#allocation2 + $0x22] sm:$0xff] }
  0x42   : > { %483 = vrot.lane.b32.xlu2 %v2733_v20, %s2596_s3  ;;  %329 = vst.msk [vmem:[#allocation2 + $0xc1] sm:$0xff] %vm268_vm0, %v250_v17  ;;  %v2754_v27 = vld [vmem:[#allocation2 + $0x69] sm:$0xff]  ;;  %v2919_v16 = vld [vmem:[#allocation2 + $0x52] sm:$0xff] }
  0x43   : > { %487 = vrot.lane.b32.xlu0 %v2727_v18, %s2596_s3  ;;  %324 = vst.msk [vmem:[#allocation2 + $0x81] sm:$0xff] %vm268_vm0, %v245_v19  ;;  %v2768_v31 = vld [vmem:[#allocation2 + $0x79] sm:$0xff]  ;;  %v2870_v61 = vld [vmem:[#allocation2 + $0x30] sm:$0xff] }
  0x44   : > { %331 = vst.msk [vmem:[#allocation2 + $0xd9] sm:$0xff] %vm268_vm0, %v252_v21  ;;  %v2751_v26 = vld [vmem:[#allocation2 + $0x39] sm:$0xff]  ;;  %v2925_v17 = vld [vmem:[#allocation2 + $0x50] sm:$0xff] }
  0x45   : > { %332 = vst.msk [vmem:[#allocation2 + $0xe1] sm:$0xff] %vm268_vm0, %v253_v22  ;;  %v2772_v33 = vld [vmem:[#allocation2 + $0x91] sm:$0xff]  ;;  %v2913_v13 = vld [vmem:[#allocation2 + $0x3a] sm:$0xff] }
  0x46   : > { %327 = vst.msk [vmem:[#allocation2 + $0xa9] sm:$0xff] %vm268_vm0, %v248_v23  ;;  %v2786_v37 = vld [vmem:[#allocation2 + $0x99] sm:$0xff] }
  0x47   : > { %334 = vst.msk [vmem:[#allocation2 + $0xf9] sm:$0xff] %vm268_vm0, %v255_v24  ;;  %v2770_v32 = vld [vmem:[#allocation2 + $0x61] sm:$0xff]  ;;  %v2889_v4 = vld [vmem:[#allocation2 + $0x38] sm:$0xff]  ;;  %v2940_v24 = vld [vmem:[#allocation2 + $0x4a] sm:$0xff] }
  0x48   : > { %335 = vst.msk [vmem:[#allocation2 + $0x109] sm:$0xff] %vm268_vm0, %v256_v28  ;;  %v2790_v39 = vld [vmem:[#allocation2 + $0xb1] sm:$0xff]  ;;  %v2907_v11 = vld [vmem:[#allocation2 + $0x60] sm:$0xff]  ;;  %v2933_v22 = vld [vmem:[#allocation2 + $0x68] sm:$0xff] }
  0x49   : > { %489 = vrot.lane.b32.xlu1 %v2748_v25, %s2596_s3  ;;  %330 = vst.msk [vmem:[#allocation2 + $0xc9] sm:$0xff] %vm268_vm0, %v251_v29  ;;  %v2804_v43 = vld [vmem:[#allocation2 + $0xc1] sm:$0xff]  ;;  %v2896_v9 = vld [vmem:[#allocation2 + $0x32] sm:$0xff] }
  0x4a   : > { %485 = vrot.lane.b32.xlu2 %v2751_v26, %s2596_s3  ;;  %337 = vst.msk [vmem:[#allocation2 + $0x121] sm:$0xff] %vm268_vm0, %v258_v30  ;;  %v2788_v38 = vld [vmem:[#allocation2 + $0x81] sm:$0xff]  ;;  %v2950_v29 = vld [vmem:[#allocation2 + $0x78] sm:$0xff] }
  0x4b   : > { %493 = vrot.lane.b32.xlu0 %v2754_v27, %s2596_s3  ;;  %338 = vst.msk [vmem:[#allocation2 + $0x129] sm:$0xff] %vm268_vm0, %v259_v34  ;;  %v2808_v45 = vld [vmem:[#allocation2 + $0xd9] sm:$0xff]  ;;  %v2936_v23 = vld [vmem:[#allocation2 + $0x62] sm:$0xff] }
  0x4c   : > { %333 = vst.msk [vmem:[#allocation2 + $0xf1] sm:$0xff] %vm268_vm0, %v254_v35  ;;  %v2820_v48 = vld [vmem:[#allocation2 + $0xe1] sm:$0xff]  ;;  %v2958_v35 = vld [vmem:[#allocation2 + $0x90] sm:$0xff] }
  0x4d   : > { %340 = vst.msk [vmem:[#allocation2 + $0x141] sm:$0xff] %vm268_vm0, %v261_v36  ;;  %v2806_v44 = vld [vmem:[#allocation2 + $0xa9] sm:$0xff]  ;;  %v2931_v21 = vld [vmem:[#allocation2 + $0x80] sm:$0xff] }
  0x4e   : > { %341 = vst.msk [vmem:[#allocation2 + $0x151] sm:$0xff] %vm268_vm0, %v262_v40  ;;  %v2824_v50 = vld [vmem:[#allocation2 + $0xf9] sm:$0xff]  ;;  %v2956_v34 = vld [vmem:[#allocation2 + $0xa8] sm:$0xff] }
  0x4f   : > { %336 = vst.msk [vmem:[#allocation2 + $0x111] sm:$0xff] %vm268_vm0, %v257_v41  ;;  %v2834_v52 = vld [vmem:[#allocation2 + $0x109] sm:$0xff]  ;;  %v2944_v28 = vld [vmem:[#allocation2 + $0x7a] sm:$0xff] }
  0x50   : > { %343 = vst.msk [vmem:[#allocation2 + $0x169] sm:$0xff] %vm268_vm0, %v264_v42  ;;  %v2822_v49 = vld [vmem:[#allocation2 + $0xc9] sm:$0xff]  ;;  %v2969_v41 = vld [vmem:[#allocation2 + $0x9a] sm:$0xff] }
  0x51   : > { %495 = vrot.lane.b32.xlu1 %v2768_v31, %s2596_s3  ;;  %344 = vst.msk [vmem:[#allocation2 + $0x171] sm:$0xff] %vm268_vm0, %v265_v46  ;;  %v2838_v54 = vld [vmem:[#allocation2 + $0x121] sm:$0xff]  ;;  %v2965_v40 = vld [vmem:[#allocation2 + $0x6a] sm:$0xff]  ;;  %v2975_v42 = vld [vmem:[#allocation2 + $0x98] sm:$0xff] }
  0x52   : > { %491 = vrot.lane.b32.xlu2 %v2770_v32, %s2596_s3  ;;  %339 = vst.msk [vmem:[#allocation2 + $0x139] sm:$0xff] %vm268_vm0, %v260_v47  ;;  %v2846_v55 = vld [vmem:[#allocation2 + $0x129] sm:$0xff] }
  0x53   : > { %499 = vrot.lane.b32.xlu0 %v2772_v33, %s2596_s3  ;;  %342 = vst.msk [vmem:[#allocation2 + $0x159] sm:$0xff] %vm268_vm0, %v263_v51  ;;  %v2836_v53 = vld [vmem:[#allocation2 + $0xf1] sm:$0xff]  ;;  %v2961_v36 = vld [vmem:[#allocation2 + $0x82] sm:$0xff] }
  0x54   : > { %v2850_v57 = vld [vmem:[#allocation2 + $0x141] sm:$0xff]  ;;  %383 = vst.msk [vmem:[#allocation3 + $0x20] sm:$0xff] %vm268_vm0, %v2870_v61 }
  0x55   : > { %v2858_v58 = vld [vmem:[#allocation2 + $0x151] sm:$0xff]  ;;  %379 = vst.msk [vmem:[#allocation3] sm:$0xff] %vm268_vm0, %v347_v62  ;;  %v2982_v51 = vld [vmem:[#allocation2 + $0xc8] sm:$0xff] }
  0x56   : > { %v2848_v56 = vld [vmem:[#allocation2 + $0x111] sm:$0xff]  ;;  %3981 = vst [vmem:[#allocation4_spill] sm:$0xff] %v2858_v58 }
  0x57   : > { %v2862_v60 = vld [vmem:[#allocation2 + $0x169] sm:$0xff]  ;;  %381 = vst.msk [vmem:[#allocation3 + $0x10] sm:$0xff] %vm268_vm0, %v2884_v3 }
  0x58   : > { %v2875_v63 = vld [vmem:[#allocation2 + $0x171] sm:$0xff]  ;;  %384 = vst.msk [vmem:[#allocation3 + $0x28] sm:$0xff] %vm268_vm0, %v2889_v4 }
  0x59   : > { %501 = vrot.lane.b32.xlu1 %v2786_v37, %s2596_s3  ;;  %v2860_v59 = vld [vmem:[#allocation2 + $0x139] sm:$0xff]  ;;  %3982 = vst [vmem:[#allocation5_spill] sm:$0xff] %v2875_v63 }
  0x5a   : > { %497 = vrot.lane.b32.xlu2 %v2788_v38, %s2596_s3  ;;  %v2877_v0 = vld [vmem:[#allocation2 + $0x159] sm:$0xff]  ;;  %3983 = vst [vmem:[#allocation6_spill] sm:$0xff] %v2893_v6 }
  0x5b   : > { %505 = vrot.lane.b32.xlu0 %v2790_v39, %s2596_s3  ;;  %380 = vst.msk [vmem:[#allocation3 + $0x8] sm:$0xff] %vm268_vm0, %v348_v5  ;;  %v2990_v5 = vld [vmem:[#allocation2 + $0x92] sm:$0xff] }
  0x5c   : > { %3984 = vst [vmem:[#allocation7_spill] sm:$0xff] %v2896_v9 }
  0x5d   : > { %382 = vst.msk [vmem:[#allocation3 + $0x18] sm:$0xff] %vm268_vm0, %v2901_v10 }
  0x5e   : > { %387 = vst.msk [vmem:[#allocation3 + $0x40] sm:$0xff] %vm268_vm0, %v2907_v11 }
  0x5f   : > { %3985 = vst [vmem:[#allocation8_spill] sm:$0xff] %v2913_v13 }
  0x60   : > { %385 = vst.msk [vmem:[#allocation3 + $0x30] sm:$0xff] %vm268_vm0, %v2909_v12 }
  0x61   : > { %507 = vrot.lane.b32.xlu1 %v2804_v43, %s2596_s3  ;;  %3986 = vst [vmem:[#allocation9_spill] sm:$0xff] %v2917_v14 }
  0x62   : > { %503 = vrot.lane.b32.xlu2 %v2806_v44, %s2596_s3  ;;  %3987 = vst [vmem:[#allocation10_spill] sm:$0xff] %v2919_v16 }
  0x63   : > { %511 = vrot.lane.b32.xlu0 %v2808_v45, %s2596_s3  ;;  %386 = vst.msk [vmem:[#allocation3 + $0x38] sm:$0xff] %vm268_vm0, %v2925_v17 }
  0x64   : > { %3988 = vst [vmem:[#allocation11_spill] sm:$0xff] %v2936_v23 }
  0x65   : > { %390 = vst.msk [vmem:[#allocation3 + $0x58] sm:$0xff] %vm268_vm0, %v2931_v21 }
  0x66   : > { %3989 = vst [vmem:[#allocation12_spill] sm:$0xff] %v2940_v24 }
  0x67   : > { %388 = vst.msk [vmem:[#allocation3 + $0x48] sm:$0xff] %vm268_vm0, %v2933_v22 }
  0x68   : > { %3990 = vst [vmem:[#allocation13_spill] sm:$0xff] %v2944_v28 }
  0x69   : > { %513 = vrot.lane.b32.xlu1 %v2820_v48, %s2596_s3  ;;  %389 = vst.msk [vmem:[#allocation3 + $0x50] sm:$0xff] %vm268_vm0, %v2950_v29 }
  0x6a   : > { %509 = vrot.lane.b32.xlu2 %v2822_v49, %s2596_s3  ;;  %3991 = vst [vmem:[#allocation14_spill] sm:$0xff] %v2961_v36 }
  0x6b   : > { %517 = vrot.lane.b32.xlu0 %v2824_v50, %s2596_s3  ;;  %393 = vst.msk [vmem:[#allocation3 + $0x70] sm:$0xff] %vm268_vm0, %v2956_v34 }
  0x6c   : > { %3992 = vst [vmem:[#allocation15_spill] sm:$0xff] %v2965_v40 }
  0x6d   : > { %391 = vst.msk [vmem:[#allocation3 + $0x60] sm:$0xff] %vm268_vm0, %v2958_v35 }
  0x6e   : > { %3993 = vst [vmem:[#allocation16_spill] sm:$0xff] %v2969_v41 }
  0x6f   : > { %392 = vst.msk [vmem:[#allocation3 + $0x68] sm:$0xff] %vm268_vm0, %v2975_v42 }
  0x70   : > { %3995 = vst [vmem:[#allocation18_spill] sm:$0xff] %v2990_v5 }
  0x71   : > { %519 = vrot.lane.b32.xlu1 %v2834_v52, %s2596_s3  ;;  %396 = vst.msk [vmem:[#allocation3 + $0x88] sm:$0xff] %vm268_vm0, %v2982_v51 }
  0x72   : > { %515 = vrot.lane.b32.xlu2 %v2836_v53, %s2596_s3 }
  0x73   : > { %523 = vrot.lane.b32.xlu0 %v2838_v54, %s2596_s3 }
  0x79   : > { %525 = vrot.lane.b32.xlu1 %v2846_v55, %s2596_s3 }
  0x7a   : > { %521 = vrot.lane.b32.xlu2 %v2848_v56, %s2596_s3 }
  0x7b   : > { %529 = vrot.lane.b32.xlu0 %v2850_v57, %s2596_s3 }
  0x81   : > { %531 = vrot.lane.b32.xlu1 %v2858_v58, %s2596_s3 }
  0x82   : > { %527 = vrot.lane.b32.xlu2 %v2860_v59, %s2596_s3 }
  0x83   : > { %535 = vrot.lane.b32.xlu0 %v2862_v60, %s2596_s3 }
  0x87   : > { %v476_v1 = vpop.permute.xlu0 %475 }
  0x88   : > { %572 = vst.msk [vmem:[#allocation3] sm:$0xff] %vm571_vm3, %v476_v1  ;;  %v2985_v1 = vld [vmem:[#allocation2 + $0xb0] sm:$0xff] }
  0x89   : > { %537 = vrot.lane.b32.xlu1 %v2875_v63, %s2596_s3  ;;  %394 = vst.msk [vmem:[#allocation3 + $0x78] sm:$0xff] %vm268_vm0, %v2985_v1 }
  0x8a   : > { %533 = vrot.lane.b32.xlu2 %v2877_v0, %s2596_s3 }
  0x8b   : > { %670 = vrot.lane.b32.xlu0 %v605_v2, %s2597_s23  ;;  %v2988_v2 = vld [vmem:[#allocation2 + $0xaa] sm:$0xff] }
  0x8c   : > { %3994 = vst [vmem:[#allocation17_spill] sm:$0xff] %v2988_v2 }
  0x91   : > { %672 = vrot.lane.b32.xlu1 %v2893_v6, %s2597_s23 }
  0x92   : > { %668 = vrot.lane.b32.xlu2 %v604_v8, %s2597_s23  ;;  %v2994_v8 = vld [vmem:[#allocation2 + $0xc2] sm:$0xff] }
  0x93   : > { %676 = vrot.lane.b32.xlu0 %v2896_v9, %s2597_s23  ;;  %3996 = vst [vmem:[#allocation19_spill] sm:$0xff] %v2994_v8  ;;  %v3098_v9 = vld [vmem:[#allocation2 + $0x122] sm:$0xff] }
  0x94   : > { %4007 = vst [vmem:[#allocation30_spill] sm:$0xff] %v3098_v9 }
  0x99   : > { %678 = vrot.lane.b32.xlu1 %v2913_v13, %s2597_s23 }
  0x9a   : > { %674 = vrot.lane.b32.xlu2 %v2917_v14, %s2597_s23  ;;  %v3117_v14 = vld [vmem:[#allocation2 + $0x168] sm:$0xff] }
  0x9b   : > { %682 = vrot.lane.b32.xlu0 %v2919_v16, %s2597_s23  ;;  %v3071_v16 = vld [vmem:[#allocation2 + $0xfa] sm:$0xff]  ;;  %409 = vst.msk [vmem:[#allocation3 + $0xf0] sm:$0xff] %vm268_vm0, %v3117_v14 }
  0x9c   : > { %v484_v19 = vpop.permute.xlu2 %483  ;;  %4004 = vst [vmem:[#allocation27_spill] sm:$0xff] %v3071_v16 }
  0x9d   : > { %576 = vst.msk [vmem:[#allocation3 + $0x20] sm:$0xff] %vm571_vm3, %v484_v19  ;;  %v3002_v19 = vld [vmem:[#allocation2 + $0xc0] sm:$0xff] }
  0x9e   : > { %395 = vst.msk [vmem:[#allocation3 + $0x80] sm:$0xff] %vm268_vm0, %v3002_v19 }
  0xa1   : > { %684 = vrot.lane.b32.xlu1 %v2936_v23, %s2597_s23 }
  0xa2   : > { %680 = vrot.lane.b32.xlu2 %v2940_v24, %s2597_s23  ;;  %v3090_v24 = vld [vmem:[#allocation2 + $0x158] sm:$0xff] }
  0xa3   : > { %688 = vrot.lane.b32.xlu0 %v2944_v28, %s2597_s23  ;;  %v3044_v28 = vld [vmem:[#allocation2 + $0xda] sm:$0xff]  ;;  %408 = vst.msk [vmem:[#allocation3 + $0xe8] sm:$0xff] %vm268_vm0, %v3090_v24 }
  0xa4   : > { %v486_v30 = vpop.permute.xlu2 %485  ;;  %4001 = vst [vmem:[#allocation24_spill] sm:$0xff] %v3044_v28 }
  0xa5   : > { %577 = vst.msk [vmem:[#allocation3 + $0x28] sm:$0xff] %vm571_vm3, %v486_v30 }
  0xa9   : > { %690 = vrot.lane.b32.xlu1 %v2961_v36, %s2597_s23  ;;  %v3015_v36 = vld [vmem:[#allocation2 + $0xca] sm:$0xff] }
  0xaa   : > { %686 = vrot.lane.b32.xlu2 %v2965_v40, %s2597_s23  ;;  %3997 = vst [vmem:[#allocation20_spill] sm:$0xff] %v3015_v36  ;;  %v3063_v40 = vld [vmem:[#allocation2 + $0x138] sm:$0xff] }
  0xab   : > { %694 = vrot.lane.b32.xlu0 %v2969_v41, %s2597_s23  ;;  %v480_v46 = vpop.permute.xlu1 %479  ;;  %v3017_v41 = vld [vmem:[#allocation2 + $0xb2] sm:$0xff]  ;;  %405 = vst.msk [vmem:[#allocation3 + $0xd0] sm:$0xff] %vm268_vm0, %v3063_v40 }
  0xac   : > { %574 = vst.msk [vmem:[#allocation3 + $0x10] sm:$0xff] %vm571_vm3, %v480_v46  ;;  %v492_v47 = vpop.permute.xlu2 %491 }
  0xad   : > { %v478_v62 = vpop.permute.xlu0 %477  ;;  %580 = vst.msk [vmem:[#allocation3 + $0x40] sm:$0xff] %vm571_vm3, %v492_v47  ;;  %v3009_v47 = vld [vmem:[#allocation2 + $0xf0] sm:$0xff] }
  0xae   : > { %573 = vst.msk [vmem:[#allocation3 + $0x8] sm:$0xff] %vm571_vm3, %v478_v62 }
  0xaf   : > { %3998 = vst [vmem:[#allocation21_spill] sm:$0xff] %v3017_v41 }
  0xb0   : > { %399 = vst.msk [vmem:[#allocation3 + $0xa0] sm:$0xff] %vm268_vm0, %v3009_v47 }
  0xb1   : > { %696 = vrot.lane.b32.xlu1 %v2988_v2, %s2597_s23  ;;  %v3012_v2 = vld [vmem:[#allocation2 + $0xd8] sm:$0xff] }
  0xb2   : > { %692 = vrot.lane.b32.xlu2 %v2990_v5, %s2597_s23  ;;  %397 = vst.msk [vmem:[#allocation3 + $0x90] sm:$0xff] %vm268_vm0, %v3012_v2  ;;  %v3036_v5 = vld [vmem:[#allocation2 + $0x110] sm:$0xff] }
  0xb3   : > { %700 = vrot.lane.b32.xlu0 %v2994_v8, %s2597_s23  ;;  %v482_v30 = vpop.permute.xlu1 %481  ;;  %v3021_v8 = vld [vmem:[#allocation2 + $0xe2] sm:$0xff]  ;;  %402 = vst.msk [vmem:[#allocation3 + $0xb8] sm:$0xff] %vm268_vm0, %v3036_v5 }
  0xb4   : > { %575 = vst.msk [vmem:[#allocation3 + $0x18] sm:$0xff] %vm571_vm3, %v482_v30  ;;  %v498_v46 = vpop.permute.xlu2 %497  ;;  %v3029_v30 = vld [vmem:[#allocation2 + $0xe0] sm:$0xff] }
  0xb5   : > { %v488_v62 = vpop.permute.xlu0 %487  ;;  %583 = vst.msk [vmem:[#allocation3 + $0x58] sm:$0xff] %vm571_vm3, %v498_v46 }
  0xb6   : > { %578 = vst.msk [vmem:[#allocation3 + $0x30] sm:$0xff] %vm571_vm3, %v488_v62 }
  0xb7   : > { %3999 = vst [vmem:[#allocation22_spill] sm:$0xff] %v3021_v8 }
  0xb8   : > { %398 = vst.msk [vmem:[#allocation3 + $0x98] sm:$0xff] %vm268_vm0, %v3029_v30 }
  0xb9   : > { %702 = vrot.lane.b32.xlu1 %v3015_v36, %s2597_s23  ;;  %v3039_v36 = vld [vmem:[#allocation2 + $0xf8] sm:$0xff] }
  0xba   : > { %698 = vrot.lane.b32.xlu2 %v3017_v41, %s2597_s23  ;;  %v3042_v41 = vld [vmem:[#allocation2 + $0xf2] sm:$0xff]  ;;  %400 = vst.msk [vmem:[#allocation3 + $0xa8] sm:$0xff] %vm268_vm0, %v3039_v36 }
  0xbb   : > { %706 = vrot.lane.b32.xlu0 %v3021_v8, %s2597_s23  ;;  %v490_v46 = vpop.permute.xlu1 %489  ;;  %4000 = vst [vmem:[#allocation23_spill] sm:$0xff] %v3042_v41  ;;  %v3048_v8 = vld [vmem:[#allocation2 + $0x10a] sm:$0xff] }
  0xbc   : > { %579 = vst.msk [vmem:[#allocation3 + $0x38] sm:$0xff] %vm571_vm3, %v490_v46  ;;  %v504_v62 = vpop.permute.xlu2 %503  ;;  %v3056_v46 = vld [vmem:[#allocation2 + $0x108] sm:$0xff] }
  0xbd   : > { %v494_v23 = vpop.permute.xlu0 %493  ;;  %586 = vst.msk [vmem:[#allocation3 + $0x70] sm:$0xff] %vm571_vm3, %v504_v62 }
  0xbe   : > { %581 = vst.msk [vmem:[#allocation3 + $0x48] sm:$0xff] %vm571_vm3, %v494_v23 }
  0xbf   : > { %4002 = vst [vmem:[#allocation25_spill] sm:$0xff] %v3048_v8 }
  0xc0   : > { %401 = vst.msk [vmem:[#allocation3 + $0xb0] sm:$0xff] %vm268_vm0, %v3056_v46 }
  0xc1   : > { %708 = vrot.lane.b32.xlu1 %v3042_v41, %s2597_s23  ;;  %v3066_v41 = vld [vmem:[#allocation2 + $0x120] sm:$0xff] }
  0xc2   : > { %704 = vrot.lane.b32.xlu2 %v3044_v28, %s2597_s23  ;;  %v3069_v28 = vld [vmem:[#allocation2 + $0x112] sm:$0xff]  ;;  %403 = vst.msk [vmem:[#allocation3 + $0xc0] sm:$0xff] %vm268_vm0, %v3066_v41 }
  0xc3   : > { %712 = vrot.lane.b32.xlu0 %v3048_v8, %s2597_s23  ;;  %v496_v23 = vpop.permute.xlu1 %495  ;;  %4003 = vst [vmem:[#allocation26_spill] sm:$0xff] %v3069_v28  ;;  %v3075_v8 = vld [vmem:[#allocation2 + $0x12a] sm:$0xff] }
  0xc4   : > { %582 = vst.msk [vmem:[#allocation3 + $0x50] sm:$0xff] %vm571_vm3, %v496_v23  ;;  %v510_v62 = vpop.permute.xlu2 %509  ;;  %v3083_v23 = vld [vmem:[#allocation2 + $0x128] sm:$0xff] }
  0xc5   : > { %v500_v13 = vpop.permute.xlu0 %499  ;;  %589 = vst.msk [vmem:[#allocation3 + $0x88] sm:$0xff] %vm571_vm3, %v510_v62 }
  0xc6   : > { %584 = vst.msk [vmem:[#allocation3 + $0x60] sm:$0xff] %vm571_vm3, %v500_v13 }
  0xc7   : > { %4005 = vst [vmem:[#allocation28_spill] sm:$0xff] %v3075_v8 }
  0xc8   : > { %404 = vst.msk [vmem:[#allocation3 + $0xc8] sm:$0xff] %vm268_vm0, %v3083_v23 }
  0xc9   : > { %714 = vrot.lane.b32.xlu1 %v3069_v28, %s2597_s23  ;;  %v3093_v28 = vld [vmem:[#allocation2 + $0x140] sm:$0xff] }
  0xca   : > { %710 = vrot.lane.b32.xlu2 %v3071_v16, %s2597_s23  ;;  %v3096_v16 = vld [vmem:[#allocation2 + $0x13a] sm:$0xff]  ;;  %406 = vst.msk [vmem:[#allocation3 + $0xd8] sm:$0xff] %vm268_vm0, %v3093_v28 }
  0xcb   : > { %718 = vrot.lane.b32.xlu0 %v3075_v8, %s2597_s23  ;;  %v502_v13 = vpop.permute.xlu1 %501  ;;  %4006 = vst [vmem:[#allocation29_spill] sm:$0xff] %v3096_v16  ;;  %v3102_v8 = vld [vmem:[#allocation2 + $0x152] sm:$0xff] }
  0xcc   : > { %585 = vst.msk [vmem:[#allocation3 + $0x68] sm:$0xff] %vm571_vm3, %v502_v13  ;;  %v516_v62 = vpop.permute.xlu2 %515  ;;  %v3110_v13 = vld [vmem:[#allocation2 + $0x150] sm:$0xff] }
  0xcd   : > { %v506_v6 = vpop.permute.xlu0 %505  ;;  %592 = vst.msk [vmem:[#allocation3 + $0xa0] sm:$0xff] %vm571_vm3, %v516_v62 }
  0xce   : > { %587 = vst.msk [vmem:[#allocation3 + $0x78] sm:$0xff] %vm571_vm3, %v506_v6 }
  0xcf   : > { %4008 = vst [vmem:[#allocation31_spill] sm:$0xff] %v3102_v8 }
  0xd0   : > { %407 = vst.msk [vmem:[#allocation3 + $0xe0] sm:$0xff] %vm268_vm0, %v3110_v13 }
  0xd1   : > { %720 = vrot.lane.b32.xlu1 %v3096_v16, %s2597_s23  ;;  %v3121_v16 = vld [vmem:[#allocation2 + $0x15a] sm:$0xff] }
  0xd2   : > { %716 = vrot.lane.b32.xlu2 %v3098_v9, %s2597_s23  ;;  %4009 = vst [vmem:[#allocation32_spill] sm:$0xff] %v3121_v16  ;;  %v3123_v9 = vld [vmem:[#allocation2 + $0x142] sm:$0xff] }
  0xd3   : > { %724 = vrot.lane.b32.xlu0 %v3102_v8, %s2597_s23  ;;  %v508_v6 = vpop.permute.xlu1 %507  ;;  %4010 = vst [vmem:[#allocation33_spill] sm:$0xff] %v3123_v9  ;;  %v3127_v8 = vld [vmem:[#allocation2 + $0x172] sm:$0xff] }
  0xd4   : > { %588 = vst.msk [vmem:[#allocation3 + $0x80] sm:$0xff] %vm571_vm3, %v508_v6  ;;  %v522_v62 = vpop.permute.xlu2 %521  ;;  %v3133_v6 = vld [vmem:[#allocation2 + $0x170] sm:$0xff] }
  0xd5   : > { %v512_v63 = vpop.permute.xlu0 %511  ;;  %595 = vst.msk [vmem:[#allocation3 + $0xb8] sm:$0xff] %vm571_vm3, %v522_v62 }
  0xd6   : > { %590 = vst.msk [vmem:[#allocation3 + $0x90] sm:$0xff] %vm571_vm3, %v512_v63 }
  0xd7   : > { %4011 = vst [vmem:[#allocation34_spill] sm:$0xff] %v3127_v8 }
  0xd8   : > { %410 = vst.msk [vmem:[#allocation3 + $0xf8] sm:$0xff] %vm268_vm0, %v3133_v6 }
  0xd9   : > { %726 = vrot.lane.b32.xlu1 %v3121_v16, %s2597_s23  ;;  %v3142_v16 = vld [vmem:[#allocation2 + $0x16a] sm:$0xff] }
  0xda   : > { %722 = vrot.lane.b32.xlu2 %v3123_v9, %s2597_s23 }
  0xdb   : > { %730 = vrot.lane.b32.xlu0 %v3127_v8, %s2597_s23  ;;  %v514_v63 = vpop.permute.xlu1 %513 }
  0xdc   : > { %591 = vst.msk [vmem:[#allocation3 + $0x98] sm:$0xff] %vm571_vm3, %v514_v63  ;;  %v528_v62 = vpop.permute.xlu2 %527 }
  0xdd   : > { %v518_v58 = vpop.permute.xlu0 %517  ;;  %598 = vst.msk [vmem:[#allocation3 + $0xd0] sm:$0xff] %vm571_vm3, %v528_v62 }
  0xde   : > { %593 = vst.msk [vmem:[#allocation3 + $0xa8] sm:$0xff] %vm571_vm3, %v518_v58 }
  0xe1   : > { %861 = vrot.lane.b32.xlu1 %v2884_v3, %s2598_s24 }
  0xe2   : > { %728 = vrot.lane.b32.xlu2 %v3142_v16, %s2597_s23 }
  0xe3   : > { %865 = vrot.lane.b32.xlu0 %v2870_v61, %s2598_s24  ;;  %v520_v8 = vpop.permute.xlu1 %519 }
  0xe4   : > { %594 = vst.msk [vmem:[#allocation3 + $0xb0] sm:$0xff] %vm571_vm3, %v520_v8  ;;  %v534_v63 = vpop.permute.xlu2 %533  ;;  %v266_v8 = vld [vmem:[%s2687_s22 + $0xf0] sm:$0xff] }
  0xe5   : > { %v524_v9 = vpop.permute.xlu0 %523  ;;  %601 = vst.msk [vmem:[#allocation3 + $0xe8] sm:$0xff] %vm571_vm3, %v534_v63  ;;  %v267_v63 = vld [vmem:[%s2687_s22 + $0xf8] sm:$0xff] }
  0xe6   : > { %596 = vst.msk [vmem:[#allocation3 + $0xc0] sm:$0xff] %vm571_vm3, %v524_v9 }
  0xe7   : > { %345 = vst.msk [vmem:[#allocation2 + $0x181] sm:$0xff] %vm268_vm0, %v266_v8 }
  0xe8   : > { %346 = vst.msk [vmem:[#allocation2 + $0x189] sm:$0xff] %vm268_vm0, %v267_v63 }
  0xe9   : > { %867 = vrot.lane.b32.xlu1 %v2889_v4, %s2598_s24 }
  0xea   : > { %863 = vrot.lane.b32.xlu2 %v2901_v10, %s2598_s24 }
  0xeb   : > { %871 = vrot.lane.b32.xlu0 %v2925_v17, %s2598_s24  ;;  %v526_v58 = vpop.permute.xlu1 %525 }
  0xec   : > { %597 = vst.msk [vmem:[#allocation3 + $0xc8] sm:$0xff] %vm571_vm3, %v526_v58  ;;  %v669_v61 = vpop.permute.xlu2 %668 }
  0xed   : > { %v530_v3 = vpop.permute.xlu0 %529  ;;  %765 = vst.msk [vmem:[#allocation3] sm:$0xff] %vm764_vm4, %v669_v61 }
  0xee   : > { %599 = vst.msk [vmem:[#allocation3 + $0xd8] sm:$0xff] %vm571_vm3, %v530_v3 }
  0xf1   : > { %873 = vrot.lane.b32.xlu1 %v2907_v11, %s2598_s24 }
  0xf2   : > { %869 = vrot.lane.b32.xlu2 %v2909_v12, %s2598_s24 }
  0xf3   : > { %877 = vrot.lane.b32.xlu0 %v2950_v29, %s2598_s24  ;;  %v532_v4 = vpop.permute.xlu1 %531 }
  0xf4   : > { %600 = vst.msk [vmem:[#allocation3 + $0xe0] sm:$0xff] %vm571_vm3, %v532_v4  ;;  %v675_v9 = vpop.permute.xlu2 %674  ;;  %v827_v4 = vld [vmem:[#allocation2 + $0x180] sm:$0xff] }
  0xf5   : > { %v536_v10 = vpop.permute.xlu0 %535  ;;  %768 = vst.msk [vmem:[#allocation3 + $0x18] sm:$0xff] %vm764_vm4, %v675_v9  ;;  %v828_v9 = vld [vmem:[#allocation2 + $0x188] sm:$0xff] }
  0xf6   : > { %602 = vst.msk [vmem:[#allocation3 + $0xf0] sm:$0xff] %vm571_vm3, %v536_v10 }
  0xf9   : > { %879 = vrot.lane.b32.xlu1 %v2931_v21, %s2598_s24 }
  0xfa   : > { %875 = vrot.lane.b32.xlu2 %v2933_v22, %s2598_s24 }
  0xfb   : > { %883 = vrot.lane.b32.xlu0 %v2975_v42, %s2598_s24  ;;  %v538_v11 = vpop.permute.xlu1 %537 }
  0xfc   : > { %603 = vst.msk [vmem:[#allocation3 + $0xf8] sm:$0xff] %vm571_vm3, %v538_v11  ;;  %v681_v12 = vpop.permute.xlu2 %680 }
  0xfd   : > { %v671_v17 = vpop.permute.xlu0 %670  ;;  %771 = vst.msk [vmem:[#allocation3 + $0x30] sm:$0xff] %vm764_vm4, %v681_v12  ;;  %v1020_v12 = vld [vmem:[#allocation2 + $0x181] sm:$0xff] }
  0xfe   : > { %766 = vst.msk [vmem:[#allocation3 + $0x8] sm:$0xff] %vm764_vm4, %v671_v17 }
 0x101   : > { %885 = vrot.lane.b32.xlu1 %v2956_v34, %s2598_s24 }
 0x102   : > { %881 = vrot.lane.b32.xlu2 %v2958_v35, %s2598_s24 }
 0x103   : > { %889 = vrot.lane.b32.xlu0 %v3002_v19, %s2598_s24  ;;  %v673_v21 = vpop.permute.xlu1 %672 }
 0x104   : > { %767 = vst.msk [vmem:[#allocation3 + $0x10] sm:$0xff] %vm764_vm4, %v673_v21  ;;  %v687_v22 = vpop.permute.xlu2 %686  ;;  %v1021_v21 = vld [vmem:[#allocation2 + $0x189] sm:$0xff] }
 0x105   : > { %v677_v29 = vpop.permute.xlu0 %676  ;;  %774 = vst.msk [vmem:[#allocation3 + $0x48] sm:$0xff] %vm764_vm4, %v687_v22  ;;  %v4013_v22 = vld [vmem:[#allocation5_spill] sm:$0xff] }
 0x106   : > { %769 = vst.msk [vmem:[#allocation3 + $0x20] sm:$0xff] %vm764_vm4, %v677_v29 }
 0x109   : > { %891 = vrot.lane.b32.xlu1 %v2982_v51, %s2598_s24 }
 0x10a   : > { %887 = vrot.lane.b32.xlu2 %v2985_v1, %s2598_s24 }
 0x10b   : > { %895 = vrot.lane.b32.xlu0 %v3029_v30, %s2598_s24  ;;  %v679_v34 = vpop.permute.xlu1 %678 }
 0x10c   : > { %770 = vst.msk [vmem:[#allocation3 + $0x28] sm:$0xff] %vm764_vm4, %v679_v34  ;;  %v693_v19 = vpop.permute.xlu2 %692 }
 0x10d   : > { %v683_v62 = vpop.permute.xlu0 %682  ;;  %777 = vst.msk [vmem:[#allocation3 + $0x60] sm:$0xff] %vm764_vm4, %v693_v19  ;;  %v4015_v19 = vld [vmem:[#allocation7_spill] sm:$0xff] }
 0x10e   : > { %772 = vst.msk [vmem:[#allocation3 + $0x38] sm:$0xff] %vm764_vm4, %v683_v62  ;;  %v4016_v62 = vld [vmem:[#allocation6_spill] sm:$0xff] }
 0x111   : > { %897 = vrot.lane.b32.xlu1 %v3009_v47, %s2598_s24 }
 0x112   : > { %893 = vrot.lane.b32.xlu2 %v3012_v2, %s2598_s24 }
 0x113   : > { %901 = vrot.lane.b32.xlu0 %v3056_v46, %s2598_s24  ;;  %v685_v51 = vpop.permute.xlu1 %684 }
 0x114   : > { %773 = vst.msk [vmem:[#allocation3 + $0x40] sm:$0xff] %vm764_vm4, %v685_v51  ;;  %v699_v1 = vpop.permute.xlu2 %698  ;;  %v4017_v51 = vld [vmem:[#allocation12_spill] sm:$0xff] }
 0x115   : > { %v689_v30 = vpop.permute.xlu0 %688  ;;  %780 = vst.msk [vmem:[#allocation3 + $0x78] sm:$0xff] %vm764_vm4, %v699_v1 }
 0x116   : > { %775 = vst.msk [vmem:[#allocation3 + $0x50] sm:$0xff] %vm764_vm4, %v689_v30 }
 0x119   : > { %903 = vrot.lane.b32.xlu1 %v3036_v5, %s2598_s24 }
 0x11a   : > { %899 = vrot.lane.b32.xlu2 %v3039_v36, %s2598_s24 }
 0x11b   : > { %907 = vrot.lane.b32.xlu0 %v3083_v23, %s2598_s24  ;;  %v691_v2 = vpop.permute.xlu1 %690 }
 0x11c   : > { %776 = vst.msk [vmem:[#allocation3 + $0x58] sm:$0xff] %vm764_vm4, %v691_v2  ;;  %v705_v46 = vpop.permute.xlu2 %704  ;;  %v4018_v2 = vld [vmem:[#allocation10_spill] sm:$0xff] }
 0x11d   : > { %v695_v58 = vpop.permute.xlu0 %694  ;;  %783 = vst.msk [vmem:[#allocation3 + $0x90] sm:$0xff] %vm764_vm4, %v705_v46  ;;  %v4019_v46 = vld [vmem:[#allocation8_spill] sm:$0xff] }
 0x11e   : > { %778 = vst.msk [vmem:[#allocation3 + $0x68] sm:$0xff] %vm764_vm4, %v695_v58  ;;  %v4020_v58 = vld [vmem:[#allocation15_spill] sm:$0xff] }
 0x121   : > { %909 = vrot.lane.b32.xlu1 %v3063_v40, %s2598_s24 }
 0x122   : > { %905 = vrot.lane.b32.xlu2 %v3066_v41, %s2598_s24 }
 0x123   : > { %913 = vrot.lane.b32.xlu0 %v3110_v13, %s2598_s24  ;;  %v697_v5 = vpop.permute.xlu1 %696 }
 0x124   : > { %779 = vst.msk [vmem:[#allocation3 + $0x70] sm:$0xff] %vm764_vm4, %v697_v5  ;;  %v711_v23 = vpop.permute.xlu2 %710 }
 0x125   : > { %v701_v61 = vpop.permute.xlu0 %700  ;;  %786 = vst.msk [vmem:[#allocation3 + $0xa8] sm:$0xff] %vm764_vm4, %v711_v23 }
 0x126   : > { %781 = vst.msk [vmem:[#allocation3 + $0x80] sm:$0xff] %vm764_vm4, %v701_v61 }
 0x129   : > { %915 = vrot.lane.b32.xlu1 %v3090_v24, %s2598_s24 }
 0x12a   : > { %911 = vrot.lane.b32.xlu2 %v3093_v28, %s2598_s24 }
 0x12b   : > { %919 = vrot.lane.b32.xlu0 %v3133_v6, %s2598_s24  ;;  %v703_v40 = vpop.permute.xlu1 %702 }
 0x12c   : > { %782 = vst.msk [vmem:[#allocation3 + $0x88] sm:$0xff] %vm764_vm4, %v703_v40  ;;  %v717_v41 = vpop.permute.xlu2 %716  ;;  %v4021_v40 = vld [vmem:[#allocation13_spill] sm:$0xff] }
 0x12d   : > { %v707_v3 = vpop.permute.xlu0 %706  ;;  %789 = vst.msk [vmem:[#allocation3 + $0xc0] sm:$0xff] %vm764_vm4, %v717_v41  ;;  %v4022_v41 = vld [vmem:[#allocation11_spill] sm:$0xff] }
 0x12e   : > { %784 = vst.msk [vmem:[#allocation3 + $0x98] sm:$0xff] %vm764_vm4, %v707_v3  ;;  %v4023_v3 = vld [vmem:[#allocation18_spill] sm:$0xff] }
 0x131   : > { %921 = vrot.lane.b32.xlu1 %v827_v4, %s2598_s24 }
 0x132   : > { %917 = vrot.lane.b32.xlu2 %v3117_v14, %s2598_s24 }
 0x133   : > { %1054 = vrot.lane.b32.xlu0 %v2704_v7, %s2599_s25  ;;  %v709_v24 = vpop.permute.xlu1 %708 }
 0x134   : > { %785 = vst.msk [vmem:[#allocation3 + $0xa0] sm:$0xff] %vm764_vm4, %v709_v24  ;;  %v723_v28 = vpop.permute.xlu2 %722 }
 0x135   : > { %v713_v6 = vpop.permute.xlu0 %712  ;;  %792 = vst.msk [vmem:[#allocation3 + $0xd8] sm:$0xff] %vm764_vm4, %v723_v28 }
 0x136   : > { %787 = vst.msk [vmem:[#allocation3 + $0xb0] sm:$0xff] %vm764_vm4, %v713_v6  ;;  %v4024_v6 = vld [vmem:[#allocation16_spill] sm:$0xff] }
 0x139   : > { %1056 = vrot.lane.b32.xlu1 %v2721_v15, %s2599_s25 }
 0x13a   : > { %923 = vrot.lane.b32.xlu2 %v828_v9, %s2598_s24  ;;  %v4025_v9 = vld [vmem:[#allocation14_spill] sm:$0xff] }
 0x13b   : > { %1060 = vrot.lane.b32.xlu0 %v2751_v26, %s2599_s25  ;;  %v715_v14 = vpop.permute.xlu1 %714 }
 0x13c   : > { %788 = vst.msk [vmem:[#allocation3 + $0xb8] sm:$0xff] %vm764_vm4, %v715_v14  ;;  %v729_v7 = vpop.permute.xlu2 %728  ;;  %v4026_v14 = vld [vmem:[#allocation21_spill] sm:$0xff] }
 0x13d   : > { %v719_v10 = vpop.permute.xlu0 %718  ;;  %795 = vst.msk [vmem:[#allocation3 + $0xf0] sm:$0xff] %vm764_vm4, %v729_v7 }
 0x13e   : > { %790 = vst.msk [vmem:[#allocation3 + $0xc8] sm:$0xff] %vm764_vm4, %v719_v10 }
 0x141   : > { %1062 = vrot.lane.b32.xlu1 %v2727_v18, %s2599_s25 }
 0x142   : > { %1058 = vrot.lane.b32.xlu2 %v2733_v20, %s2599_s25 }
 0x143   : > { %1066 = vrot.lane.b32.xlu0 %v2770_v32, %s2599_s25  ;;  %v721_v15 = vpop.permute.xlu1 %720 }
 0x144   : > { %791 = vst.msk [vmem:[#allocation3 + $0xd0] sm:$0xff] %vm764_vm4, %v721_v15  ;;  %v864_v26 = vpop.permute.xlu2 %863 }
 0x145   : > { %v725_v11 = vpop.permute.xlu0 %724  ;;  %959 = vst.msk [vmem:[#allocation3 + $0x8] sm:$0xff] %vm957_vm5, %v864_v26  ;;  %v4027_v26 = vld [vmem:[#allocation19_spill] sm:$0xff] }
 0x146   : > { %793 = vst.msk [vmem:[#allocation3 + $0xe0] sm:$0xff] %vm764_vm4, %v725_v11  ;;  %v4028_v11 = vld [vmem:[#allocation17_spill] sm:$0xff] }
 0x149   : > { %1068 = vrot.lane.b32.xlu1 %v2754_v27, %s2599_s25 }
 0x14a   : > { %1064 = vrot.lane.b32.xlu2 %v2748_v25, %s2599_s25 }
 0x14b   : > { %1072 = vrot.lane.b32.xlu0 %v2788_v38, %s2599_s25  ;;  %v727_v18 = vpop.permute.xlu1 %726 }
 0x14c   : > { %794 = vst.msk [vmem:[#allocation3 + $0xe8] sm:$0xff] %vm764_vm4, %v727_v18  ;;  %v870_v20 = vpop.permute.xlu2 %869  ;;  %v4029_v18 = vld [vmem:[#allocation24_spill] sm:$0xff] }
 0x14d   : > { %v731_v32 = vpop.permute.xlu0 %730  ;;  %962 = vst.msk [vmem:[#allocation3 + $0x20] sm:$0xff] %vm957_vm5, %v870_v20 }
 0x14e   : > { %796 = vst.msk [vmem:[#allocation3 + $0xf8] sm:$0xff] %vm764_vm4, %v731_v32 }
 0x151   : > { %1074 = vrot.lane.b32.xlu1 %v2772_v33, %s2599_s25 }
 0x152   : > { %1070 = vrot.lane.b32.xlu2 %v2768_v31, %s2599_s25 }
 0x153   : > { %1078 = vrot.lane.b32.xlu0 %v2806_v44, %s2599_s25  ;;  %v862_v25 = vpop.permute.xlu1 %861 }
 0x154   : > { %958 = vst.msk [vmem:[#allocation3] sm:$0xff] %vm957_vm5, %v862_v25  ;;  %v876_v27 = vpop.permute.xlu2 %875 }
 0x155   : > { %v866_v38 = vpop.permute.xlu0 %865  ;;  %965 = vst.msk [vmem:[#allocation3 + $0x38] sm:$0xff] %vm957_vm5, %v876_v27  ;;  %v4030_v27 = vld [vmem:[#allocation22_spill] sm:$0xff] }
 0x156   : > { %960 = vst.msk [vmem:[#allocation3 + $0x10] sm:$0xff] %vm957_vm5, %v866_v38  ;;  %v4031_v38 = vld [vmem:[#allocation20_spill] sm:$0xff] }
 0x159   : > { %1080 = vrot.lane.b32.xlu1 %v2790_v39, %s2599_s25 }
 0x15a   : > { %1076 = vrot.lane.b32.xlu2 %v2786_v37, %s2599_s25 }
 0x15b   : > { %1084 = vrot.lane.b32.xlu0 %v2822_v49, %s2599_s25  ;;  %v868_v31 = vpop.permute.xlu1 %867 }
 0x15c   : > { %961 = vst.msk [vmem:[#allocation3 + $0x18] sm:$0xff] %vm957_vm5, %v868_v31  ;;  %v882_v33 = vpop.permute.xlu2 %881  ;;  %v4032_v31 = vld [vmem:[#allocation27_spill] sm:$0xff] }
 0x15d   : > { %v872_v44 = vpop.permute.xlu0 %871  ;;  %968 = vst.msk [vmem:[#allocation3 + $0x50] sm:$0xff] %vm957_vm5, %v882_v33 }
 0x15e   : > { %963 = vst.msk [vmem:[#allocation3 + $0x28] sm:$0xff] %vm957_vm5, %v872_v44 }
 0x161   : > { %1086 = vrot.lane.b32.xlu1 %v2808_v45, %s2599_s25 }
 0x162   : > { %1082 = vrot.lane.b32.xlu2 %v2804_v43, %s2599_s25 }
 0x163   : > { %1090 = vrot.lane.b32.xlu0 %v2836_v53, %s2599_s25  ;;  %v874_v37 = vpop.permute.xlu1 %873 }
 0x164   : > { %964 = vst.msk [vmem:[#allocation3 + $0x30] sm:$0xff] %vm957_vm5, %v874_v37  ;;  %v888_v39 = vpop.permute.xlu2 %887 }
 0x165   : > { %v878_v49 = vpop.permute.xlu0 %877  ;;  %971 = vst.msk [vmem:[#allocation3 + $0x68] sm:$0xff] %vm957_vm5, %v888_v39  ;;  %v4033_v39 = vld [vmem:[#allocation25_spill] sm:$0xff] }
 0x166   : > { %966 = vst.msk [vmem:[#allocation3 + $0x40] sm:$0xff] %vm957_vm5, %v878_v49  ;;  %v4034_v49 = vld [vmem:[#allocation23_spill] sm:$0xff] }
 0x169   : > { %1092 = vrot.lane.b32.xlu1 %v2824_v50, %s2599_s25 }
 0x16a   : > { %1088 = vrot.lane.b32.xlu2 %v2820_v48, %s2599_s25 }
 0x16b   : > { %1096 = vrot.lane.b32.xlu0 %v2848_v56, %s2599_s25  ;;  %v880_v43 = vpop.permute.xlu1 %879 }
 0x16c   : > { %967 = vst.msk [vmem:[#allocation3 + $0x48] sm:$0xff] %vm957_vm5, %v880_v43  ;;  %v894_v45 = vpop.permute.xlu2 %893  ;;  %v4035_v43 = vld [vmem:[#allocation30_spill] sm:$0xff] }
 0x16d   : > { %v884_v53 = vpop.permute.xlu0 %883  ;;  %974 = vst.msk [vmem:[#allocation3 + $0x80] sm:$0xff] %vm957_vm5, %v894_v45 }
 0x16e   : > { %969 = vst.msk [vmem:[#allocation3 + $0x58] sm:$0xff] %vm957_vm5, %v884_v53 }
 0x171   : > { %1098 = vrot.lane.b32.xlu1 %v2838_v54, %s2599_s25 }
 0x172   : > { %1094 = vrot.lane.b32.xlu2 %v2834_v52, %s2599_s25 }
 0x173   : > { %1102 = vrot.lane.b32.xlu0 %v2860_v59, %s2599_s25  ;;  %v886_v48 = vpop.permute.xlu1 %885 }
 0x174   : > { %970 = vst.msk [vmem:[#allocation3 + $0x60] sm:$0xff] %vm957_vm5, %v886_v48  ;;  %v900_v50 = vpop.permute.xlu2 %899 }
 0x175   : > { %v890_v56 = vpop.permute.xlu0 %889  ;;  %977 = vst.msk [vmem:[#allocation3 + $0x98] sm:$0xff] %vm957_vm5, %v900_v50  ;;  %v4036_v50 = vld [vmem:[#allocation28_spill] sm:$0xff] }
 0x176   : > { %972 = vst.msk [vmem:[#allocation3 + $0x70] sm:$0xff] %vm957_vm5, %v890_v56  ;;  %v4037_v56 = vld [vmem:[#allocation26_spill] sm:$0xff] }
 0x179   : > { %1104 = vrot.lane.b32.xlu1 %v2850_v57, %s2599_s25  ;;  %v4012_v57 = vld [vmem:[#allocation4_spill] sm:$0xff] }
 0x17a   : > { %1100 = vrot.lane.b32.xlu2 %v2846_v55, %s2599_s25 }
 0x17b   : > { %1108 = vrot.lane.b32.xlu0 %v2877_v0, %s2599_s25  ;;  %v892_v52 = vpop.permute.xlu1 %891 }
 0x17c   : > { %973 = vst.msk [vmem:[#allocation3 + $0x78] sm:$0xff] %vm957_vm5, %v892_v52  ;;  %v906_v54 = vpop.permute.xlu2 %905  ;;  %v4038_v52 = vld [vmem:[#allocation33_spill] sm:$0xff] }
 0x17d   : > { %v896_v59 = vpop.permute.xlu0 %895  ;;  %980 = vst.msk [vmem:[#allocation3 + $0xb0] sm:$0xff] %vm957_vm5, %v906_v54 }
 0x17e   : > { %975 = vst.msk [vmem:[#allocation3 + $0x88] sm:$0xff] %vm957_vm5, %v896_v59 }
 0x181   : > { %1110 = vrot.lane.b32.xlu1 %v2862_v60, %s2599_s25  ;;  %v4014_v60 = vld [vmem:[#allocation9_spill] sm:$0xff] }
 0x182   : > { %1106 = vrot.lane.b32.xlu2 %v4012_v57, %s2599_s25  ;;  %v4039_v57 = vld [vmem:[#allocation31_spill] sm:$0xff] }
 0x183   : > { %1114 = vrot.lane.b32.xlu0 %v1020_v12, %s2599_s25  ;;  %v898_v55 = vpop.permute.xlu1 %897 }
 0x184   : > { %976 = vst.msk [vmem:[#allocation3 + $0x90] sm:$0xff] %vm957_vm5, %v898_v55  ;;  %v912_v0 = vpop.permute.xlu2 %911  ;;  %v4040_v55 = vld [vmem:[#allocation29_spill] sm:$0xff] }
 0x185   : > { %v902_v17 = vpop.permute.xlu0 %901  ;;  %983 = vst.msk [vmem:[#allocation3 + $0xc8] sm:$0xff] %vm957_vm5, %v912_v0 }
 0x186   : > { %978 = vst.msk [vmem:[#allocation3 + $0xa0] sm:$0xff] %vm957_vm5, %v902_v17 }
 0x189   : > { %1116 = vrot.lane.b32.xlu1 %v1021_v21, %s2599_s25 }
 0x18a   : > { %1112 = vrot.lane.b32.xlu2 %v4013_v22, %s2599_s25  ;;  %v1570_v22 = vld [vmem:[#allocation2 + $0x31] sm:$0xff] }
 0x18b   : > { %1249 = vrot.lane.b32.xlu0 %v4014_v60, %s2600_s26  ;;  %v904_v29 = vpop.permute.xlu1 %903  ;;  %v4041_v60 = vld [vmem:[#allocation34_spill] sm:$0xff] }
 0x18c   : > { %979 = vst.msk [vmem:[#allocation3 + $0xa8] sm:$0xff] %vm957_vm5, %v904_v29  ;;  %v918_v8 = vpop.permute.xlu2 %917  ;;  %v4042_v29 = vld [vmem:[#allocation32_spill] sm:$0xff] }
 0x18d   : > { %v908_v34 = vpop.permute.xlu0 %907  ;;  %986 = vst.msk [vmem:[#allocation3 + $0xe0] sm:$0xff] %vm957_vm5, %v918_v8 }
 0x18e   : > { %981 = vst.msk [vmem:[#allocation3 + $0xb8] sm:$0xff] %vm957_vm5, %v908_v34 }
 0x191   : > { %1251 = vrot.lane.b32.xlu1 %v4015_v19, %s2600_s26  ;;  %v1763_v19 = vld [vmem:[#allocation2 + $0x32] sm:$0xff] }
 0x192   : > { %1247 = vrot.lane.b32.xlu2 %v4016_v62, %s2600_s26  ;;  %v1377_v62 = vld [vmem:[#allocation2 + $0x30] sm:$0xff] }
 0x193   : > { %1255 = vrot.lane.b32.xlu0 %v4017_v51, %s2600_s26  ;;  %v910_v1 = vpop.permute.xlu1 %909  ;;  %v1571_v51 = vld [vmem:[#allocation2 + $0x39] sm:$0xff] }
 0x194   : > { %982 = vst.msk [vmem:[#allocation3 + $0xc0] sm:$0xff] %vm957_vm5, %v910_v1  ;;  %v924_v30 = vpop.permute.xlu2 %923 }
 0x195   : > { %v914_v63 = vpop.permute.xlu0 %913  ;;  %989 = vst.msk [vmem:[#allocation3 + $0xf8] sm:$0xff] %vm957_vm5, %v924_v30 }
 0x196   : > { %984 = vst.msk [vmem:[#allocation3 + $0xd0] sm:$0xff] %vm957_vm5, %v914_v63 }
 0x199   : > { %1257 = vrot.lane.b32.xlu1 %v4018_v2, %s2600_s26  ;;  %v1764_v2 = vld [vmem:[#allocation2 + $0x3a] sm:$0xff] }
 0x19a   : > { %1253 = vrot.lane.b32.xlu2 %v4019_v46, %s2600_s26  ;;  %v1378_v46 = vld [vmem:[#allocation2 + $0x38] sm:$0xff] }
 0x19b   : > { %1261 = vrot.lane.b32.xlu0 %v4020_v58, %s2600_s26  ;;  %v916_v5 = vpop.permute.xlu1 %915 }
 0x19c   : > { %985 = vst.msk [vmem:[#allocation3 + $0xd8] sm:$0xff] %vm957_vm5, %v916_v5  ;;  %v1059_v23 = vpop.permute.xlu2 %1058 }
 0x19d   : > { %v920_v61 = vpop.permute.xlu0 %919  ;;  %1153 = vst.msk [vmem:[#allocation3 + $0x10] sm:$0xff] %vm1150_vm6, %v1059_v23 }
 0x19e   : > { %987 = vst.msk [vmem:[#allocation3 + $0xe8] sm:$0xff] %vm957_vm5, %v920_v61  ;;  %v1572_v61 = vld [vmem:[#allocation2 + $0x49] sm:$0xff] }
 0x1a1   : > { %1263 = vrot.lane.b32.xlu1 %v4021_v40, %s2600_s26  ;;  %v1379_v40 = vld [vmem:[#allocation2 + $0x48] sm:$0xff] }
 0x1a2   : > { %1259 = vrot.lane.b32.xlu2 %v4022_v41, %s2600_s26  ;;  %v1765_v41 = vld [vmem:[#allocation2 + $0x4a] sm:$0xff] }
 0x1a3   : > { %1267 = vrot.lane.b32.xlu0 %v4023_v3, %s2600_s26  ;;  %v922_v4 = vpop.permute.xlu1 %921 }
 0x1a4   : > { %988 = vst.msk [vmem:[#allocation3 + $0xf0] sm:$0xff] %vm957_vm5, %v922_v4  ;;  %v1065_v24 = vpop.permute.xlu2 %1064 }
 0x1a5   : > { %v1055_v28 = vpop.permute.xlu0 %1054  ;;  %1156 = vst.msk [vmem:[#allocation3 + $0x28] sm:$0xff] %vm1150_vm6, %v1065_v24  ;;  %v1771_v24 = vld [vmem:[#allocation2 + $0x92] sm:$0xff] }
 0x1a6   : > { %1151 = vst.msk [vmem:[#allocation3] sm:$0xff] %vm1150_vm6, %v1055_v28  ;;  %v1578_v28 = vld [vmem:[#allocation2 + $0x91] sm:$0xff] }
 0x1a9   : > { %1269 = vrot.lane.b32.xlu1 %v4024_v6, %s2600_s26 }
 0x1aa   : > { %1265 = vrot.lane.b32.xlu2 %v4025_v9, %s2600_s26 }
 0x1ab   : > { %1273 = vrot.lane.b32.xlu0 %v4026_v14, %s2600_s26  ;;  %v1057_v7 = vpop.permute.xlu1 %1056 }
 0x1ac   : > { %1152 = vst.msk [vmem:[#allocation3 + $0x8] sm:$0xff] %vm1150_vm6, %v1057_v7  ;;  %v1071_v10 = vpop.permute.xlu2 %1070  ;;  %v1573_v7 = vld [vmem:[#allocation2 + $0x51] sm:$0xff] }
 0x1ad   : > { %v1061_v15 = vpop.permute.xlu0 %1060  ;;  %1159 = vst.msk [vmem:[#allocation3 + $0x40] sm:$0xff] %vm1150_vm6, %v1071_v10  ;;  %v1380_v10 = vld [vmem:[#allocation2 + $0x50] sm:$0xff] }
 0x1ae   : > { %1154 = vst.msk [vmem:[#allocation3 + $0x18] sm:$0xff] %vm1150_vm6, %v1061_v15 }
 0x1b1   : > { %1275 = vrot.lane.b32.xlu1 %v4027_v26, %s2600_s26 }
 0x1b2   : > { %1271 = vrot.lane.b32.xlu2 %v4028_v11, %s2600_s26  ;;  %v1766_v11 = vld [vmem:[#allocation2 + $0x52] sm:$0xff] }
 0x1b3   : > { %1279 = vrot.lane.b32.xlu0 %v4029_v18, %s2600_s26  ;;  %v1063_v20 = vpop.permute.xlu1 %1062  ;;  %v1579_v18 = vld [vmem:[#allocation2 + $0x99] sm:$0xff] }
 0x1b4   : > { %1155 = vst.msk [vmem:[#allocation3 + $0x20] sm:$0xff] %vm1150_vm6, %v1063_v20  ;;  %v1077_v32 = vpop.permute.xlu2 %1076  ;;  %v1586_v20 = vld [vmem:[#allocation2 + $0xf1] sm:$0xff] }
 0x1b5   : > { %v1067_v25 = vpop.permute.xlu0 %1066  ;;  %1162 = vst.msk [vmem:[#allocation3 + $0x58] sm:$0xff] %vm1150_vm6, %v1077_v32 }
 0x1b6   : > { %1157 = vst.msk [vmem:[#allocation3 + $0x30] sm:$0xff] %vm1150_vm6, %v1067_v25 }
 0x1b9   : > { %1281 = vrot.lane.b32.xlu1 %v4030_v27, %s2600_s26  ;;  %v1779_v27 = vld [vmem:[#allocation2 + $0xf2] sm:$0xff] }
 0x1ba   : > { %1277 = vrot.lane.b32.xlu2 %v4031_v38, %s2600_s26  ;;  %v1772_v38 = vld [vmem:[#allocation2 + $0x9a] sm:$0xff] }
 0x1bb   : > { %1285 = vrot.lane.b32.xlu0 %v4032_v31, %s2600_s26  ;;  %v1069_v33 = vpop.permute.xlu1 %1068  ;;  %v1387_v31 = vld [vmem:[#allocation2 + $0xa8] sm:$0xff] }
 0x1bc   : > { %1158 = vst.msk [vmem:[#allocation3 + $0x38] sm:$0xff] %vm1150_vm6, %v1069_v33  ;;  %v1083_v44 = vpop.permute.xlu2 %1082 }
 0x1bd   : > { %v1073_v37 = vpop.permute.xlu0 %1072  ;;  %1165 = vst.msk [vmem:[#allocation3 + $0x70] sm:$0xff] %vm1150_vm6, %v1083_v44 }
 0x1be   : > { %1160 = vst.msk [vmem:[#allocation3 + $0x48] sm:$0xff] %vm1150_vm6, %v1073_v37 }
 0x1c1   : > { %1287 = vrot.lane.b32.xlu1 %v4033_v39, %s2600_s26  ;;  %v1574_v39 = vld [vmem:[#allocation2 + $0x61] sm:$0xff] }
 0x1c2   : > { %1283 = vrot.lane.b32.xlu2 %v4034_v49, %s2600_s26  ;;  %v1381_v49 = vld [vmem:[#allocation2 + $0x60] sm:$0xff] }
 0x1c3   : > { %1291 = vrot.lane.b32.xlu0 %v4035_v43, %s2600_s26  ;;  %v1075_v45 = vpop.permute.xlu1 %1074 }
 0x1c4   : > { %1161 = vst.msk [vmem:[#allocation3 + $0x50] sm:$0xff] %vm1150_vm6, %v1075_v45  ;;  %v1089_v53 = vpop.permute.xlu2 %1088 }
 0x1c5   : > { %v1079_v48 = vpop.permute.xlu0 %1078  ;;  %1168 = vst.msk [vmem:[#allocation3 + $0x88] sm:$0xff] %vm1150_vm6, %v1089_v53 }
 0x1c6   : > { %1163 = vst.msk [vmem:[#allocation3 + $0x60] sm:$0xff] %vm1150_vm6, %v1079_v48  ;;  %v1767_v48 = vld [vmem:[#allocation2 + $0x62] sm:$0xff] }
 0x1c9   : > { %1293 = vrot.lane.b32.xlu1 %v4036_v50, %s2600_s26  ;;  %v1580_v50 = vld [vmem:[#allocation2 + $0xa9] sm:$0xff] }
 0x1ca   : > { %1289 = vrot.lane.b32.xlu2 %v4037_v56, %s2600_s26  ;;  %v1587_v56 = vld [vmem:[#allocation2 + $0xf9] sm:$0xff] }
 0x1cb   : > { %1297 = vrot.lane.b32.xlu0 %v4038_v52, %s2600_s26  ;;  %v1081_v54 = vpop.permute.xlu1 %1080 }
 0x1cc   : > { %1164 = vst.msk [vmem:[#allocation3 + $0x68] sm:$0xff] %vm1150_vm6, %v1081_v54  ;;  %v1095_v59 = vpop.permute.xlu2 %1094 }
 0x1cd   : > { %v1085_v12 = vpop.permute.xlu0 %1084  ;;  %1171 = vst.msk [vmem:[#allocation3 + $0xa0] sm:$0xff] %vm1150_vm6, %v1095_v59  ;;  %v1780_v59 = vld [vmem:[#allocation2 + $0xfa] sm:$0xff] }
 0x1ce   : > { %1166 = vst.msk [vmem:[#allocation3 + $0x78] sm:$0xff] %vm1150_vm6, %v1085_v12  ;;  %v1773_v12 = vld [vmem:[#allocation2 + $0xaa] sm:$0xff] }
 0x1d1   : > { %1299 = vrot.lane.b32.xlu1 %v4039_v57, %s2600_s26  ;;  %v1388_v57 = vld [vmem:[#allocation2 + $0xb0] sm:$0xff] }
 0x1d2   : > { %1295 = vrot.lane.b32.xlu2 %v4040_v55, %s2600_s26  ;;  %v1996_v55 = vld [vmem:[%s3945_s1 + $0x40] sm:$0xff] }
 0x1d3   : > { %1303 = vrot.lane.b32.xlu0 %v3142_v16, %s2600_s26  ;;  %v1087_v0 = vpop.permute.xlu1 %1086  ;;  %2101 = vmatpush.msra.mxu0 %v1996_v55 }
 0x1d4   : > { %1167 = vst.msk [vmem:[#allocation3 + $0x80] sm:$0xff] %vm1150_vm6, %v1087_v0  ;;  %v1101_v17 = vpop.permute.xlu2 %1100  ;;  %2543 = vmatpush.msra.mxu1 %v1996_v55  ;;  %2544 = vmatpush.msra.mxu2 %v1996_v55 }
 0x1d5   : > { %v1091_v21 = vpop.permute.xlu0 %1090  ;;  %1174 = vst.msk [vmem:[#allocation3 + $0xb8] sm:$0xff] %vm1150_vm6, %v1101_v17  ;;  %2545 = vmatpush.msra.mxu3 %v1996_v55  ;;  %v1397_v55 = vld [vmem:[#allocation2 + $0x120] sm:$0xff] }
 0x1d6   : > { %1169 = vst.msk [vmem:[#allocation3 + $0x90] sm:$0xff] %vm1150_vm6, %v1091_v21  ;;  %v1995_v21 = vld [vmem:[%s3945_s1 + $0x38] sm:$0xff] }
 0x1d7   : > { %2102 = vmatpush.msra.mxu0 %v1995_v21  ;;  %2546 = vmatpush.msra.mxu1 %v1995_v21 }
 0x1d8   : > { %2547 = vmatpush.msra.mxu2 %v1995_v21  ;;  %2548 = vmatpush.msra.mxu3 %v1995_v21 }
 0x1d9   : > { %1305 = vrot.lane.b32.xlu1 %v4041_v60, %s2600_s26  ;;  %v1575_v60 = vld [vmem:[#allocation2 + $0x69] sm:$0xff] }
 0x1da   : > { %1301 = vrot.lane.b32.xlu2 %v4042_v29, %s2600_s26  ;;  %v1994_v29 = vld [vmem:[%s3945_s1 + $0x30] sm:$0xff] }
 0x1db   : > { %1634 = vrot.lane.b32.xlu0 %v1570_v22, %s2601_s27  ;;  %v1093_v16 = vpop.permute.xlu1 %1092  ;;  %2103 = vmatpush.msra.mxu0 %v1994_v29 }
 0x1dc   : > { %1170 = vst.msk [vmem:[#allocation3 + $0x98] sm:$0xff] %vm1150_vm6, %v1093_v16  ;;  %v1107_v8 = vpop.permute.xlu2 %1106  ;;  %v1993_v16 = vld [vmem:[%s3945_s1 + $0x28] sm:$0xff]  ;;  %2549 = vmatpush.msra.mxu1 %v1994_v29  ;;  %2550 = vmatpush.msra.mxu2 %v1994_v29 }
 0x1dd   : > { %v1097_v34 = vpop.permute.xlu0 %1096  ;;  %1177 = vst.msk [vmem:[#allocation3 + $0xd0] sm:$0xff] %vm1150_vm6, %v1107_v8  ;;  %v1382_v8 = vld [vmem:[#allocation2 + $0x68] sm:$0xff]  ;;  %2551 = vmatpush.msra.mxu3 %v1994_v29  ;;  %2104 = vmatpush.msra.mxu0 %v1993_v16 }
 0x1de   : > { %1172 = vst.msk [vmem:[#allocation3 + $0xa8] sm:$0xff] %vm1150_vm6, %v1097_v34  ;;  %v1395_v34 = vld [vmem:[#allocation2 + $0x108] sm:$0xff]  ;;  %2552 = vmatpush.msra.mxu1 %v1993_v16  ;;  %2553 = vmatpush.msra.mxu2 %v1993_v16 }
 0x1df   : > { %2554 = vmatpush.msra.mxu3 %v1993_v16  ;;  %v1583_v29 = vld [vmem:[#allocation2 + $0xc9] sm:$0xff] }
 0x1e0   : > { %v1776_v16 = vld [vmem:[#allocation2 + $0xca] sm:$0xff] }
 0x1e1   : > { %1827 = vrot.lane.b32.xlu1 %v1763_v19, %s2602_s28  ;;  %v1992_v19 = vld [vmem:[%s3945_s1 + $0x20] sm:$0xff] }
 0x1e2   : > { %1441 = vrot.lane.b32.xlu2 %v1377_v62, %s2603_s29  ;;  %2105 = vmatpush.msra.mxu0 %v1992_v19 }
 0x1e3   : > { %1636 = vrot.lane.b32.xlu0 %v1571_v51, %s2601_s27  ;;  %v1099_v1 = vpop.permute.xlu1 %1098  ;;  %2555 = vmatpush.msra.mxu1 %v1992_v19 }
 0x1e4   : > { %1173 = vst.msk [vmem:[#allocation3 + $0xb0] sm:$0xff] %vm1150_vm6, %v1099_v1  ;;  %v1113_v30 = vpop.permute.xlu2 %1112  ;;  %v1991_v1 = vld [vmem:[%s3945_s1 + $0x18] sm:$0xff]  ;;  %2556 = vmatpush.msra.mxu2 %v1992_v19  ;;  %2557 = vmatpush.msra.mxu3 %v1992_v19 }
 0x1e5   : > { %v1103_v63 = vpop.permute.xlu0 %1102  ;;  %1180 = vst.msk [vmem:[#allocation3 + $0xe8] sm:$0xff] %vm1150_vm6, %v1113_v30  ;;  %2106 = vmatpush.msra.mxu0 %v1991_v1  ;;  %2558 = vmatpush.msra.mxu1 %v1991_v1 }
 0x1e6   : > { %1175 = vst.msk [vmem:[#allocation3 + $0xc0] sm:$0xff] %vm1150_vm6, %v1103_v63  ;;  %v1990_v63 = vld [vmem:[%s3945_s1 + $0x10] sm:$0xff]  ;;  %2559 = vmatpush.msra.mxu2 %v1991_v1  ;;  %2560 = vmatpush.msra.mxu3 %v1991_v1  ;;  %v1770_v1 = vld [vmem:[#allocation2 + $0x82] sm:$0xff] }
 0x1e7   : > { %2107 = vmatpush.msra.mxu0 %v1990_v63  ;;  %2561 = vmatpush.msra.mxu1 %v1990_v63 }
 0x1e8   : > { %2562 = vmatpush.msra.mxu2 %v1990_v63  ;;  %2563 = vmatpush.msra.mxu3 %v1990_v63 }
 0x1e9   : > { %1829 = vrot.lane.b32.xlu1 %v1764_v2, %s2602_s28  ;;  %v1989_v2 = vld [vmem:[%s3945_s1 + $0x8] sm:$0xff] }
 0x1ea   : > { %1443 = vrot.lane.b32.xlu2 %v1378_v46, %s2603_s29  ;;  %v1581_v46 = vld [vmem:[#allocation2 + $0xb1] sm:$0xff]  ;;  %2108 = vmatpush.msra.mxu0 %v1989_v2 }
 0x1eb   : > { %1457 = vrot.lane.b32.xlu0 %v2958_v35, %s2603_s29  ;;  %v1105_v58 = vpop.permute.xlu1 %1104  ;;  %2564 = vmatpush.msra.mxu1 %v1989_v2 }
 0x1ec   : > { %1176 = vst.msk [vmem:[#allocation3 + $0xc8] sm:$0xff] %vm1150_vm6, %v1105_v58  ;;  %v1248_v5 = vpop.permute.xlu2 %1247  ;;  %v1774_v58 = vld [vmem:[#allocation2 + $0xb2] sm:$0xff]  ;;  %2565 = vmatpush.msra.mxu2 %v1989_v2  ;;  %2566 = vmatpush.msra.mxu3 %v1989_v2 }
 0x1ed   : > { %v1109_v23 = vpop.permute.xlu0 %1108  ;;  %1344 = vst.msk [vmem:[#allocation3] sm:$0xff] %vm1343_vm7, %v1248_v5  ;;  %v1988_v5 = vld [vmem:[%s3945_s1] sm:$0xff] }
 0x1ee   : > { %1178 = vst.msk [vmem:[#allocation3 + $0xd8] sm:$0xff] %vm1150_vm6, %v1109_v23  ;;  %2109 = vmatpush.msra.mxu0 %v1988_v5  ;;  %2567 = vmatpush.msra.mxu1 %v1988_v5 }
 0x1ef   : > { %2568 = vmatpush.msra.mxu2 %v1988_v5  ;;  %2569 = vmatpush.msra.mxu3 %v1988_v5  ;;  %v1789_v5 = vld [vmem:[#allocation2 + $0x16a] sm:$0xff] }
 0x1f1   : > { %1638 = vrot.lane.b32.xlu1 %v1572_v61, %s2601_s27 }
 0x1f2   : > { %1445 = vrot.lane.b32.xlu2 %v1379_v40, %s2603_s29 }
 0x1f3   : > { %1831 = vrot.lane.b32.xlu0 %v1765_v41, %s2602_s28  ;;  %v1111_v3 = vpop.permute.xlu1 %1110  ;;  %v1768_v41 = vld [vmem:[#allocation2 + $0x6a] sm:$0xff] }
 0x1f4   : > { %1179 = vst.msk [vmem:[#allocation3 + $0xe0] sm:$0xff] %vm1150_vm6, %v1111_v3  ;;  %v1254_v35 = vpop.permute.xlu2 %1253  ;;  %v1781_v3 = vld [vmem:[#allocation2 + $0x10a] sm:$0xff] }
 0x1f5   : > { %v1115_v4 = vpop.permute.xlu0 %1114  ;;  %1347 = vst.msk [vmem:[#allocation3 + $0x18] sm:$0xff] %vm1343_vm7, %v1254_v35 }
 0x1f6   : > { %1181 = vst.msk [vmem:[#allocation3 + $0xf0] sm:$0xff] %vm1150_vm6, %v1115_v4 }
 0x1f9   : > { %1843 = vrot.lane.b32.xlu1 %v1771_v24, %s2602_s28 }
 0x1fa   : > { %1650 = vrot.lane.b32.xlu2 %v1578_v28, %s2601_s27  ;;  %v1787_v28 = vld [vmem:[#allocation2 + $0x152] sm:$0xff] }
 0x1fb   : > { %1459 = vrot.lane.b32.xlu0 %v2975_v42, %s2603_s29  ;;  %v1117_v6 = vpop.permute.xlu1 %1116 }
 0x1fc   : > { %1182 = vst.msk [vmem:[#allocation3 + $0xf8] sm:$0xff] %vm1150_vm6, %v1117_v6  ;;  %v1260_v9 = vpop.permute.xlu2 %1259  ;;  %v1594_v6 = vld [vmem:[#allocation2 + $0x151] sm:$0xff] }
 0x1fd   : > { %v1250_v14 = vpop.permute.xlu0 %1249  ;;  %1350 = vst.msk [vmem:[#allocation3 + $0x30] sm:$0xff] %vm1343_vm7, %v1260_v9  ;;  %v1389_v9 = vld [vmem:[#allocation2 + $0xc0] sm:$0xff] }
 0x1fe   : > { %1345 = vst.msk [vmem:[#allocation3 + $0x8] sm:$0xff] %vm1343_vm7, %v1250_v14 }
 0x201   : > { %1640 = vrot.lane.b32.xlu1 %v1573_v7, %s2601_s27 }
 0x202   : > { %1447 = vrot.lane.b32.xlu2 %v1380_v10, %s2603_s29 }
 0x203   : > { %1473 = vrot.lane.b32.xlu0 %v3009_v47, %s2603_s29  ;;  %v1252_v15 = vpop.permute.xlu1 %1251 }
 0x204   : > { %1346 = vst.msk [vmem:[#allocation3 + $0x10] sm:$0xff] %vm1343_vm7, %v1252_v15  ;;  %v1266_v42 = vpop.permute.xlu2 %1265  ;;  %v1576_v15 = vld [vmem:[#allocation2 + $0x79] sm:$0xff] }
 0x205   : > { %v1256_v26 = vpop.permute.xlu0 %1255  ;;  %1353 = vst.msk [vmem:[#allocation3 + $0x48] sm:$0xff] %vm1343_vm7, %v1266_v42  ;;  %v1383_v42 = vld [vmem:[#allocation2 + $0x78] sm:$0xff] }
 0x206   : > { %1348 = vst.msk [vmem:[#allocation3 + $0x20] sm:$0xff] %vm1343_vm7, %v1256_v26  ;;  %v1396_v26 = vld [vmem:[#allocation2 + $0x110] sm:$0xff] }
 0x209   : > { %1833 = vrot.lane.b32.xlu1 %v1766_v11, %s2602_s28 }
 0x20a   : > { %1652 = vrot.lane.b32.xlu2 %v1579_v18, %s2601_s27 }
 0x20b   : > { %1666 = vrot.lane.b32.xlu0 %v1586_v20, %s2601_s27  ;;  %v1258_v32 = vpop.permute.xlu1 %1257 }
 0x20c   : > { %1349 = vst.msk [vmem:[#allocation3 + $0x28] sm:$0xff] %vm1343_vm7, %v1258_v32  ;;  %v1272_v47 = vpop.permute.xlu2 %1271  ;;  %v1402_v32 = vld [vmem:[#allocation2 + $0x158] sm:$0xff] }
 0x20d   : > { %v1262_v25 = vpop.permute.xlu0 %1261  ;;  %1356 = vst.msk [vmem:[#allocation3 + $0x60] sm:$0xff] %vm1343_vm7, %v1272_v47  ;;  %v1582_v47 = vld [vmem:[#allocation2 + $0xc1] sm:$0xff] }
 0x20e   : > { %1351 = vst.msk [vmem:[#allocation3 + $0x38] sm:$0xff] %vm1343_vm7, %v1262_v25  ;;  %v1775_v25 = vld [vmem:[#allocation2 + $0xc2] sm:$0xff] }
 0x211   : > { %1859 = vrot.lane.b32.xlu1 %v1779_v27, %s2602_s28 }
 0x212   : > { %1845 = vrot.lane.b32.xlu2 %v1772_v38, %s2602_s28 }
 0x213   : > { %1461 = vrot.lane.b32.xlu0 %v1387_v31, %s2603_s29  ;;  %v1264_v33 = vpop.permute.xlu1 %1263 }
 0x214   : > { %1352 = vst.msk [vmem:[#allocation3 + $0x40] sm:$0xff] %vm1343_vm7, %v1264_v33  ;;  %v1278_v44 = vpop.permute.xlu2 %1277 }
 0x215   : > { %v1268_v37 = vpop.permute.xlu0 %1267  ;;  %1359 = vst.msk [vmem:[#allocation3 + $0x78] sm:$0xff] %vm1343_vm7, %v1278_v44  ;;  %v1589_v44 = vld [vmem:[#allocation2 + $0x111] sm:$0xff] }
 0x216   : > { %1354 = vst.msk [vmem:[#allocation3 + $0x50] sm:$0xff] %vm1343_vm7, %v1268_v37  ;;  %v1769_v37 = vld [vmem:[#allocation2 + $0x7a] sm:$0xff] }
 0x219   : > { %1642 = vrot.lane.b32.xlu1 %v1574_v39, %s2601_s27  ;;  %v1782_v39 = vld [vmem:[#allocation2 + $0x112] sm:$0xff] }
 0x21a   : > { %1449 = vrot.lane.b32.xlu2 %v1381_v49, %s2603_s29 }
 0x21b   : > { %1475 = vrot.lane.b32.xlu0 %v3039_v36, %s2603_s29  ;;  %v1270_v43 = vpop.permute.xlu1 %1269 }
 0x21c   : > { %1355 = vst.msk [vmem:[#allocation3 + $0x58] sm:$0xff] %vm1343_vm7, %v1270_v43  ;;  %v1284_v45 = vpop.permute.xlu2 %1283 }
 0x21d   : > { %v1274_v53 = vpop.permute.xlu0 %1273  ;;  %1362 = vst.msk [vmem:[#allocation3 + $0x90] sm:$0xff] %vm1343_vm7, %v1284_v45 }
 0x21e   : > { %1357 = vst.msk [vmem:[#allocation3 + $0x68] sm:$0xff] %vm1343_vm7, %v1274_v53 }
 0x221   : > { %1835 = vrot.lane.b32.xlu1 %v1767_v48, %s2602_s28  ;;  %v1788_v48 = vld [vmem:[#allocation2 + $0x15a] sm:$0xff] }
 0x222   : > { %1654 = vrot.lane.b32.xlu2 %v1580_v50, %s2601_s27  ;;  %v1595_v50 = vld [vmem:[#allocation2 + $0x159] sm:$0xff] }
 0x223   : > { %1668 = vrot.lane.b32.xlu0 %v1587_v56, %s2601_s27  ;;  %v1276_v52 = vpop.permute.xlu1 %1275  ;;  %v1390_v56 = vld [vmem:[#allocation2 + $0xc8] sm:$0xff] }
 0x224   : > { %1358 = vst.msk [vmem:[#allocation3 + $0x70] sm:$0xff] %vm1343_vm7, %v1276_v52  ;;  %v1290_v36 = vpop.permute.xlu2 %1289 }
 0x225   : > { %v1280_v54 = vpop.permute.xlu0 %1279  ;;  %1365 = vst.msk [vmem:[#allocation3 + $0xa8] sm:$0xff] %vm1343_vm7, %v1290_v36 }
 0x226   : > { %1360 = vst.msk [vmem:[#allocation3 + $0x80] sm:$0xff] %vm1343_vm7, %v1280_v54 }
 0x229   : > { %1861 = vrot.lane.b32.xlu1 %v1780_v59, %s2602_s28 }
 0x22a   : > { %1847 = vrot.lane.b32.xlu2 %v1773_v12, %s2602_s28  ;;  %v1577_v12 = vld [vmem:[#allocation2 + $0x81] sm:$0xff] }
 0x22b   : > { %1463 = vrot.lane.b32.xlu0 %v1388_v57, %s2603_s29  ;;  %v1282_v0 = vpop.permute.xlu1 %1281  ;;  %v1384_v57 = vld [vmem:[#allocation2 + $0x80] sm:$0xff] }
 0x22c   : > { %1361 = vst.msk [vmem:[#allocation3 + $0x88] sm:$0xff] %vm1343_vm7, %v1282_v0  ;;  %v1296_v17 = vpop.permute.xlu2 %1295 }
 0x22d   : > { %v1286_v22 = vpop.permute.xlu0 %1285  ;;  %1368 = vst.msk [vmem:[#allocation3 + $0xc0] sm:$0xff] %vm1343_vm7, %v1296_v17 }
 0x22e   : > { %1363 = vst.msk [vmem:[#allocation3 + $0x98] sm:$0xff] %vm1343_vm7, %v1286_v22 }
 0x231   : > { %1644 = vrot.lane.b32.xlu1 %v1575_v60, %s2601_s27  ;;  %v1403_v60 = vld [vmem:[#allocation2 + $0x168] sm:$0xff] }
 0x232   : > { %1451 = vrot.lane.b32.xlu2 %v1382_v8, %s2603_s29 }
 0x233   : > { %1477 = vrot.lane.b32.xlu0 %v1395_v34, %s2603_s29  ;;  %v1288_v62 = vpop.permute.xlu1 %1287 }
 0x234   : > { %1364 = vst.msk [vmem:[#allocation3 + $0xa0] sm:$0xff] %vm1343_vm7, %v1288_v62  ;;  %v1302_v51 = vpop.permute.xlu2 %1301 }
 0x235   : > { %v1292_v30 = vpop.permute.xlu0 %1291  ;;  %1371 = vst.msk [vmem:[#allocation3 + $0xd8] sm:$0xff] %vm1343_vm7, %v1302_v51  ;;  %v1590_v51 = vld [vmem:[#allocation2 + $0x121] sm:$0xff] }
 0x236   : > { %1366 = vst.msk [vmem:[#allocation3 + $0xb0] sm:$0xff] %vm1343_vm7, %v1292_v30  ;;  %v1783_v30 = vld [vmem:[#allocation2 + $0x122] sm:$0xff] }
 0x239   : > { %1489 = vrot.lane.b32.xlu1 %v3110_v13, %s2603_s29  ;;  %v1588_v13 = vld [vmem:[#allocation2 + $0x109] sm:$0xff] }
 0x23a   : > { %1656 = vrot.lane.b32.xlu2 %v1581_v46, %s2601_s27 }
 0x23b   : > { %1849 = vrot.lane.b32.xlu0 %v1774_v58, %s2602_s28  ;;  %v1294_v23 = vpop.permute.xlu1 %1293 }
 0x23c   : > { %1367 = vst.msk [vmem:[#allocation3 + $0xb8] sm:$0xff] %vm1343_vm7, %v1294_v23  ;;  %v1442_v61 = vpop.permute.xlu2 %1441  ;;  %v1596_v23 = vld [vmem:[#allocation2 + $0x169] sm:$0xff] }
 0x23d   : > { %v1298_v40 = vpop.permute.xlu0 %1297  ;;  %1538 = vst.msk [vmem:[#allocation3] sm:$0xff] %vm1537_vm8, %v1442_v61  ;;  %v1584_v61 = vld [vmem:[#allocation2 + $0xd9] sm:$0xff] }
 0x23e   : > { %1369 = vst.msk [vmem:[#allocation3 + $0xc8] sm:$0xff] %vm1343_vm7, %v1298_v40 }
 0x241   : > { %1670 = vrot.lane.b32.xlu1 %v1588_v13, %s2601_s27 }
 0x242   : > { %1837 = vrot.lane.b32.xlu2 %v1768_v41, %s2602_s28 }
 0x243   : > { %1863 = vrot.lane.b32.xlu0 %v1781_v3, %s2602_s28  ;;  %v1300_v35 = vpop.permute.xlu1 %1299 }
 0x244   : > { %1370 = vst.msk [vmem:[#allocation3 + $0xd0] sm:$0xff] %vm1343_vm7, %v1300_v35  ;;  %v1444_v4 = vpop.permute.xlu2 %1443  ;;  %v1398_v35 = vld [vmem:[#allocation2 + $0x128] sm:$0xff] }
 0x245   : > { %v1304_v24 = vpop.permute.xlu0 %1303  ;;  %1539 = vst.msk [vmem:[#allocation3 + $0x8] sm:$0xff] %vm1537_vm8, %v1444_v4 }
 0x246   : > { %1372 = vst.msk [vmem:[#allocation3 + $0xe0] sm:$0xff] %vm1343_vm7, %v1304_v24  ;;  %v1391_v24 = vld [vmem:[#allocation2 + $0xd8] sm:$0xff] }
 0x249   : > { %1875 = vrot.lane.b32.xlu1 %v1787_v28, %s2602_s28  ;;  %v1777_v28 = vld [vmem:[#allocation2 + $0xda] sm:$0xff] }
 0x24a   : > { %1682 = vrot.lane.b32.xlu2 %v1594_v6, %s2601_s27 }
 0x24b   : > { %1465 = vrot.lane.b32.xlu0 %v1389_v9, %s2603_s29  ;;  %v1306_v14 = vpop.permute.xlu1 %1305 }
 0x24c   : > { %1373 = vst.msk [vmem:[#allocation3 + $0xe8] sm:$0xff] %vm1343_vm7, %v1306_v14  ;;  %v1446_v7 = vpop.permute.xlu2 %1445 }
 0x24d   : > { %v1635_v10 = vpop.permute.xlu0 %1634  ;;  %1540 = vst.msk [vmem:[#allocation3 + $0x10] sm:$0xff] %vm1537_vm8, %v1446_v7  ;;  %v1591_v7 = vld [vmem:[#allocation2 + $0x129] sm:$0xff] }
 0x24e   : > { %1731 = vst.msk [vmem:[#allocation3] sm:$0xff] %vm1730_vm9, %v1635_v10  ;;  %v1404_v10 = vld [vmem:[#allocation2 + $0x170] sm:$0xff] }
 0x251   : > { %1646 = vrot.lane.b32.xlu1 %v1576_v15, %s2601_s27  ;;  %v1784_v15 = vld [vmem:[#allocation2 + $0x12a] sm:$0xff] }
 0x252   : > { %1453 = vrot.lane.b32.xlu2 %v1383_v42, %s2603_s29 }
 0x253   : > { %1479 = vrot.lane.b32.xlu0 %v1396_v26, %s2603_s29  ;;  %v1828_v11 = vpop.permute.xlu1 %1827 }
 0x254   : > { %1924 = vst.msk [vmem:[#allocation3] sm:$0xff] %vm1923_vm10, %v1828_v11  ;;  %v1651_v18 = vpop.permute.xlu2 %1650 }
 0x255   : > { %v1637_v20 = vpop.permute.xlu0 %1636 }
 0x256   : > { %1732 = vst.msk [vmem:[#allocation3 + $0x8] sm:$0xff] %vm1730_vm9, %v1637_v20  ;;  %v1790_v20 = vld [vmem:[#allocation2 + $0x172] sm:$0xff] }
 0x259   : > { %1491 = vrot.lane.b32.xlu1 %v1402_v32, %s2603_s29  ;;  %v1597_v32 = vld [vmem:[#allocation2 + $0x171] sm:$0xff] }
 0x25a   : > { %1658 = vrot.lane.b32.xlu2 %v1582_v47, %s2601_s27  ;;  %v1585_v47 = vld [vmem:[#allocation2 + $0xe1] sm:$0xff] }
 0x25b   : > { %1851 = vrot.lane.b32.xlu0 %v1775_v25, %s2602_s28  ;;  %v1830_v27 = vpop.permute.xlu1 %1829  ;;  %v1956_v38 = vld [vmem:[#allocation3] sm:$0xff] }
 0x25c   : > { %1925 = vst.msk [vmem:[#allocation3 + $0x8] sm:$0xff] %vm1923_vm10, %v1830_v27  ;;  %2507 = vmatmul.msk.f32.vlgmr.msra.gmra.mxu0 %vm1997_vm11, %v1956_v38  ;;  %v1448_v31 = vpop.permute.xlu2 %1447 }
 0x25d   : > { %v1458_v33 = vpop.permute.xlu0 %1457  ;;  %1541 = vst.msk [vmem:[#allocation3 + $0x18] sm:$0xff] %vm1537_vm8, %v1448_v31 }
 0x25e   : > { %1546 = vst.msk [vmem:[#allocation3 + $0x40] sm:$0xff] %vm1537_vm8, %v1458_v33  ;;  %v1399_v33 = vld [vmem:[#allocation2 + $0x138] sm:$0xff] }
 0x25f   : > { %1739 = vst.msk [vmem:[#allocation3 + $0x40] sm:$0xff] %vm1730_vm9, %v1651_v18 }
 0x261   : > { %1672 = vrot.lane.b32.xlu1 %v1589_v44, %s2601_s27  ;;  %v1392_v44 = vld [vmem:[#allocation2 + $0xe0] sm:$0xff] }
 0x262   : > { %1839 = vrot.lane.b32.xlu2 %v1769_v37, %s2602_s28  ;;  %v1778_v37 = vld [vmem:[#allocation2 + $0xe2] sm:$0xff] }
 0x263   : > { %1865 = vrot.lane.b32.xlu0 %v1782_v39, %s2602_s28  ;;  %v1639_v49 = vpop.permute.xlu1 %1638  ;;  %v1957_v43 = vld [vmem:[#allocation3 + $0x8] sm:$0xff] }
 0x264   : > { %1733 = vst.msk [vmem:[#allocation3 + $0x10] sm:$0xff] %vm1730_vm9, %v1639_v49  ;;  %2508 = vmatmul.msk.f32.gmra.mxu0 %vm1997_vm11, %v1957_v43  ;;  %v1653_v45 = vpop.permute.xlu2 %1652 }
 0x265   : > { %v1832_v53 = vpop.permute.xlu0 %1831 }
 0x266   : > { %1926 = vst.msk [vmem:[#allocation3 + $0x10] sm:$0xff] %vm1923_vm10, %v1832_v53  ;;  %v1592_v53 = vld [vmem:[#allocation2 + $0x139] sm:$0xff] }
 0x269   : > { %1877 = vrot.lane.b32.xlu1 %v1788_v48, %s2602_s28  ;;  %v1405_v48 = vld [vmem:[#allocation2 + $0x180] sm:$0xff] }
 0x26a   : > { %1684 = vrot.lane.b32.xlu2 %v1595_v50, %s2601_s27  ;;  %v1785_v50 = vld [vmem:[#allocation2 + $0x13a] sm:$0xff] }
 0x26b   : > { %1467 = vrot.lane.b32.xlu0 %v1390_v56, %s2603_s29  ;;  %v1844_v52 = vpop.permute.xlu1 %1843 }
 0x26c   : > { %1932 = vst.msk [vmem:[#allocation3 + $0x40] sm:$0xff] %vm1923_vm10, %v1844_v52  ;;  %v1846_v36 = vpop.permute.xlu2 %1845 }
 0x26d   : > { %v1460_v54 = vpop.permute.xlu0 %1459  ;;  %v1958_v59 = vld [vmem:[#allocation3 + $0x10] sm:$0xff] }
 0x26e   : > { %1547 = vst.msk [vmem:[#allocation3 + $0x48] sm:$0xff] %vm1537_vm8, %v1460_v54  ;;  %2509 = vmatmul.msk.f32.gmra.mxu0 %vm1997_vm11, %v1958_v59  ;;  %v1791_v59 = vld [vmem:[#allocation2 + $0x182] sm:$0xff] }
 0x26f   : > { %1740 = vst.msk [vmem:[#allocation3 + $0x48] sm:$0xff] %vm1730_vm9, %v1653_v45 }
 0x270   : > { %1933 = vst.msk [vmem:[#allocation3 + $0x48] sm:$0xff] %vm1923_vm10, %v1846_v36 }
 0x271   : > { %1648 = vrot.lane.b32.xlu1 %v1577_v12, %s2601_s27  ;;  %v1598_v12 = vld [vmem:[#allocation2 + $0x181] sm:$0xff] }
 0x272   : > { %1455 = vrot.lane.b32.xlu2 %v1384_v57, %s2603_s29  ;;  %v1406_v57 = vld [vmem:[#allocation2 + $0x188] sm:$0xff] }
 0x273   : > { %1481 = vrot.lane.b32.xlu0 %v1397_v55, %s2603_s29  ;;  %v1641_v0 = vpop.permute.xlu1 %1640  ;;  %v1964_v17 = vld [vmem:[#allocation3 + $0x40] sm:$0xff] }
 0x274   : > { %1734 = vst.msk [vmem:[#allocation3 + $0x18] sm:$0xff] %vm1730_vm9, %v1641_v0  ;;  %2515 = vmatmul.msk.f32.vlgmr.msra.gmra.mxu1 %vm1997_vm11, %v1964_v17  ;;  %v1450_v21 = vpop.permute.xlu2 %1449 }
 0x275   : > { %v1474_v22 = vpop.permute.xlu0 %1473  ;;  %1542 = vst.msk [vmem:[#allocation3 + $0x20] sm:$0xff] %vm1537_vm8, %v1450_v21 }
 0x276   : > { %1554 = vst.msk [vmem:[#allocation3 + $0x80] sm:$0xff] %vm1537_vm8, %v1474_v22  ;;  %v1593_v22 = vld [vmem:[#allocation2 + $0x141] sm:$0xff] }
 0x277   : > { %v1965_v8 = vld [vmem:[#allocation3 + $0x48] sm:$0xff] }
 0x279   : > { %1493 = vrot.lane.b32.xlu1 %v1403_v60, %s2603_s29  ;;  %v1400_v60 = vld [vmem:[#allocation2 + $0x140] sm:$0xff] }
 0x27a   : > { %1660 = vrot.lane.b32.xlu2 %v1583_v29, %s2601_s27  ;;  %v1786_v29 = vld [vmem:[#allocation2 + $0x142] sm:$0xff] }
 0x27b   : > { %1853 = vrot.lane.b32.xlu0 %v1776_v16, %s2602_s28  ;;  %v1834_v34 = vpop.permute.xlu1 %1833 }
 0x27c   : > { %1927 = vst.msk [vmem:[#allocation3 + $0x18] sm:$0xff] %vm1923_vm10, %v1834_v34  ;;  %v1655_v19 = vpop.permute.xlu2 %1654  ;;  %2516 = vmatmul.msk.f32.gmra.mxu1 %vm1997_vm11, %v1965_v8 }
 0x27d   : > { %v1667_v62 = vpop.permute.xlu0 %1666 }
 0x27e   : > { %1747 = vst.msk [vmem:[#allocation3 + $0x80] sm:$0xff] %vm1730_vm9, %v1667_v62  ;;  %v1792_v62 = vld [vmem:[#allocation2 + $0x18a] sm:$0xff] }
 0x281   : > { %1674 = vrot.lane.b32.xlu1 %v1590_v51, %s2601_s27  ;;  %v1599_v51 = vld [vmem:[#allocation2 + $0x189] sm:$0xff] }
 0x282   : > { %1841 = vrot.lane.b32.xlu2 %v1770_v1, %s2602_s28  ;;  %v1407_v1 = vld [vmem:[#allocation2 + $0x198] sm:$0xff] }
 0x283   : > { %1867 = vrot.lane.b32.xlu0 %v1783_v30, %s2602_s28  ;;  %v1860_v63 = vpop.permute.xlu1 %1859  ;;  %v1959_v2 = vld [vmem:[#allocation3 + $0x18] sm:$0xff] }
 0x284   : > { %1940 = vst.msk [vmem:[#allocation3 + $0x80] sm:$0xff] %vm1923_vm10, %v1860_v63  ;;  %2510 = vmatmul.msk.f32.gmra.mxu0 %vm1997_vm11, %v1959_v2  ;;  %v1848_v46 = vpop.permute.xlu2 %1847 }
 0x285   : > { %v1462_v58 = vpop.permute.xlu0 %1461 }
 0x286   : > { %1548 = vst.msk [vmem:[#allocation3 + $0x50] sm:$0xff] %vm1537_vm8, %v1462_v58  ;;  %v1600_v58 = vld [vmem:[#allocation2 + $0x199] sm:$0xff] }
 0x287   : > { %1741 = vst.msk [vmem:[#allocation3 + $0x50] sm:$0xff] %vm1730_vm9, %v1655_v19 }
 0x288   : > { %1934 = vst.msk [vmem:[#allocation3 + $0x50] sm:$0xff] %vm1923_vm10, %v1848_v46 }
 0x289   : > { %1879 = vrot.lane.b32.xlu1 %v1789_v5, %s2602_s28 }
 0x28a   : > { %1686 = vrot.lane.b32.xlu2 %v1596_v23, %s2601_s27 }
 0x28b   : > { %1662 = vrot.lane.b32.xlu0 %v1584_v61, %s2601_s27  ;;  %v1643_v40 = vpop.permute.xlu1 %1642  ;;  %v1972_v13 = vld [vmem:[#allocation3 + $0x80] sm:$0xff] }
 0x28c   : > { %1735 = vst.msk [vmem:[#allocation3 + $0x20] sm:$0xff] %vm1730_vm9, %v1643_v40  ;;  %2523 = vmatmul.msk.f32.vlgmr.msra.gmra.mxu2 %vm1997_vm11, %v1972_v13  ;;  %v1452_v41 = vpop.permute.xlu2 %1451  ;;  %v1408_v13 = vld [vmem:[#allocation2 + $0x1a0] sm:$0xff] }
 0x28d   : > { %v1476_v3 = vpop.permute.xlu0 %1475  ;;  %1543 = vst.msk [vmem:[#allocation3 + $0x28] sm:$0xff] %vm1537_vm8, %v1452_v41  ;;  %v1793_v41 = vld [vmem:[#allocation2 + $0x19a] sm:$0xff] }
 0x28e   : > { %1555 = vst.msk [vmem:[#allocation3 + $0x88] sm:$0xff] %vm1537_vm8, %v1476_v3  ;;  %v1794_v3 = vld [vmem:[#allocation2 + $0x1a2] sm:$0xff] }
 0x28f   : > { %v1966_v4 = vld [vmem:[#allocation3 + $0x50] sm:$0xff] }
 0x290   : > { %2517 = vmatmul.msk.f32.gmra.mxu1 %vm1997_vm11, %v1966_v4 }
 0x291   : > { %1483 = vrot.lane.b32.xlu1 %v1398_v35, %s2603_s29 }
 0x292   : > { %1469 = vrot.lane.b32.xlu2 %v1391_v24, %s2603_s29 }
 0x293   : > { %1855 = vrot.lane.b32.xlu0 %v1777_v28, %s2602_s28  ;;  %v1836_v6 = vpop.permute.xlu1 %1835 }
 0x294   : > { %1928 = vst.msk [vmem:[#allocation3 + $0x20] sm:$0xff] %vm1923_vm10, %v1836_v6  ;;  %v1657_v9 = vpop.permute.xlu2 %1656 }
 0x295   : > { %v1669_v14 = vpop.permute.xlu0 %1668 }
 0x296   : > { %1748 = vst.msk [vmem:[#allocation3 + $0x88] sm:$0xff] %vm1730_vm9, %v1669_v14 }
 0x299   : > { %1676 = vrot.lane.b32.xlu1 %v1591_v7, %s2601_s27 }
 0x29a   : > { %1495 = vrot.lane.b32.xlu2 %v1404_v10, %s2603_s29 }
 0x29b   : > { %1869 = vrot.lane.b32.xlu0 %v1784_v15, %s2602_s28  ;;  %v1862_v42 = vpop.permute.xlu1 %1861  ;;  %v1960_v26 = vld [vmem:[#allocation3 + $0x20] sm:$0xff] }
 0x29c   : > { %1941 = vst.msk [vmem:[#allocation3 + $0x88] sm:$0xff] %vm1923_vm10, %v1862_v42  ;;  %2511 = vmatmul.msk.f32.gmra.mxu0 %vm1997_vm11, %v1960_v26  ;;  %v1838_v11 = vpop.permute.xlu2 %1837 }
 0x29d   : > { %v1464_v18 = vpop.permute.xlu0 %1463 }
 0x29e   : > { %1549 = vst.msk [vmem:[#allocation3 + $0x58] sm:$0xff] %vm1537_vm8, %v1464_v18 }
 0x29f   : > { %1742 = vst.msk [vmem:[#allocation3 + $0x58] sm:$0xff] %vm1730_vm9, %v1657_v9  ;;  %v1601_v9 = vld [vmem:[#allocation2 + $0x1a1] sm:$0xff] }
 0x2a1   : > { %1881 = vrot.lane.b32.xlu1 %v1790_v20, %s2602_s28 }
 0x2a2   : > { %1688 = vrot.lane.b32.xlu2 %v1597_v32, %s2601_s27 }
 0x2a3   : > { %1664 = vrot.lane.b32.xlu0 %v1585_v47, %s2601_s27  ;;  %v1645_v25 = vpop.permute.xlu1 %1644  ;;  %v1973_v27 = vld [vmem:[#allocation3 + $0x88] sm:$0xff] }
 0x2a4   : > { %1736 = vst.msk [vmem:[#allocation3 + $0x28] sm:$0xff] %vm1730_vm9, %v1645_v25  ;;  %2524 = vmatmul.msk.f32.gmra.mxu2 %vm1997_vm11, %v1973_v27  ;;  %v1683_v38 = vpop.permute.xlu2 %1682 }
 0x2a5   : > { %1929 = vst.msk [vmem:[#allocation3 + $0x28] sm:$0xff] %vm1923_vm10, %v1838_v11  ;;  %v1478_v31 = vpop.permute.xlu0 %1477 }
 0x2a6   : > { %1556 = vst.msk [vmem:[#allocation3 + $0x90] sm:$0xff] %vm1537_vm8, %v1478_v31 }
 0x2a9   : > { %1485 = vrot.lane.b32.xlu1 %v1399_v33, %s2603_s29 }
 0x2aa   : > { %1471 = vrot.lane.b32.xlu2 %v1392_v44, %s2603_s29 }
 0x2ab   : > { %1857 = vrot.lane.b32.xlu0 %v1778_v37, %s2602_s28  ;;  %v1490_v39 = vpop.permute.xlu1 %1489 }
 0x2ac   : > { %1562 = vst.msk [vmem:[#allocation3 + $0xc0] sm:$0xff] %vm1537_vm8, %v1490_v39  ;;  %v1961_v49 = vld [vmem:[#allocation3 + $0x28] sm:$0xff]  ;;  %v1454_v43 = vpop.permute.xlu2 %1453 }
 0x2ad   : > { %1755 = vst.msk [vmem:[#allocation3 + $0xc0] sm:$0xff] %vm1730_vm9, %v1683_v38  ;;  %v1850_v45 = vpop.permute.xlu0 %1849  ;;  %2512 = vmatmul.msk.f32.gmra.mxu0 %vm1997_vm11, %v1961_v49 }
 0x2ae   : > { %1935 = vst.msk [vmem:[#allocation3 + $0x58] sm:$0xff] %vm1923_vm10, %v1850_v45 }
 0x2af   : > { %1544 = vst.msk [vmem:[#allocation3 + $0x30] sm:$0xff] %vm1537_vm8, %v1454_v43 }
 0x2b1   : > { %1678 = vrot.lane.b32.xlu1 %v1592_v53, %s2601_s27 }
 0x2b2   : > { %1497 = vrot.lane.b32.xlu2 %v1405_v48, %s2603_s29 }
 0x2b3   : > { %1871 = vrot.lane.b32.xlu0 %v1785_v50, %s2602_s28  ;;  %v1671_v56 = vpop.permute.xlu1 %1670 }
 0x2b4   : > { %1749 = vst.msk [vmem:[#allocation3 + $0x90] sm:$0xff] %vm1730_vm9, %v1671_v56  ;;  %v1659_v52 = vpop.permute.xlu2 %1658 }
 0x2b5   : > { %v1864_v36 = vpop.permute.xlu0 %1863  ;;  %v1967_v54 = vld [vmem:[#allocation3 + $0x58] sm:$0xff] }
 0x2b6   : > { %1942 = vst.msk [vmem:[#allocation3 + $0x90] sm:$0xff] %vm1923_vm10, %v1864_v36  ;;  %2518 = vmatmul.msk.f32.gmra.mxu1 %vm1997_vm11, %v1967_v54 }
 0x2b9   : > { %1883 = vrot.lane.b32.xlu1 %v1791_v59, %s2602_s28 }
 0x2ba   : > { %1690 = vrot.lane.b32.xlu2 %v1598_v12, %s2601_s27 }
 0x2bb   : > { %1499 = vrot.lane.b32.xlu0 %v1406_v57, %s2603_s29  ;;  %v1876_v55 = vpop.permute.xlu1 %1875 }
 0x2bc   : > { %1948 = vst.msk [vmem:[#allocation3 + $0xc0] sm:$0xff] %vm1923_vm10, %v1876_v55  ;;  %v1840_v0 = vpop.permute.xlu2 %1839 }
 0x2bd   : > { %v1466_v17 = vpop.permute.xlu0 %1465  ;;  %v1974_v21 = vld [vmem:[#allocation3 + $0x90] sm:$0xff] }
 0x2be   : > { %1550 = vst.msk [vmem:[#allocation3 + $0x60] sm:$0xff] %vm1537_vm8, %v1466_v17  ;;  %2525 = vmatmul.msk.f32.gmra.mxu2 %vm1997_vm11, %v1974_v21 }
 0x2bf   : > { %1743 = vst.msk [vmem:[#allocation3 + $0x60] sm:$0xff] %vm1730_vm9, %v1659_v52 }
 0x2c1   : > { %1680 = vrot.lane.b32.xlu1 %v1593_v22, %s2601_s27 }
 0x2c2   : > { %1487 = vrot.lane.b32.xlu2 %v1400_v60, %s2603_s29 }
 0x2c3   : > { %1873 = vrot.lane.b32.xlu0 %v1786_v29, %s2602_s28  ;;  %v1647_v16 = vpop.permute.xlu1 %1646  ;;  %v1980_v8 = vld [vmem:[#allocation3 + $0xc0] sm:$0xff] }
 0x2c4   : > { %1737 = vst.msk [vmem:[#allocation3 + $0x30] sm:$0xff] %vm1730_vm9, %v1647_v16  ;;  %2531 = vmatmul.msk.f32.vlgmr.msra.gmra.mxu3 %vm1997_vm11, %v1980_v8  ;;  %v1685_v34 = vpop.permute.xlu2 %1684 }
 0x2c5   : > { %1930 = vst.msk [vmem:[#allocation3 + $0x30] sm:$0xff] %vm1923_vm10, %v1840_v0  ;;  %v1480_v19 = vpop.permute.xlu0 %1479 }
 0x2c6   : > { %1557 = vst.msk [vmem:[#allocation3 + $0x98] sm:$0xff] %vm1537_vm8, %v1480_v19 }
 0x2c9   : > { %1885 = vrot.lane.b32.xlu1 %v1792_v62, %s2602_s28 }
 0x2ca   : > { %1692 = vrot.lane.b32.xlu2 %v1599_v51, %s2601_s27 }
 0x2cb   : > { %1501 = vrot.lane.b32.xlu0 %v1407_v1, %s2603_s29  ;;  %v1492_v30 = vpop.permute.xlu1 %1491 }
 0x2cc   : > { %1563 = vst.msk [vmem:[#allocation3 + $0xc8] sm:$0xff] %vm1537_vm8, %v1492_v30  ;;  %v1962_v63 = vld [vmem:[#allocation3 + $0x30] sm:$0xff]  ;;  %v1456_v2 = vpop.permute.xlu2 %1455 }
 0x2cd   : > { %1756 = vst.msk [vmem:[#allocation3 + $0xc8] sm:$0xff] %vm1730_vm9, %v1685_v34  ;;  %v1852_v46 = vpop.permute.xlu0 %1851  ;;  %2513 = vmatmul.msk.f32.gmra.mxu0 %vm1997_vm11, %v1962_v63 }
 0x2ce   : > { %1936 = vst.msk [vmem:[#allocation3 + $0x60] sm:$0xff] %vm1923_vm10, %v1852_v46 }
 0x2cf   : > { %1545 = vst.msk [vmem:[#allocation3 + $0x38] sm:$0xff] %vm1537_vm8, %v1456_v2 }
 0x2d1   : > { %1694 = vrot.lane.b32.xlu1 %v1600_v58, %s2601_s27 }
 0x2d2   : > { %1307 = vrot.lane.b32.xlu2 %v1791_v59, %s2600_s26 }
 0x2d3   : > { %1309 = vrot.lane.b32.xlu0 %v1792_v62, %s2600_s26  ;;  %v1673_v5 = vpop.permute.xlu1 %1672 }
 0x2d4   : > { %1750 = vst.msk [vmem:[#allocation3 + $0x98] sm:$0xff] %vm1730_vm9, %v1673_v5  ;;  %v1661_v23 = vpop.permute.xlu2 %1660 }
 0x2d5   : > { %v1866_v61 = vpop.permute.xlu0 %1865  ;;  %v1968_v40 = vld [vmem:[#allocation3 + $0x60] sm:$0xff] }
 0x2d6   : > { %1943 = vst.msk [vmem:[#allocation3 + $0x98] sm:$0xff] %vm1923_vm10, %v1866_v61  ;;  %2519 = vmatmul.msk.f32.gmra.mxu1 %vm1997_vm11, %v1968_v40 }
 0x2d9   : > { %1503 = vrot.lane.b32.xlu1 %v1408_v13, %s2603_s29  ;;  %v2111_v35 = vpop.f32.mrf.mxu0 }
 0x2da   : > { %2207 = vst.msk [vmem:[%s3669_s30] sm:$0xff] %vm268_vm0, %v2111_v35  ;;  %1887 = vrot.lane.b32.xlu2 %v1793_v41, %s2602_s28  ;;  %v2309_v14 = vmul.f32 %v2111_v35, %v2111_v35  ;;  %v2239_v10 = vsel %vm268_vm0, %v2111_v35, 0.0 }
 0x2db   : > { %1889 = vrot.lane.b32.xlu0 %v1794_v3, %s2602_s28  ;;  %v1878_v4 = vpop.permute.xlu1 %1877  ;;  %s235_s28 = scalar_lea.vmem %s3949_s5, %s2506_s19 }
 0x2dc   : > { %1949 = vst.msk [vmem:[#allocation3 + $0xc8] sm:$0xff] %vm1923_vm10, %v1878_v4  ;;  %v1842_v24 = vpop.permute.xlu2 %1841  ;;  %v2341_v20 = vsel %vm268_vm0, %v2309_v14, 0.0 }
 0x2dd   : > { %v1468_v28 = vpop.permute.xlu0 %1467  ;;  %v1975_v6 = vld [vmem:[#allocation3 + $0x98] sm:$0xff] }
 0x2de   : > { %1551 = vst.msk [vmem:[#allocation3 + $0x68] sm:$0xff] %vm1537_vm8, %v1468_v28  ;;  %2526 = vmatmul.msk.f32.gmra.mxu2 %vm1997_vm11, %v1975_v6 }
 0x2df   : > { %1744 = vst.msk [vmem:[#allocation3 + $0x68] sm:$0xff] %vm1730_vm9, %v1661_v23 }
 0x2e1   : > { %v2114_v7 = vpop.f32.mrf.mxu0 }
 0x2e2   : > { %2208 = vst.msk [vmem:[%s3669_s30 + $0x8] sm:$0xff] %vm268_vm0, %v2114_v7  ;;  %v2240_v15 = vsel %vm268_vm0, %v2114_v7, 0.0  ;;  %v2310_v42 = vmul.f32 %v2114_v7, %v2114_v7  ;;  %1696 = vrot.lane.b32.xlu2 %v1601_v9, %s2601_s27 }
 0x2e3   : > { %v2241_v26 = vadd.f32 %v2240_v15, %v2239_v10  ;;  %v1649_v11 = vpop.permute.xlu1 %1648  ;;  %v1981_v18 = vld [vmem:[#allocation3 + $0xc8] sm:$0xff] }
 0x2e4   : > { %v2342_v32 = vsel %vm268_vm0, %v2310_v42, 0.0  ;;  %1738 = vst.msk [vmem:[#allocation3 + $0x38] sm:$0xff] %vm1730_vm9, %v1649_v11  ;;  %2532 = vmatmul.msk.f32.gmra.mxu3 %vm1997_vm11, %v1981_v18  ;;  %v1687_v47 = vpop.permute.xlu2 %1686 }
 0x2e5   : > { %v2343_v25 = vadd.f32 %v2342_v32, %v2341_v20  ;;  %1931 = vst.msk [vmem:[#allocation3 + $0x38] sm:$0xff] %vm1923_vm10, %v1842_v24  ;;  %v1482_v27 = vpop.permute.xlu0 %1481 }
 0x2e6   : > { %1558 = vst.msk [vmem:[#allocation3 + $0xa0] sm:$0xff] %vm1537_vm8, %v1482_v27 }
 0x2eb   : > { %v1494_v38 = vpop.permute.xlu1 %1493  ;;  %v2117_v31 = vpop.f32.mrf.mxu0 }
 0x2ec   : > { %1564 = vst.msk [vmem:[#allocation3 + $0xd0] sm:$0xff] %vm1537_vm8, %v1494_v38  ;;  %v2242_v33 = vsel %vm268_vm0, %v2117_v31, 0.0  ;;  %v2311_v44 = vmul.f32 %v2117_v31, %v2117_v31  ;;  %v1963_v37 = vld [vmem:[#allocation3 + $0x38] sm:$0xff]  ;;  %v1470_v39 = vpop.permute.xlu2 %1469 }
 0x2ed   : > { %2209 = vst.msk [vmem:[%s3669_s30 + $0x10] sm:$0xff] %vm268_vm0, %v2117_v31  ;;  %v2243_v49 = vadd.f32 %v2242_v33, %v2241_v26  ;;  %v1854_v43 = vpop.permute.xlu0 %1853  ;;  %2514 = vmatmul.msk.f32.gmra.mxu0 %vm1997_vm11, %v1963_v37 }
 0x2ee   : > { %v2344_v45 = vsel %vm268_vm0, %v2311_v44, 0.0  ;;  %1937 = vst.msk [vmem:[#allocation3 + $0x68] sm:$0xff] %vm1923_vm10, %v1854_v43 }
 0x2ef   : > { %v2345_v53 = vadd.f32 %v2344_v45, %v2343_v25  ;;  %1757 = vst.msk [vmem:[#allocation3 + $0xd0] sm:$0xff] %vm1730_vm9, %v1687_v47 }
 0x2f0   : > { %1552 = vst.msk [vmem:[#allocation3 + $0x70] sm:$0xff] %vm1537_vm8, %v1470_v39 }
 0x2f1   : > { %v3700_v48 = vpop.f32.mrf.mxu1 }
 0x2f2   : > { %2215 = vst.msk [vmem:[%s3669_s30 + $0x40] sm:$0xff] %vm268_vm0, %v3700_v48 }
 0x2f3   : > { %v1675_v50 = vpop.permute.xlu1 %1674 }
 0x2f4   : > { %1751 = vst.msk [vmem:[#allocation3 + $0xa0] sm:$0xff] %vm1730_vm9, %v1675_v50  ;;  %v1496_v56 = vpop.permute.xlu2 %1495 }
 0x2f5   : > { %v1868_v52 = vpop.permute.xlu0 %1867  ;;  %v1969_v36 = vld [vmem:[#allocation3 + $0x68] sm:$0xff]  ;;  %1565 = vst.msk [vmem:[#allocation3 + $0xd8] sm:$0xff] %vm1537_vm8, %v1496_v56 }
 0x2f6   : > { %1944 = vst.msk [vmem:[#allocation3 + $0xa0] sm:$0xff] %vm1923_vm10, %v1868_v52  ;;  %2520 = vmatmul.msk.f32.gmra.mxu1 %vm1997_vm11, %v1969_v36 }
 0x2f9   : > { %v3709_v54 = vpop.f32.mrf.mxu1 }
 0x2fa   : > { %2216 = vst.msk [vmem:[%s3669_s30 + $0x48] sm:$0xff] %vm268_vm0, %v3709_v54 }
 0x2fb   : > { %v1880_v59 = vpop.permute.xlu1 %1879 }
 0x2fc   : > { %1950 = vst.msk [vmem:[#allocation3 + $0xd0] sm:$0xff] %vm1923_vm10, %v1880_v59  ;;  %v1689_v12 = vpop.permute.xlu2 %1688 }
 0x2fd   : > { %v1663_v57 = vpop.permute.xlu0 %1662  ;;  %v1976_v55 = vld [vmem:[#allocation3 + $0xa0] sm:$0xff]  ;;  %1758 = vst.msk [vmem:[#allocation3 + $0xd8] sm:$0xff] %vm1730_vm9, %v1689_v12 }
 0x2fe   : > { %1745 = vst.msk [vmem:[#allocation3 + $0x70] sm:$0xff] %vm1730_vm9, %v1663_v57  ;;  %2527 = vmatmul.msk.f32.gmra.mxu2 %vm1997_vm11, %v1976_v55 }
 0x301   : > { %v2120_v0 = vpop.f32.mrf.mxu0 }
 0x302   : > { %2210 = vst.msk [vmem:[%s3669_s30 + $0x18] sm:$0xff] %vm268_vm0, %v2120_v0  ;;  %v2244_v17 = vsel %vm268_vm0, %v2120_v0, 0.0  ;;  %v2312_v21 = vmul.f32 %v2120_v0, %v2120_v0 }
 0x303   : > { %v2245_v22 = vadd.f32 %v2244_v17, %v2243_v49  ;;  %v1484_v60 = vpop.permute.xlu1 %1483  ;;  %v1982_v29 = vld [vmem:[#allocation3 + $0xd0] sm:$0xff] }
 0x304   : > { %v2346_v16 = vsel %vm268_vm0, %v2312_v21, 0.0  ;;  %1559 = vst.msk [vmem:[#allocation3 + $0xa8] sm:$0xff] %vm1537_vm8, %v1484_v60  ;;  %2533 = vmatmul.msk.f32.gmra.mxu3 %vm1997_vm11, %v1982_v29  ;;  %v1472_v8 = vpop.permute.xlu2 %1471 }
 0x305   : > { %v2347_v34 = vadd.f32 %v2346_v16, %v2345_v53  ;;  %v1856_v19 = vpop.permute.xlu0 %1855  ;;  %1553 = vst.msk [vmem:[#allocation3 + $0x78] sm:$0xff] %vm1537_vm8, %v1472_v8 }
 0x306   : > { %1938 = vst.msk [vmem:[#allocation3 + $0x70] sm:$0xff] %vm1923_vm10, %v1856_v19 }
 0x30b   : > { %v1677_v62 = vpop.permute.xlu1 %1676 }
 0x30c   : > { %1752 = vst.msk [vmem:[#allocation3 + $0xa8] sm:$0xff] %vm1730_vm9, %v1677_v62  ;;  %v1498_v51 = vpop.permute.xlu2 %1497 }
 0x30d   : > { %v1870_v1 = vpop.permute.xlu0 %1869  ;;  %v1970_v30 = vld [vmem:[#allocation3 + $0x70] sm:$0xff]  ;;  %v3727_v63 = vpop.f32.mrf.mxu1  ;;  %1566 = vst.msk [vmem:[#allocation3 + $0xe0] sm:$0xff] %vm1537_vm8, %v1498_v51  ;;  %v2317_v51 = vmul.f32 %v3700_v48, %v3700_v48 }
 0x30e   : > { %1945 = vst.msk [vmem:[#allocation3 + $0xa8] sm:$0xff] %vm1923_vm10, %v1870_v1  ;;  %2521 = vmatmul.msk.f32.gmra.mxu1 %vm1997_vm11, %v1970_v30 }
 0x30f   : > { %v3732_v2 = vpop.f32.mrf.mxu2  ;;  %2217 = vst.msk [vmem:[%s3669_s30 + $0x50] sm:$0xff] %vm268_vm0, %v3727_v63 }
 0x310   : > { %2223 = vst.msk [vmem:[%s3669_s30 + $0x80] sm:$0xff] %vm268_vm0, %v3732_v2 }
 0x313   : > { %v1882_v46 = vpop.permute.xlu1 %1881 }
 0x314   : > { %1951 = vst.msk [vmem:[#allocation3 + $0xd8] sm:$0xff] %vm1923_vm10, %v1882_v46  ;;  %v1691_v58 = vpop.permute.xlu2 %1690 }
 0x315   : > { %v1665_v5 = vpop.permute.xlu0 %1664  ;;  %v1977_v23 = vld [vmem:[#allocation3 + $0xa8] sm:$0xff]  ;;  %1759 = vst.msk [vmem:[#allocation3 + $0xe0] sm:$0xff] %vm1730_vm9, %v1691_v58  ;;  %v2254_v58 = vsel %vm268_vm0, %v3700_v48, 0.0 }
 0x316   : > { %1746 = vst.msk [vmem:[#allocation3 + $0x78] sm:$0xff] %vm1730_vm9, %v1665_v5  ;;  %2528 = vmatmul.msk.f32.gmra.mxu2 %vm1997_vm11, %v1977_v23  ;;  %v2318_v5 = vmul.f32 %v3709_v54, %v3709_v54 }
 0x318   : > { %v2358_v48 = vsel %vm268_vm0, %v2318_v5, 0.0 }
 0x319   : > { %v2123_v61 = vpop.f32.mrf.mxu0 }
 0x31a   : > { %2211 = vst.msk [vmem:[%s3669_s30 + $0x20] sm:$0xff] %vm268_vm0, %v2123_v61  ;;  %v2246_v40 = vsel %vm268_vm0, %v2123_v61, 0.0  ;;  %v2313_v13 = vmul.f32 %v2123_v61, %v2123_v61 }
 0x31b   : > { %v2247_v41 = vadd.f32 %v2246_v40, %v2245_v22  ;;  %v1486_v3 = vpop.permute.xlu1 %1485  ;;  %v1983_v35 = vld [vmem:[#allocation3 + $0xd8] sm:$0xff] }
 0x31c   : > { %v2348_v4 = vsel %vm268_vm0, %v2313_v13, 0.0  ;;  %1560 = vst.msk [vmem:[#allocation3 + $0xb0] sm:$0xff] %vm1537_vm8, %v1486_v3  ;;  %2534 = vmatmul.msk.f32.gmra.mxu3 %vm1997_vm11, %v1983_v35  ;;  %v1488_v24 = vpop.permute.xlu2 %1487  ;;  %v2356_v13 = vsel %vm268_vm0, %v2317_v51, 0.0  ;;  %v2319_v3 = vmul.f32 %v3727_v63, %v3727_v63 }
 0x31d   : > { %v2349_v28 = vadd.f32 %v2348_v4, %v2347_v34  ;;  %v1858_v6 = vpop.permute.xlu0 %1857  ;;  %1561 = vst.msk [vmem:[#allocation3 + $0xb8] sm:$0xff] %vm1537_vm8, %v1488_v24  ;;  %v2258_v24 = vsel %vm268_vm0, %v3727_v63, 0.0 }
 0x31e   : > { %1939 = vst.msk [vmem:[#allocation3 + $0x78] sm:$0xff] %vm1923_vm10, %v1858_v6 }
 0x323   : > { %v1679_v9 = vpop.permute.xlu1 %1678 }
 0x324   : > { %1753 = vst.msk [vmem:[#allocation3 + $0xb0] sm:$0xff] %vm1730_vm9, %v1679_v9  ;;  %v1693_v14 = vpop.permute.xlu2 %1692 }
 0x325   : > { %v1872_v7 = vpop.permute.xlu0 %1871  ;;  %v1971_v10 = vld [vmem:[#allocation3 + $0x78] sm:$0xff] }
 0x326   : > { %1946 = vst.msk [vmem:[#allocation3 + $0xb0] sm:$0xff] %vm1923_vm10, %v1872_v7  ;;  %2522 = vmatmul.msk.f32.gmra.mxu1 %vm1997_vm11, %v1971_v10 }
 0x327   : > { %v3755_v15 = vpop.f32.mrf.mxu2 }
 0x328   : > { %2224 = vst.msk [vmem:[%s3669_s30 + $0x88] sm:$0xff] %vm268_vm0, %v3755_v15 }
 0x32a   : > { %v2126_v42 = vpop.f32.mrf.mxu0 }
 0x32b   : > { %2212 = vst.msk [vmem:[%s3669_s30 + $0x28] sm:$0xff] %vm268_vm0, %v2126_v42  ;;  %v2248_v26 = vsel %vm268_vm0, %v2126_v42, 0.0  ;;  %v2314_v11 = vmul.f32 %v2126_v42, %v2126_v42  ;;  %v1884_v18 = vpop.permute.xlu1 %1883 }
 0x32c   : > { %v2249_v20 = vadd.f32 %v2248_v26, %v2247_v41  ;;  %1952 = vst.msk [vmem:[#allocation3 + $0xe0] sm:$0xff] %vm1923_vm10, %v1884_v18  ;;  %v1308_v32 = vpop.permute.xlu2 %1307  ;;  %v2256_v41 = vsel %vm268_vm0, %v3709_v54, 0.0 }
 0x32d   : > { %v2350_v47 = vsel %vm268_vm0, %v2314_v11, 0.0  ;;  %v1500_v25 = vpop.permute.xlu0 %1499  ;;  %v1978_v27 = vld [vmem:[#allocation3 + $0xb0] sm:$0xff]  ;;  %1374 = vst.msk [vmem:[#allocation3 + $0xf0] sm:$0xff] %vm1343_vm7, %v1308_v32 }
 0x32e   : > { %v2351_v38 = vadd.f32 %v2350_v47, %v2349_v28  ;;  %1567 = vst.msk [vmem:[#allocation3 + $0xe8] sm:$0xff] %vm1537_vm8, %v1500_v25  ;;  %2529 = vmatmul.msk.f32.gmra.mxu2 %vm1997_vm11, %v1978_v27 }
 0x32f   : > { %1760 = vst.msk [vmem:[#allocation3 + $0xe8] sm:$0xff] %vm1730_vm9, %v1693_v14  ;;  %v2360_v14 = vsel %vm268_vm0, %v2319_v3, 0.0 }
 0x333   : > { %v3769_v31 = vpop.f32.mrf.mxu1  ;;  %v1681_v33 = vpop.permute.xlu1 %1680  ;;  %v1984_v44 = vld [vmem:[#allocation3 + $0xe0] sm:$0xff] }
 0x334   : > { %2218 = vst.msk [vmem:[%s3669_s30 + $0x58] sm:$0xff] %vm268_vm0, %v3769_v31  ;;  %2535 = vmatmul.msk.f32.gmra.mxu3 %vm1997_vm11, %v1984_v44  ;;  %v1888_v45 = vpop.permute.xlu2 %1887  ;;  %v2320_v28 = vmul.f32 %v3769_v31, %v3769_v31  ;;  %v2260_v54 = vsel %vm268_vm0, %v3769_v31, 0.0 }
 0x335   : > { %1754 = vst.msk [vmem:[#allocation3 + $0xb8] sm:$0xff] %vm1730_vm9, %v1681_v33  ;;  %v1874_v37 = vpop.permute.xlu0 %1873 }
 0x336   : > { %1947 = vst.msk [vmem:[#allocation3 + $0xb8] sm:$0xff] %vm1923_vm10, %v1874_v37  ;;  %v2362_v63 = vsel %vm268_vm0, %v2320_v28, 0.0 }
 0x33b   : > { %v1886_v39 = vpop.permute.xlu1 %1885 }
 0x33c   : > { %1953 = vst.msk [vmem:[#allocation3 + $0xe8] sm:$0xff] %vm1923_vm10, %v1886_v39  ;;  %v1697_v12 = vpop.permute.xlu2 %1696 }
 0x33d   : > { %v1502_v49 = vpop.permute.xlu0 %1501  ;;  %v1979_v43 = vld [vmem:[#allocation3 + $0xb8] sm:$0xff] }
 0x33e   : > { %1568 = vst.msk [vmem:[#allocation3 + $0xf0] sm:$0xff] %vm1537_vm8, %v1502_v49  ;;  %2530 = vmatmul.msk.f32.gmra.mxu2 %vm1997_vm11, %v1979_v43 }
 0x341   : > { %v3780_v53 = vpop.f32.mrf.mxu2 }
 0x342   : > { %2225 = vst.msk [vmem:[%s3669_s30 + $0x90] sm:$0xff] %vm268_vm0, %v3780_v53  ;;  %v2327_v51 = vmul.f32 %v3780_v53, %v3780_v53 }
 0x343   : > { %v1695_v50 = vpop.permute.xlu1 %1694  ;;  %v1985_v56 = vld [vmem:[#allocation3 + $0xe8] sm:$0xff] }
 0x344   : > { %1761 = vst.msk [vmem:[#allocation3 + $0xf0] sm:$0xff] %vm1730_vm9, %v1695_v50  ;;  %2536 = vmatmul.msk.f32.gmra.mxu3 %vm1997_vm11, %v1985_v56 }
 0x345   : > { %1954 = vst.msk [vmem:[#allocation3 + $0xf0] sm:$0xff] %vm1923_vm10, %v1888_v45  ;;  %v1310_v52 = vpop.permute.xlu0 %1309 }
 0x346   : > { %1375 = vst.msk [vmem:[#allocation3 + $0xf8] sm:$0xff] %vm1343_vm7, %v1310_v52 }
 0x347   : > { %v3789_v36 = vpop.f32.mrf.mxu3 }
 0x348   : > { %2231 = vst.msk [vmem:[%s3669_s30 + $0xc0] sm:$0xff] %vm268_vm0, %v3789_v36 }
 0x34a   : > { %v2129_v59 = vpop.f32.mrf.mxu0 }
 0x34b   : > { %2213 = vst.msk [vmem:[%s3669_s30 + $0x30] sm:$0xff] %vm268_vm0, %v2129_v59  ;;  %v2250_v57 = vsel %vm268_vm0, %v2129_v59, 0.0  ;;  %v2315_v55 = vmul.f32 %v2129_v59, %v2129_v59  ;;  %v1504_v0 = vpop.permute.xlu1 %1503 }
 0x34c   : > { %v2251_v17 = vadd.f32 %v2250_v57, %v2249_v20  ;;  %1569 = vst.msk [vmem:[#allocation3 + $0xf8] sm:$0xff] %vm1537_vm8, %v1504_v0  ;;  %v1986_v21 = vld [vmem:[#allocation3 + $0xf0] sm:$0xff] }
 0x34d   : > { %v2352_v22 = vsel %vm268_vm0, %v2315_v55, 0.0  ;;  %1762 = vst.msk [vmem:[#allocation3 + $0xf8] sm:$0xff] %vm1730_vm9, %v1697_v12  ;;  %v1890_v60 = vpop.permute.xlu0 %1889  ;;  %2537 = vmatmul.msk.f32.gmra.mxu3 %vm1997_vm11, %v1986_v21  ;;  %v2325_v12 = vmul.f32 %v3732_v2, %v3732_v2  ;;  %v2270_v21 = vsel %vm268_vm0, %v3732_v2, 0.0  ;;  %v2274_v2 = vsel %vm268_vm0, %v3780_v53, 0.0 }
 0x34e   : > { %v2353_v29 = vadd.f32 %v2352_v22, %v2351_v38  ;;  %1955 = vst.msk [vmem:[#allocation3 + $0xf8] sm:$0xff] %vm1923_vm10, %v1890_v60  ;;  %v2326_v22 = vmul.f32 %v3755_v15, %v3755_v15 }
 0x353   : > { %v2147_v16 = vpop.f32.mrf.mxu1 }
 0x354   : > { %2219 = vst.msk [vmem:[%s3669_s30 + $0x60] sm:$0xff] %vm268_vm0, %v2147_v16  ;;  %v2321_v7 = vmul.f32 %v2147_v16, %v2147_v16  ;;  %v2262_v11 = vsel %vm268_vm0, %v2147_v16, 0.0 }
 0x355   : > { %v1987_v8 = vld [vmem:[#allocation3 + $0xf8] sm:$0xff] }
 0x356   : > { %2538 = vmatmul.msk.f32.gmra.mxu3 %vm1997_vm11, %v1987_v8  ;;  %v2364_v47 = vsel %vm268_vm0, %v2321_v7, 0.0  ;;  %v2372_v8 = vsel %vm268_vm0, %v2325_v12, 0.0 }
 0x361   : > { %v3805_v34 = vpop.f32.mrf.mxu2 }
 0x362   : > { %2226 = vst.msk [vmem:[%s3669_s30 + $0x98] sm:$0xff] %vm268_vm0, %v3805_v34 }
 0x367   : > { %v3810_v19 = vpop.f32.mrf.mxu3 }
 0x368   : > { %2232 = vst.msk [vmem:[%s3669_s30 + $0xc8] sm:$0xff] %vm268_vm0, %v3810_v19 }
 0x36a   : > { %v2132_v62 = vpop.f32.mrf.mxu0 }
 0x36b   : > { %2214 = vst.msk [vmem:[%s3669_s30 + $0x38] sm:$0xff] %vm268_vm0, %v2132_v62  ;;  %v2252_v1 = vsel %vm268_vm0, %v2132_v62, 0.0  ;;  %v2316_v30 = vmul.f32 %v2132_v62, %v2132_v62  ;;  %v2272_v62 = vsel %vm268_vm0, %v3755_v15, 0.0  ;;  %v2276_v15 = vsel %vm268_vm0, %v3805_v34, 0.0 }
 0x36c   : > { %v2253_v46 = vadd.f32 %v2252_v1, %v2251_v17 }
 0x36d   : > { %v2354_v23 = vsel %vm268_vm0, %v2316_v30, 0.0 }
 0x36e   : > { %v2255_v61 = vadd.f32 %v2254_v58, %v2253_v46  ;;  %v2355_v40 = vadd.f32 %v2354_v23, %v2353_v29  ;;  %v2374_v46 = vsel %vm268_vm0, %v2326_v22, 0.0  ;;  %v2328_v58 = vmul.f32 %v3805_v34, %v3805_v34 }
 0x370   : > { %v2257_v35 = vadd.f32 %v2256_v41, %v2255_v61  ;;  %v2357_v4 = vadd.f32 %v2356_v13, %v2355_v40  ;;  %v2376_v61 = vsel %vm268_vm0, %v2327_v51, 0.0  ;;  %v2378_v3 = vsel %vm268_vm0, %v2328_v58, 0.0 }
 0x372   : > { %v2259_v6 = vadd.f32 %v2258_v24, %v2257_v35  ;;  %v2359_v9 = vadd.f32 %v2358_v48, %v2357_v4 }
 0x373   : > { %v2150_v10 = vpop.f32.mrf.mxu1 }
 0x374   : > { %v2361_v42 = vadd.f32 %v2360_v14, %v2359_v9  ;;  %2220 = vst.msk [vmem:[%s3669_s30 + $0x68] sm:$0xff] %vm268_vm0, %v2150_v10  ;;  %v2261_v26 = vadd.f32 %v2260_v54, %v2259_v6  ;;  %v2322_v18 = vmul.f32 %v2150_v10, %v2150_v10  ;;  %v2264_v25 = vsel %vm268_vm0, %v2150_v10, 0.0 }
 0x376   : > { %v2263_v20 = vadd.f32 %v2262_v11, %v2261_v26  ;;  %v2363_v32 = vadd.f32 %v2362_v63, %v2361_v42  ;;  %v2366_v31 = vsel %vm268_vm0, %v2322_v18, 0.0  ;;  %v2333_v18 = vmul.f32 %v3789_v36, %v3789_v36 }
 0x378   : > { %v2265_v27 = vadd.f32 %v2264_v25, %v2263_v20  ;;  %v2365_v38 = vadd.f32 %v2364_v47, %v2363_v32 }
 0x37a   : > { %v2367_v33 = vadd.f32 %v2366_v31, %v2365_v38  ;;  %v2334_v38 = vmul.f32 %v3810_v19, %v3810_v19 }
 0x381   : > { %v2171_v44 = vpop.f32.mrf.mxu2 }
 0x382   : > { %2227 = vst.msk [vmem:[%s3669_s30 + $0xa0] sm:$0xff] %vm268_vm0, %v2171_v44  ;;  %v2329_v40 = vmul.f32 %v2171_v44, %v2171_v44  ;;  %v2278_v35 = vsel %vm268_vm0, %v2171_v44, 0.0 }
 0x384   : > { %v2380_v48 = vsel %vm268_vm0, %v2329_v40, 0.0 }
 0x387   : > { %v3847_v37 = vpop.f32.mrf.mxu3 }
 0x388   : > { %2233 = vst.msk [vmem:[%s3669_s30 + $0xd0] sm:$0xff] %vm268_vm0, %v3847_v37 }
 0x38b   : > { %v2153_v39 = vpop.f32.mrf.mxu1 }
 0x38c   : > { %2221 = vst.msk [vmem:[%s3669_s30 + $0x70] sm:$0xff] %vm268_vm0, %v2153_v39  ;;  %v2323_v43 = vmul.f32 %v2153_v39, %v2153_v39  ;;  %v2266_v50 = vsel %vm268_vm0, %v2153_v39, 0.0  ;;  %v2388_v39 = vsel %vm268_vm0, %v2333_v18, 0.0 }
 0x38d   : > { %v2267_v52 = vadd.f32 %v2266_v50, %v2265_v27  ;;  %v2286_v27 = vsel %vm268_vm0, %v3789_v36, 0.0  ;;  %v2390_v36 = vsel %vm268_vm0, %v2334_v38, 0.0 }
 0x38e   : > { %v2368_v56 = vsel %vm268_vm0, %v2323_v43, 0.0  ;;  %v2335_v43 = vmul.f32 %v3847_v37, %v3847_v37 }
 0x38f   : > { %v2369_v0 = vadd.f32 %v2368_v56, %v2367_v33 }
 0x399   : > { %v2174_v49 = vpop.f32.mrf.mxu2 }
 0x39a   : > { %2228 = vst.msk [vmem:[%s3669_s30 + $0xa8] sm:$0xff] %vm268_vm0, %v2174_v49  ;;  %v2330_v34 = vmul.f32 %v2174_v49, %v2174_v49  ;;  %v2280_v9 = vsel %vm268_vm0, %v2174_v49, 0.0  ;;  %v2288_v49 = vsel %vm268_vm0, %v3810_v19, 0.0 }
 0x39c   : > { %v2382_v7 = vsel %vm268_vm0, %v2330_v34, 0.0 }
 0x39f   : > { %v3856_v45 = vpop.f32.mrf.mxu3 }
 0x3a0   : > { %2234 = vst.msk [vmem:[%s3669_s30 + $0xd8] sm:$0xff] %vm268_vm0, %v3856_v45  ;;  %v2336_v19 = vmul.f32 %v3856_v45, %v3856_v45 }
 0x3a2   : > { %v2394_v22 = vsel %vm268_vm0, %v2336_v19, 0.0 }
 0x3a3   : > { %v2156_v59 = vpop.f32.mrf.mxu1 }
 0x3a4   : > { %2222 = vst.msk [vmem:[%s3669_s30 + $0x78] sm:$0xff] %vm268_vm0, %v2156_v59  ;;  %v2268_v57 = vsel %vm268_vm0, %v2156_v59, 0.0  ;;  %v2324_v55 = vmul.f32 %v2156_v59, %v2156_v59  ;;  %v2290_v59 = vsel %vm268_vm0, %v3847_v37, 0.0 }
 0x3a5   : > { %v2269_v17 = vadd.f32 %v2268_v57, %v2267_v52 }
 0x3a6   : > { %v2370_v60 = vsel %vm268_vm0, %v2324_v55, 0.0  ;;  %v2392_v55 = vsel %vm268_vm0, %v2335_v43, 0.0 }
 0x3a7   : > { %v2271_v29 = vadd.f32 %v2270_v21, %v2269_v17  ;;  %v2371_v16 = vadd.f32 %v2370_v60, %v2369_v0  ;;  %v2292_v17 = vsel %vm268_vm0, %v3856_v45, 0.0 }
 0x3a9   : > { %v2273_v1 = vadd.f32 %v2272_v62, %v2271_v29  ;;  %v2373_v30 = vadd.f32 %v2372_v8, %v2371_v16 }
 0x3ab   : > { %v2275_v5 = vadd.f32 %v2274_v2, %v2273_v1  ;;  %v2375_v23 = vadd.f32 %v2374_v46, %v2373_v30 }
 0x3ad   : > { %v2377_v13 = vadd.f32 %v2376_v61, %v2375_v23  ;;  %v2277_v41 = vadd.f32 %v2276_v15, %v2275_v5 }
 0x3af   : > { %v2279_v53 = vadd.f32 %v2278_v35, %v2277_v41  ;;  %v2379_v4 = vadd.f32 %v2378_v3, %v2377_v13 }
 0x3b1   : > { %v2177_v24 = vpop.f32.mrf.mxu2  ;;  %v2381_v28 = vadd.f32 %v2380_v48, %v2379_v4  ;;  %v2281_v54 = vadd.f32 %v2280_v9, %v2279_v53 }
 0x3b2   : > { %2229 = vst.msk [vmem:[%s3669_s30 + $0xb0] sm:$0xff] %vm268_vm0, %v2177_v24  ;;  %v2331_v14 = vmul.f32 %v2177_v24, %v2177_v24  ;;  %v2282_v10 = vsel %vm268_vm0, %v2177_v24, 0.0 }
 0x3b3   : > { %v2383_v42 = vadd.f32 %v2382_v7, %v2381_v28  ;;  %v2283_v63 = vadd.f32 %v2282_v10, %v2281_v54 }
 0x3b4   : > { %v2384_v26 = vsel %vm268_vm0, %v2331_v14, 0.0 }
 0x3b5   : > { %v2385_v47 = vadd.f32 %v2384_v26, %v2383_v42 }
 0x3b7   : > { %v2195_v6 = vpop.f32.mrf.mxu3 }
 0x3b8   : > { %2235 = vst.msk [vmem:[%s3669_s30 + $0xe0] sm:$0xff] %vm268_vm0, %v2195_v6  ;;  %v2337_v60 = vmul.f32 %v2195_v6, %v2195_v6  ;;  %v2294_v37 = vsel %vm268_vm0, %v2195_v6, 0.0 }
 0x3ba   : > { %v2396_v62 = vsel %vm268_vm0, %v2337_v60, 0.0 }
 0x3c1   : > { %v2180_v11 = vpop.f32.mrf.mxu2 }
 0x3c2   : > { %2230 = vst.msk [vmem:[%s3669_s30 + $0xb8] sm:$0xff] %vm268_vm0, %v2180_v11  ;;  %v2284_v20 = vsel %vm268_vm0, %v2180_v11, 0.0  ;;  %v2332_v32 = vmul.f32 %v2180_v11, %v2180_v11 }
 0x3c3   : > { %v2285_v25 = vadd.f32 %v2284_v20, %v2283_v63 }
 0x3c4   : > { %v2386_v31 = vsel %vm268_vm0, %v2332_v32, 0.0 }
 0x3c5   : > { %v2287_v33 = vadd.f32 %v2286_v27, %v2285_v25  ;;  %v2387_v44 = vadd.f32 %v2386_v31, %v2385_v47 }
 0x3c7   : > { %v2289_v50 = vadd.f32 %v2288_v49, %v2287_v33  ;;  %v2389_v56 = vadd.f32 %v2388_v39, %v2387_v44  ;;  %v2198_v52 = vpop.f32.mrf.mxu3 }
 0x3c8   : > { %2236 = vst.msk [vmem:[%s3669_s30 + $0xe8] sm:$0xff] %vm268_vm0, %v2198_v52  ;;  %v2338_v51 = vmul.f32 %v2198_v52, %v2198_v52  ;;  %v2296_v30 = vsel %vm268_vm0, %v2198_v52, 0.0 }
 0x3c9   : > { %v2291_v12 = vadd.f32 %v2290_v59, %v2289_v50  ;;  %v2391_v57 = vadd.f32 %v2390_v36, %v2389_v56 }
 0x3ca   : > { %v2398_v2 = vsel %vm268_vm0, %v2338_v51, 0.0 }
 0x3cb   : > { %v2393_v0 = vadd.f32 %v2392_v55, %v2391_v57  ;;  %v2293_v21 = vadd.f32 %v2292_v17, %v2291_v12 }
 0x3cd   : > { %v2395_v29 = vadd.f32 %v2394_v22, %v2393_v0  ;;  %v2295_v8 = vadd.f32 %v2294_v37, %v2293_v21 }
 0x3cf   : > { %v2397_v1 = vadd.f32 %v2396_v62, %v2395_v29  ;;  %v2297_v45 = vadd.f32 %v2296_v30, %v2295_v8 }
 0x3d0   : > { %v2201_v16 = vpop.f32.mrf.mxu3 }
 0x3d1   : > { %2237 = vst.msk [vmem:[%s3669_s30 + $0xf0] sm:$0xff] %vm268_vm0, %v2201_v16  ;;  %v2339_v46 = vmul.f32 %v2201_v16, %v2201_v16  ;;  %v2298_v58 = vsel %vm268_vm0, %v2201_v16, 0.0  ;;  %v2399_v5 = vadd.f32 %v2398_v2, %v2397_v1 }
 0x3d2   : > { %v2299_v61 = vadd.f32 %v2298_v58, %v2297_v45 }
 0x3d3   : > { %v2400_v23 = vsel %vm268_vm0, %v2339_v46, 0.0 }
 0x3d4   : > { %v2401_v41 = vadd.f32 %v2400_v23, %v2399_v5 }
 0x3d9   : > { %v2204_v15 = vpop.f32.mrf.mxu3 }
 0x3da   : > { %2238 = vst.msk [vmem:[%s3669_s30 + $0xf8] sm:$0xff] %vm268_vm0, %v2204_v15  ;;  %v2300_v40 = vsel %vm268_vm0, %v2204_v15, 0.0  ;;  %v2340_v13 = vmul.f32 %v2204_v15, %v2204_v15 }
 0x3db   : > { %v2301_v3 = vadd.f32 %v2300_v40, %v2299_v61 }
 0x3dc   : > { %v2402_v35 = vsel %vm268_vm0, %v2340_v13, 0.0 }
 0x3dd   : > { %v2302_v53 = vrot.slane %v2301_v3, 4  ;;  %v2403_v4 = vadd.f32 %v2402_v35, %v2401_v41 }
 0x3df   : > { %v2303_v48 = vadd.f32 %v2302_v53, %v2301_v3  ;;  %v2404_v24 = vrot.slane %v2403_v4, 4 }
 0x3e1   : > { %v2304_v28 = vrot.slane %v2303_v48, 2  ;;  %v2405_v6 = vadd.f32 %v2404_v24, %v2403_v4 }
 0x3e3   : > { %v2305_v34 = vadd.f32 %v2304_v28, %v2303_v48  ;;  %v2406_v9 = vrot.slane %v2405_v6, 2 }
 0x3e5   : > { %v2306_v14 = vrot.slane %v2305_v34, 1  ;;  %v2407_v54 = vadd.f32 %v2406_v9, %v2405_v6 }
 0x3e7   : > { %v2307_v7 = vadd.f32 %v2306_v14, %v2305_v34  ;;  %v2408_v10 = vrot.slane %v2407_v54, 1 }
 0x3e9   : > { %2308 = vst.msk [vmem:[%s235_s28] sm:$0x1] %vm277_vm1, %v2307_v7  ;;  %v2409_v42 = vadd.f32 %v2408_v10, %v2407_v54 }
 0x3eb   : > { %2410 = vst.msk [vmem:[%s235_s28 + $0x1] sm:$0x1] %vm277_vm1, %v2409_v42 }
 0x3ec PF: > { %s16_s18 = sadd.s32 1, %s2593_s18  }
 0x3ed   : > { %p13_p4 = scmp.ge.s32.totalorder %s16_s18, 4  }
 0x3ef   :  { %15 = sbr.rel (!%p13_p4) target bundleno = 1 (0x1), region = 81 }

// kernel: basic_block_forward.4
= control target key start
LH: loop header
LB: loop body
LE: loop exit
PB: predicated region body
PF: predicated region fallthrough
CT: control target
= control target key end

     0   :  { %s2740_s18 = smov 0   ;;  %s4163_s0 = inlined_call_operand.vmem [shape: f32[2,256,8], index: 0, kind: input, shape index: {}]   ;;  %s4164_s1 = inlined_call_operand.vmem [shape: f32[72,8], index: 1, kind: input, shape index: {}]   ;;  %s4165_s2 = inlined_call_operand.vmem [shape: f32[1,8], index: 2, kind: input, shape index: {}]   ;;  %s4166_s3 = inlined_call_operand.vmem [shape: f32[1,8], index: 3, kind: input, shape index: {}]   ;;  %s4167_s4 = inlined_call_operand.vmem [shape: f32[2,256,8], index: 4, kind: output, shape index: {0}]   ;;  %s4168_s5 = inlined_call_operand.vmem [shape: f32[2,2,8], index: 5, kind: output, shape index: {1}]  }
   0x1 LB: > { %s2601_s19 = sadd.s32 4294967295, %s2699_s18   ;;  %p2605_p0 = scmp.ge.s32.totalorder %s2699_s18, 1  ;;  %s2699_s18 = sphi %s2740_s18, %s16_s18  }
   0x2   : > { %p190_p1 = scmp.lt.s32.totalorder %s2699_s18, 3 }
   0x4   : > { %p191_p2 = pnand %p2605_p0, %p190_p1 }
   0x6   : > { %194 = sbr.rel (%p191_p2) target bundleno = 1008 (0x3f0), region = 36 }
   0xb   : > { %vm372_vm0 = vcmask 64512   ;;  %v2701_v0 = vmov 0.0   ;;  %vm381_vm1 = vcmask 57344   ;;  %s2702_s20 = smov 8   ;;  %p222_p3 = scmp.lt.s32.totalorder %s2601_s19, 1  ;;  %vm375_vm2 = vcmask 58368  }
   0xc   : > { %373 = vst.msk [vmem:[#allocation2] sm:$0xff] %vm372_vm0, %v2701_v0  ;;  %v2814_v2 = vld [vmem:[%s4165_s2] ss:$0 sm:$0xff]  ;;  %vm675_vm3 = vcmask 130112   ;;  %s2703_s29 = smov 16   ;;  %s2704_s30 = smov 24  }
   0xd   : > { %374 = vst.msk [vmem:[#allocation2 + $0x8] sm:$0xff] %vm372_vm0, %v2701_v0  ;;  %s4245_s19 = smov (!%p222_p3, %s2601_s19), 1  ;;  %v2830_v6 = vld [vmem:[%s4166_s3] ss:$0 sm:$0xff]  ;;  %vm868_vm4 = vcmask 195712   ;;  %s2705_s6 = smov 32  }
   0xe   : > { %382 = vst.msk [vmem:[#allocation2] sm:$0x1] %vm381_vm1, %v2701_v0  ;;  %s2645_s21 = sshll.u32 %s4245_s19, 8  ;;  %vm1061_vm5 = vcmask 261312   ;;  %s2706_s7 = smov 40   ;;  %vm1254_vm6 = vcmask 326912  }
   0xf   : > { %378 = vst.msk [vmem:[#allocation2 + $0x198] sm:$0xff] %vm372_vm0, %v2701_v0  ;;  %s2805_s24 = scalar_lea.vmem %s4163_s0, %s2645_s21  ;;  %s2707_s8 = smov 56   ;;  %vm1447_vm7 = vcmask 392512   ;;  %vm1641_vm8 = vcmask 458112   ;;  %vm1834_vm9 = vcmask 523712   ;;  %vm2027_vm10 = vcmask 589312  }
  0x10   : > { %379 = vst.msk [vmem:[#allocation2 + $0x1a0] sm:$0xff] %vm372_vm0, %v2701_v0  ;;  %v236_v3 = vld [vmem:[%s2805_s24] sm:$0xff]  ;;  %v237_v7 = vld [vmem:[%s2805_s24 + $0x8] sm:$0xff]  ;;  %v243_v8 = vld [vmem:[%s2805_s24 + $0x38] sm:$0xff]  ;;  %s2708_s9 = smov 48   ;;  %s2709_s10 = smov 64  }
  0x11   : > { %383 = vst.msk [vmem:[#allocation2 + $0x18] sm:$0x1] %vm381_vm1, %v2701_v0  ;;  %v240_v4 = vld [vmem:[%s2805_s24 + $0x20] sm:$0xff]  ;;  %v272_v5 = vmul.f32 %v2814_v2, %v236_v3  ;;  %v241_v10 = vld [vmem:[%s2805_s24 + $0x28] sm:$0xff]  ;;  %v273_v11 = vmul.f32 %v2814_v2, %v237_v7  ;;  %v238_v12 = vld [vmem:[%s2805_s24 + $0x10] sm:$0xff]  ;;  %v279_v14 = vmul.f32 %v2814_v2, %v243_v8  ;;  %vm2101_vm11 = vcmask 588800  }
  0x12   : > { %384 = vst.msk [vmem:[#allocation2 + $0x30] sm:$0x1] %vm381_vm1, %v2701_v0  ;;  %v276_v9 = vmul.f32 %v2814_v2, %v240_v4  ;;  %v246_v15 = vld [vmem:[%s2805_s24 + $0x50] sm:$0xff]  ;;  %v277_v16 = vmul.f32 %v2814_v2, %v241_v10  ;;  %v244_v17 = vld [vmem:[%s2805_s24 + $0x40] sm:$0xff]  ;;  %v274_v19 = vmul.f32 %v2814_v2, %v238_v12  ;;  %v239_v20 = vld [vmem:[%s2805_s24 + $0x18] sm:$0xff] }
  0x13   : > { %385 = vst.msk [vmem:[#allocation2 + $0x48] sm:$0x1] %vm381_vm1, %v2701_v0  ;;  %v308_v13 = vadd.f32 %v2830_v6, %v272_v5  ;;  %v309_v21 = vadd.f32 %v2830_v6, %v273_v11  ;;  %v282_v22 = vmul.f32 %v2814_v2, %v246_v15  ;;  %v249_v23 = vld [vmem:[%s2805_s24 + $0x68] sm:$0xff]  ;;  %v315_v25 = vadd.f32 %v2830_v6, %v279_v14  ;;  %v247_v27 = vld [vmem:[%s2805_s24 + $0x58] sm:$0xff]  ;;  %v242_v30 = vld [vmem:[%s2805_s24 + $0x30] sm:$0xff] }
  0x14   : > { %v515_v1 = vld [vmem:[#allocation2 + $0x1] sm:$0xff]  ;;  %386 = vst.msk [vmem:[#allocation2 + $0x60] sm:$0x1] %vm381_vm1, %v2701_v0  ;;  %v312_v18 = vadd.f32 %v2830_v6, %v276_v9  ;;  %v280_v26 = vmul.f32 %v2814_v2, %v244_v17  ;;  %v313_v28 = vadd.f32 %v2830_v6, %v277_v16  ;;  %v275_v29 = vmul.f32 %v2814_v2, %v239_v20  ;;  %v250_v44 = vld [vmem:[%s2805_s24 + $0x70] sm:$0xff]  ;;  %v255_v57 = vld [vmem:[%s2805_s24 + $0x98] sm:$0xff] }
  0x15   : > { %579 = vrot.lane.b32.xlu0 %v515_v1, %s2702_s20  ;;  %387 = vst.msk [vmem:[#allocation2 + $0x78] sm:$0x1] %vm381_vm1, %v2701_v0  ;;  %v340_v24 = vmax.f32 %v308_v13, 0.0  ;;  %v310_v32 = vadd.f32 %v2830_v6, %v274_v19  ;;  %v285_v33 = vmul.f32 %v2814_v2, %v249_v23  ;;  %v252_v34 = vld [vmem:[%s2805_s24 + $0x80] sm:$0xff]  ;;  %v341_v35 = vmax.f32 %v309_v21, 0.0  ;;  %v245_v48 = vld [vmem:[%s2805_s24 + $0x48] sm:$0xff] }
  0x16   : > { %388 = vst.msk [vmem:[#allocation2 + $0x90] sm:$0x1] %vm381_vm1, %v2701_v0  ;;  %v344_v31 = vmax.f32 %v312_v18, 0.0  ;;  %v318_v36 = vadd.f32 %v2830_v6, %v282_v22  ;;  %v283_v37 = vmul.f32 %v2814_v2, %v247_v27  ;;  %v347_v38 = vmax.f32 %v315_v25, 0.0  ;;  %v253_v5 = vld [vmem:[%s2805_s24 + $0x88] sm:$0xff]  ;;  %v248_v9 = vld [vmem:[%s2805_s24 + $0x60] sm:$0xff] }
  0x17   : > { %389 = vst.msk [vmem:[#allocation2 + $0xa8] sm:$0x1] %vm381_vm1, %v2701_v0  ;;  %v316_v39 = vadd.f32 %v2830_v6, %v280_v26  ;;  %v278_v40 = vmul.f32 %v2814_v2, %v242_v30  ;;  %v345_v41 = vmax.f32 %v313_v28, 0.0  ;;  %v311_v42 = vadd.f32 %v2830_v6, %v275_v29  ;;  %v258_v17 = vld [vmem:[%s2805_s24 + $0xb0] sm:$0xff]  ;;  %v256_v23 = vld [vmem:[%s2805_s24 + $0xa0] sm:$0xff]  ;;  %v251_v26 = vld [vmem:[%s2805_s24 + $0x78] sm:$0xff] }
  0x18   : > { %390 = vst.msk [vmem:[#allocation2 + $0xc0] sm:$0x1] %vm381_vm1, %v2701_v0  ;;  %v288_v43 = vmul.f32 %v2814_v2, %v252_v34  ;;  %v342_v45 = vmax.f32 %v310_v32, 0.0  ;;  %v321_v46 = vadd.f32 %v2830_v6, %v285_v33  ;;  %v286_v47 = vmul.f32 %v2814_v2, %v250_v44  ;;  %v261_v32 = vld [vmem:[%s2805_s24 + $0xc8] sm:$0xff] }
  0x19   : > { %391 = vst.msk [vmem:[#allocation2 + $0xd8] sm:$0x1] %vm381_vm1, %v2701_v0  ;;  %v350_v50 = vmax.f32 %v318_v36, 0.0  ;;  %v319_v51 = vadd.f32 %v2830_v6, %v283_v37  ;;  %v281_v52 = vmul.f32 %v2814_v2, %v245_v48  ;;  %v348_v53 = vmax.f32 %v316_v39, 0.0 }
  0x1a   : > { %392 = vst.msk [vmem:[#allocation2 + $0xf0] sm:$0x1] %vm381_vm1, %v2701_v0  ;;  %v314_v54 = vadd.f32 %v2830_v6, %v278_v40  ;;  %v343_v55 = vmax.f32 %v311_v42, 0.0  ;;  %v324_v56 = vadd.f32 %v2830_v6, %v288_v43  ;;  %v353_v58 = vmax.f32 %v321_v46, 0.0 }
  0x1b   : > { %393 = vst.msk [vmem:[#allocation2 + $0x108] sm:$0x1] %vm381_vm1, %v2701_v0  ;;  %v322_v59 = vadd.f32 %v2830_v6, %v286_v47  ;;  %v291_v60 = vmul.f32 %v2814_v2, %v255_v57  ;;  %v351_v62 = vmax.f32 %v319_v51, 0.0  ;;  %v317_v63 = vadd.f32 %v2830_v6, %v281_v52  ;;  %v264_v47 = vld [vmem:[%s2805_s24 + $0xe0] sm:$0xff] }
  0x1c   : > { %394 = vst.msk [vmem:[#allocation2 + $0x120] sm:$0x1] %vm381_vm1, %v2701_v0  ;;  %v356_v4 = vmax.f32 %v324_v56, 0.0  ;;  %v289_v8 = vmul.f32 %v2814_v2, %v253_v5  ;;  %v284_v11 = vmul.f32 %v2814_v2, %v248_v9  ;;  %v294_v19 = vmul.f32 %v2814_v2, %v258_v17  ;;  %v257_v56 = vld [vmem:[%s2805_s24 + $0xa8] sm:$0xff]  ;;  %v260_v5 = vld [vmem:[%s2805_s24 + $0xc0] sm:$0xff] }
  0x1d   : > { %395 = vst.msk [vmem:[#allocation2 + $0x138] sm:$0x1] %vm381_vm1, %v2701_v0  ;;  %v327_v1 = vadd.f32 %v2830_v6, %v291_v60  ;;  %v354_v7 = vmax.f32 %v322_v59, 0.0  ;;  %v349_v10 = vmax.f32 %v317_v63, 0.0  ;;  %v292_v25 = vmul.f32 %v2814_v2, %v256_v23 }
  0x1e   : > { %396 = vst.msk [vmem:[#allocation2 + $0x150] sm:$0x1] %vm381_vm1, %v2701_v0  ;;  %v325_v13 = vadd.f32 %v2830_v6, %v289_v8  ;;  %v320_v16 = vadd.f32 %v2830_v6, %v284_v11  ;;  %v330_v21 = vadd.f32 %v2830_v6, %v294_v19  ;;  %v287_v28 = vmul.f32 %v2814_v2, %v251_v26 }
  0x1f   : > { %397 = vst.msk [vmem:[#allocation2 + $0x168] sm:$0x1] %vm381_vm1, %v2701_v0  ;;  %v359_v12 = vmax.f32 %v327_v1, 0.0  ;;  %v328_v29 = vadd.f32 %v2830_v6, %v292_v25  ;;  %v297_v34 = vmul.f32 %v2814_v2, %v261_v32  ;;  %v296_v8 = vmul.f32 %v2814_v2, %v260_v5 }
  0x20   : > { %398 = vst.msk [vmem:[#allocation2 + $0x180] sm:$0x1] %vm381_vm1, %v2701_v0  ;;  %v357_v18 = vmax.f32 %v325_v13, 0.0  ;;  %v352_v20 = vmax.f32 %v320_v16, 0.0  ;;  %v263_v16 = vld [vmem:[%s2805_s24 + $0xd8] sm:$0xff] }
  0x21   : > { %401 = vst.msk [vmem:[#allocation2 + $0x29] sm:$0x1] %vm381_vm1, %v2701_v0  ;;  %v360_v33 = vmax.f32 %v328_v29, 0.0  ;;  %v333_v36 = vadd.f32 %v2830_v6, %v297_v34  ;;  %v332_v11 = vadd.f32 %v2830_v6, %v296_v8 }
  0x22   : > { %402 = vst.msk [vmem:[#allocation2 + $0x41] sm:$0x1] %vm381_vm1, %v2701_v0 }
  0x23   : > { %403 = vst.msk [vmem:[#allocation2 + $0x59] sm:$0x1] %vm381_vm1, %v2701_v0  ;;  %v365_v39 = vmax.f32 %v333_v36, 0.0  ;;  %v364_v13 = vmax.f32 %v332_v11, 0.0 }
  0x24   : > { %404 = vst.msk [vmem:[#allocation2 + $0x71] sm:$0x1] %vm381_vm1, %v2701_v0 }
  0x25   : > { %405 = vst.msk [vmem:[#allocation2 + $0x89] sm:$0x1] %vm381_vm1, %v2701_v0 }
  0x26   : > { %406 = vst.msk [vmem:[#allocation2 + $0xa1] sm:$0x1] %vm381_vm1, %v2701_v0 }
  0x27   : > { %407 = vst.msk [vmem:[#allocation2 + $0xb9] sm:$0x1] %vm381_vm1, %v2701_v0 }
  0x28   : > { %408 = vst.msk [vmem:[#allocation2 + $0xd1] sm:$0x1] %vm381_vm1, %v2701_v0 }
  0x29   : > { %409 = vst.msk [vmem:[#allocation2 + $0xe9] sm:$0x1] %vm381_vm1, %v2701_v0 }
  0x2a   : > { %410 = vst.msk [vmem:[#allocation2 + $0x101] sm:$0x1] %vm381_vm1, %v2701_v0 }
  0x2b   : > { %411 = vst.msk [vmem:[#allocation2 + $0x119] sm:$0x1] %vm381_vm1, %v2701_v0 }
  0x2c   : > { %412 = vst.msk [vmem:[#allocation2 + $0x131] sm:$0x1] %vm381_vm1, %v2701_v0 }
  0x2d   : > { %413 = vst.msk [vmem:[#allocation2 + $0x149] sm:$0x1] %vm381_vm1, %v2701_v0 }
  0x2e   : > { %414 = vst.msk [vmem:[#allocation2 + $0x161] sm:$0x1] %vm381_vm1, %v2701_v0 }
  0x2f   : > { %415 = vst.msk [vmem:[#allocation2 + $0x179] sm:$0x1] %vm381_vm1, %v2701_v0 }
  0x30   : > { %416 = vst.msk [vmem:[#allocation2 + $0x191] sm:$0x1] %vm381_vm1, %v2701_v0 }
  0x31   : > { %376 = vst.msk [vmem:[#allocation2 + $0x10] sm:$0x3] %vm375_vm2, %v2701_v0 }
  0x32   : > { %380 = vst.msk [vmem:[#allocation2 + $0x1a8] sm:$0x3] %vm375_vm2, %v2701_v0 }
  0x33   : > { %399 = vst.msk [vmem:[#allocation2 + $0x198] sm:$0x1] %vm381_vm1, %v2701_v0 }
  0x34   : > { %400 = vst.msk [vmem:[#allocation2 + $0x11] sm:$0x1] %vm381_vm1, %v2701_v0 }
  0x35   : > { %419 = vst.msk [vmem:[#allocation2 + $0x19] sm:$0xff] %vm372_vm0, %v340_v24  ;;  %v362_v24 = vmax.f32 %v330_v21, 0.0 }
  0x36   : > { %417 = vst.msk [vmem:[#allocation2 + $0x1a9] sm:$0x1] %vm381_vm1, %v2701_v0  ;;  %v346_v0 = vmax.f32 %v314_v54, 0.0 }
  0x37   : > { %423 = vst.msk [vmem:[#allocation2 + $0x49] sm:$0xff] %vm372_vm0, %v344_v31  ;;  %v323_v31 = vadd.f32 %v2830_v6, %v287_v28 }
  0x38   : > { %v516_v49 = vld [vmem:[#allocation2 + $0x9] sm:$0xff]  ;;  %420 = vst.msk [vmem:[#allocation2 + $0x21] sm:$0xff] %vm372_vm0, %v341_v35 }
  0x39   : > { %581 = vrot.lane.b32.xlu0 %v516_v49, %s2702_s20  ;;  %426 = vst.msk [vmem:[#allocation2 + $0x69] sm:$0xff] %vm372_vm0, %v347_v38  ;;  %v355_v35 = vmax.f32 %v323_v31, 0.0  ;;  %v259_v38 = vld [vmem:[%s2805_s24 + $0xb8] sm:$0xff]  ;;  %v300_v49 = vmul.f32 %v2814_v2, %v264_v47  ;;  %v451_v31 = vld [vmem:[#allocation2] sm:$0xff] }
  0x3a   : > { %424 = vst.msk [vmem:[#allocation2 + $0x51] sm:$0xff] %vm372_vm0, %v345_v41  ;;  %v295_v40 = vmul.f32 %v2814_v2, %v259_v38  ;;  %v254_v41 = vld [vmem:[%s2805_s24 + $0x90] sm:$0xff] }
  0x3b   : > { %421 = vst.msk [vmem:[#allocation2 + $0x31] sm:$0xff] %vm372_vm0, %v342_v45  ;;  %v290_v43 = vmul.f32 %v2814_v2, %v254_v41  ;;  %v336_v51 = vadd.f32 %v2830_v6, %v300_v49  ;;  %v709_v34 = vld [vmem:[#allocation2 + $0xa] sm:$0xff]  ;;  %v708_v41 = vld [vmem:[#allocation2 + $0x2] sm:$0xff] }
  0x3c   : > { %v2906_v61 = vld [vmem:[#allocation2 + $0x19] sm:$0xff]  ;;  %429 = vst.msk [vmem:[#allocation2 + $0x91] sm:$0xff] %vm372_vm0, %v350_v50  ;;  %v331_v44 = vadd.f32 %v2830_v6, %v295_v40 }
  0x3d   : > { %583 = vrot.lane.b32.xlu1 %v2906_v61, %s2702_s20  ;;  %427 = vst.msk [vmem:[#allocation2 + $0x79] sm:$0xff] %vm372_vm0, %v348_v53  ;;  %v326_v46 = vadd.f32 %v2830_v6, %v290_v43  ;;  %v262_v53 = vld [vmem:[%s2805_s24 + $0xd0] sm:$0xff]  ;;  %v368_v54 = vmax.f32 %v336_v51, 0.0  ;;  %v3083_v40 = vld [vmem:[#allocation2 + $0x18] sm:$0xff] }
  0x3e   : > { %v521_v3 = vld [vmem:[#allocation2 + $0x49] sm:$0xff]  ;;  %422 = vst.msk [vmem:[#allocation2 + $0x39] sm:$0xff] %vm372_vm0, %v343_v55  ;;  %v363_v48 = vmax.f32 %v331_v44, 0.0  ;;  %v298_v55 = vmul.f32 %v2814_v2, %v262_v53 }
  0x3f   : > { %432 = vst.msk [vmem:[#allocation2 + $0xb1] sm:$0xff] %vm372_vm0, %v353_v58  ;;  %v2924_v14 = vld [vmem:[#allocation2 + $0x21] sm:$0xff]  ;;  %v358_v50 = vmax.f32 %v326_v46, 0.0  ;;  %v293_v58 = vmul.f32 %v2814_v2, %v257_v56 }
  0x40   : > { %430 = vst.msk [vmem:[#allocation2 + $0x99] sm:$0xff] %vm372_vm0, %v351_v62  ;;  %v524_v22 = vld [vmem:[#allocation2 + $0x69] sm:$0xff]  ;;  %v334_v59 = vadd.f32 %v2830_v6, %v298_v55  ;;  %v3093_v44 = vld [vmem:[#allocation2 + $0x1a] sm:$0xff] }
  0x41   : > { %591 = vrot.lane.b32.xlu0 %v521_v3, %s2702_s20  ;;  %425 = vst.msk [vmem:[#allocation2 + $0x61] sm:$0xff] %vm372_vm0, %v346_v0  ;;  %v522_v30 = vld [vmem:[#allocation2 + $0x51] sm:$0xff]  ;;  %v329_v62 = vadd.f32 %v2830_v6, %v293_v58  ;;  %v265_v3 = vld [vmem:[%s2805_s24 + $0xe8] sm:$0xff]  ;;  %v3104_v47 = vld [vmem:[#allocation2 + $0x20] sm:$0xff] }
  0x42   : > { %v519_v15 = vld [vmem:[#allocation2 + $0x31] sm:$0xff]  ;;  %435 = vst.msk [vmem:[#allocation2 + $0xd9] sm:$0xff] %vm372_vm0, %v356_v4  ;;  %v366_v63 = vmax.f32 %v334_v59, 0.0  ;;  %v301_v4 = vmul.f32 %v2814_v2, %v265_v3 }
  0x43   : > { %587 = vrot.lane.b32.xlu2 %v519_v15, %s2702_s20  ;;  %433 = vst.msk [vmem:[#allocation2 + $0xc1] sm:$0xff] %vm372_vm0, %v354_v7  ;;  %v527_v37 = vld [vmem:[#allocation2 + $0x91] sm:$0xff]  ;;  %v361_v0 = vmax.f32 %v329_v62, 0.0 }
  0x44   : > { %428 = vst.msk [vmem:[#allocation2 + $0x81] sm:$0xff] %vm372_vm0, %v349_v10  ;;  %v525_v45 = vld [vmem:[#allocation2 + $0x79] sm:$0xff]  ;;  %v337_v9 = vadd.f32 %v2830_v6, %v301_v4  ;;  %v3133_v56 = vld [vmem:[#allocation2 + $0x4a] sm:$0xff] }
  0x45   : > { %585 = vrot.lane.b32.xlu1 %v2924_v14, %s2702_s20  ;;  %438 = vst.msk [vmem:[#allocation2 + $0xf9] sm:$0xff] %vm372_vm0, %v359_v12  ;;  %v2942_v27 = vld [vmem:[#allocation2 + $0x39] sm:$0xff]  ;;  %v3141_v59 = vld [vmem:[#allocation2 + $0x90] sm:$0xff] }
  0x46   : > { %436 = vst.msk [vmem:[#allocation2 + $0xe1] sm:$0xff] %vm372_vm0, %v357_v18  ;;  %v2974_v52 = vld [vmem:[#allocation2 + $0xb1] sm:$0xff]  ;;  %v369_v12 = vmax.f32 %v337_v9, 0.0  ;;  %v299_v18 = vmul.f32 %v2814_v2, %v263_v16  ;;  %v3118_v51 = vld [vmem:[#allocation2 + $0x3a] sm:$0xff] }
  0x47   : > { %431 = vst.msk [vmem:[#allocation2 + $0xa9] sm:$0xff] %vm372_vm0, %v352_v20  ;;  %v528_v60 = vld [vmem:[#allocation2 + $0x99] sm:$0xff]  ;;  %v3158_v3 = vld [vmem:[#allocation2 + $0x6a] sm:$0xff] }
  0x48   : > { %441 = vst.msk [vmem:[#allocation2 + $0x121] sm:$0xff] %vm372_vm0, %v362_v24  ;;  %v2960_v42 = vld [vmem:[#allocation2 + $0x61] sm:$0xff]  ;;  %v335_v20 = vadd.f32 %v2830_v6, %v299_v18  ;;  %v3087_v43 = vld [vmem:[#allocation2 + $0x38] sm:$0xff] }
  0x49   : > { %597 = vrot.lane.b32.xlu0 %v524_v22, %s2702_s20  ;;  %439 = vst.msk [vmem:[#allocation2 + $0x109] sm:$0xff] %vm372_vm0, %v360_v33  ;;  %v2992_v1 = vld [vmem:[#allocation2 + $0xd9] sm:$0xff]  ;;  %v3066_v33 = vld [vmem:[#allocation2 + $0x30] sm:$0xff] }
  0x4a   : > { %434 = vst.msk [vmem:[#allocation2 + $0xc9] sm:$0xff] %vm372_vm0, %v355_v35  ;;  %v3004_v10 = vld [vmem:[#allocation2 + $0xc1] sm:$0xff]  ;;  %v367_v21 = vmax.f32 %v335_v20, 0.0  ;;  %v3102_v46 = vld [vmem:[#allocation2 + $0x52] sm:$0xff] }
  0x4b   : > { %589 = vrot.lane.b32.xlu2 %v2942_v27, %s2702_s20  ;;  %444 = vst.msk [vmem:[#allocation2 + $0x141] sm:$0xff] %vm372_vm0, %v365_v39  ;;  %v2980_v57 = vld [vmem:[#allocation2 + $0x81] sm:$0xff]  ;;  %v3081_v39 = vld [vmem:[#allocation2 + $0x32] sm:$0xff] }
  0x4c   : > { %442 = vst.msk [vmem:[#allocation2 + $0x129] sm:$0xff] %vm372_vm0, %v363_v48  ;;  %v3012_v15 = vld [vmem:[#allocation2 + $0xf9] sm:$0xff]  ;;  %v3108_v48 = vld [vmem:[#allocation2 + $0x22] sm:$0xff] }
  0x4d   : > { %593 = vrot.lane.b32.xlu1 %v522_v30, %s2702_s20  ;;  %437 = vst.msk [vmem:[#allocation2 + $0xf1] sm:$0xff] %vm372_vm0, %v358_v50  ;;  %v3021_v19 = vld [vmem:[#allocation2 + $0xe1] sm:$0xff]  ;;  %v3185_v18 = vld [vmem:[#allocation2 + $0x92] sm:$0xff] }
  0x4e   : > { %447 = vst.msk [vmem:[#allocation2 + $0x169] sm:$0xff] %vm372_vm0, %v368_v54  ;;  %v2998_v7 = vld [vmem:[#allocation2 + $0xa9] sm:$0xff]  ;;  %v3110_v49 = vld [vmem:[#allocation2 + $0x60] sm:$0xff] }
  0x4f   : > { %445 = vst.msk [vmem:[#allocation2 + $0x151] sm:$0xff] %vm372_vm0, %v366_v63  ;;  %v3028_v22 = vld [vmem:[#allocation2 + $0x121] sm:$0xff]  ;;  %v3126_v54 = vld [vmem:[#allocation2 + $0x50] sm:$0xff]  ;;  %v3151_v63 = vld [vmem:[#allocation2 + $0x78] sm:$0xff] }
  0x50   : > { %440 = vst.msk [vmem:[#allocation2 + $0x111] sm:$0xff] %vm372_vm0, %v361_v0  ;;  %v3035_v24 = vld [vmem:[#allocation2 + $0x109] sm:$0xff]  ;;  %v3128_v55 = vld [vmem:[#allocation2 + $0x7a] sm:$0xff] }
  0x51   : > { %603 = vrot.lane.b32.xlu0 %v527_v37, %s2702_s20  ;;  %448 = vst.msk [vmem:[#allocation2 + $0x171] sm:$0xff] %vm372_vm0, %v369_v12  ;;  %v3016_v17 = vld [vmem:[#allocation2 + $0xc9] sm:$0xff]  ;;  %v3135_v58 = vld [vmem:[#allocation2 + $0x80] sm:$0xff]  ;;  %v3177_v12 = vld [vmem:[#allocation2 + $0x98] sm:$0xff] }
  0x52   : > { %443 = vst.msk [vmem:[#allocation2 + $0x139] sm:$0xff] %vm372_vm0, %v364_v13  ;;  %v3041_v25 = vld [vmem:[#allocation2 + $0x141] sm:$0xff]  ;;  %v3166_v5 = vld [vmem:[#allocation2 + $0xb0] sm:$0xff] }
  0x53   : > { %595 = vrot.lane.b32.xlu2 %v2960_v42, %s2702_s20  ;;  %446 = vst.msk [vmem:[#allocation2 + $0x159] sm:$0xff] %vm372_vm0, %v367_v21  ;;  %v3047_v28 = vld [vmem:[#allocation2 + $0x129] sm:$0xff]  ;;  %v3153_v0 = vld [vmem:[#allocation2 + $0x9a] sm:$0xff] }
  0x54   : > { %v3031_v23 = vld [vmem:[#allocation2 + $0xf1] sm:$0xff]  ;;  %483 = vst.msk [vmem:[#allocation3] sm:$0xff] %vm372_vm0, %v451_v31  ;;  %v452_v37 = vld [vmem:[#allocation2 + $0x8] sm:$0xff] }
  0x55   : > { %599 = vrot.lane.b32.xlu1 %v525_v45, %s2702_s20  ;;  %v3053_v29 = vld [vmem:[#allocation2 + $0x169] sm:$0xff]  ;;  %487 = vst.msk [vmem:[#allocation3 + $0x20] sm:$0xff] %vm372_vm0, %v3066_v33  ;;  %v3193_v21 = vld [vmem:[#allocation2 + $0xd8] sm:$0xff] }
  0x56   : > { %v3059_v32 = vld [vmem:[#allocation2 + $0x151] sm:$0xff]  ;;  %484 = vst.msk [vmem:[#allocation3 + $0x8] sm:$0xff] %vm372_vm0, %v452_v37  ;;  %v3096_v45 = vld [vmem:[#allocation2 + $0x48] sm:$0xff]  ;;  %v3204_v37 = vld [vmem:[#allocation2 + $0xc0] sm:$0xff] }
  0x57   : > { %v3043_v26 = vld [vmem:[#allocation2 + $0x111] sm:$0xff]  ;;  %4194 = vst [vmem:[#allocation4_spill] sm:$0xff] %v3081_v39  ;;  %v3116_v50 = vld [vmem:[#allocation2 + $0x68] sm:$0xff] }
  0x58   : > { %v3074_v38 = vld [vmem:[#allocation2 + $0x171] sm:$0xff]  ;;  %485 = vst.msk [vmem:[#allocation3 + $0x10] sm:$0xff] %vm372_vm0, %v3083_v40  ;;  %v3160_v4 = vld [vmem:[#allocation2 + $0xa8] sm:$0xff] }
  0x59   : > { %609 = vrot.lane.b32.xlu0 %v2974_v52, %s2702_s20  ;;  %v3055_v30 = vld [vmem:[#allocation2 + $0x139] sm:$0xff]  ;;  %488 = vst.msk [vmem:[#allocation3 + $0x28] sm:$0xff] %vm372_vm0, %v3087_v43  ;;  %v3168_v8 = vld [vmem:[#allocation2 + $0x82] sm:$0xff]  ;;  %v3195_v31 = vld [vmem:[#allocation2 + $0xaa] sm:$0xff] }
  0x5a   : > { %v3070_v36 = vld [vmem:[#allocation2 + $0x159] sm:$0xff]  ;;  %489 = vst.msk [vmem:[#allocation3 + $0x30] sm:$0xff] %vm372_vm0, %v3096_v45  ;;  %v3179_v13 = vld [vmem:[#allocation2 + $0xc2] sm:$0xff] }
  0x5b   : > { %601 = vrot.lane.b32.xlu2 %v2980_v57, %s2702_s20  ;;  %4195 = vst [vmem:[#allocation5_spill] sm:$0xff] %v3102_v46  ;;  %v3187_v20 = vld [vmem:[#allocation2 + $0xc8] sm:$0xff] }
  0x5c   : > { %486 = vst.msk [vmem:[#allocation3 + $0x18] sm:$0xff] %vm372_vm0, %v3104_v47 }
  0x5d   : > { %605 = vrot.lane.b32.xlu1 %v528_v60, %s2702_s20  ;;  %491 = vst.msk [vmem:[#allocation3 + $0x40] sm:$0xff] %vm372_vm0, %v3110_v49  ;;  %v3143_v60 = vld [vmem:[#allocation2 + $0x62] sm:$0xff] }
  0x5e   : > { %4196 = vst [vmem:[#allocation6_spill] sm:$0xff] %v3118_v51 }
  0x5f   : > { %492 = vst.msk [vmem:[#allocation3 + $0x48] sm:$0xff] %vm372_vm0, %v3116_v50 }
  0x60   : > { %4197 = vst [vmem:[#allocation7_spill] sm:$0xff] %v3128_v55 }
  0x61   : > { %615 = vrot.lane.b32.xlu0 %v2992_v1, %s2702_s20  ;;  %490 = vst.msk [vmem:[#allocation3 + $0x38] sm:$0xff] %vm372_vm0, %v3126_v54 }
  0x62   : > { %494 = vst.msk [vmem:[#allocation3 + $0x58] sm:$0xff] %vm372_vm0, %v3135_v58 }
  0x63   : > { %607 = vrot.lane.b32.xlu2 %v2998_v7, %s2702_s20  ;;  %4198 = vst [vmem:[#allocation8_spill] sm:$0xff] %v3143_v60 }
  0x64   : > { %495 = vst.msk [vmem:[#allocation3 + $0x60] sm:$0xff] %vm372_vm0, %v3141_v59 }
  0x65   : > { %611 = vrot.lane.b32.xlu1 %v3004_v10, %s2702_s20  ;;  %4199 = vst [vmem:[#allocation9_spill] sm:$0xff] %v3153_v0 }
  0x66   : > { %493 = vst.msk [vmem:[#allocation3 + $0x50] sm:$0xff] %vm372_vm0, %v3151_v63 }
  0x67   : > { %4200 = vst [vmem:[#allocation10_spill] sm:$0xff] %v3158_v3 }
  0x68   : > { %497 = vst.msk [vmem:[#allocation3 + $0x70] sm:$0xff] %vm372_vm0, %v3160_v4 }
  0x69   : > { %621 = vrot.lane.b32.xlu0 %v3012_v15, %s2702_s20  ;;  %4201 = vst [vmem:[#allocation11_spill] sm:$0xff] %v3168_v8 }
  0x6a   : > { %498 = vst.msk [vmem:[#allocation3 + $0x78] sm:$0xff] %vm372_vm0, %v3166_v5 }
  0x6b   : > { %613 = vrot.lane.b32.xlu2 %v3016_v17, %s2702_s20  ;;  %4202 = vst [vmem:[#allocation12_spill] sm:$0xff] %v3179_v13 }
  0x6c   : > { %496 = vst.msk [vmem:[#allocation3 + $0x68] sm:$0xff] %vm372_vm0, %v3177_v12 }
  0x6d   : > { %617 = vrot.lane.b32.xlu1 %v3021_v19, %s2702_s20  ;;  %4203 = vst [vmem:[#allocation13_spill] sm:$0xff] %v3185_v18 }
  0x6e   : > { %500 = vst.msk [vmem:[#allocation3 + $0x88] sm:$0xff] %vm372_vm0, %v3187_v20 }
  0x6f   : > { %4204 = vst [vmem:[#allocation14_spill] sm:$0xff] %v3195_v31 }
  0x70   : > { %501 = vst.msk [vmem:[#allocation3 + $0x90] sm:$0xff] %vm372_vm0, %v3193_v21 }
  0x71   : > { %627 = vrot.lane.b32.xlu0 %v3028_v22, %s2702_s20  ;;  %499 = vst.msk [vmem:[#allocation3 + $0x80] sm:$0xff] %vm372_vm0, %v3204_v37 }
  0x73   : > { %619 = vrot.lane.b32.xlu2 %v3031_v23, %s2702_s20 }
  0x75   : > { %623 = vrot.lane.b32.xlu1 %v3035_v24, %s2702_s20 }
  0x79   : > { %633 = vrot.lane.b32.xlu0 %v3041_v25, %s2702_s20 }
  0x7b   : > { %625 = vrot.lane.b32.xlu2 %v3043_v26, %s2702_s20 }
  0x7d   : > { %629 = vrot.lane.b32.xlu1 %v3047_v28, %s2702_s20 }
  0x81   : > { %639 = vrot.lane.b32.xlu0 %v3053_v29, %s2702_s20 }
  0x83   : > { %631 = vrot.lane.b32.xlu2 %v3055_v30, %s2702_s20 }
  0x85   : > { %635 = vrot.lane.b32.xlu1 %v3059_v32, %s2702_s20 }
  0x87   : > { %v580_v35 = vpop.permute.xlu0 %579 }
  0x88   : > { %676 = vst.msk [vmem:[#allocation3] sm:$0xff] %vm675_vm3, %v580_v35 }
  0x89   : > { %774 = vrot.lane.b32.xlu0 %v709_v34, %s2703_s29 }
  0x8b   : > { %637 = vrot.lane.b32.xlu2 %v3070_v36, %s2702_s20 }
  0x8d   : > { %641 = vrot.lane.b32.xlu1 %v3074_v38, %s2702_s20 }
  0x91   : > { %780 = vrot.lane.b32.xlu0 %v3081_v39, %s2703_s29  ;;  %v3320_v39 = vld [vmem:[#allocation2 + $0x142] sm:$0xff] }
  0x93   : > { %772 = vrot.lane.b32.xlu2 %v708_v41, %s2703_s29  ;;  %v3206_v41 = vld [vmem:[#allocation2 + $0xe2] sm:$0xff] }
  0x94   : > { %4205 = vst [vmem:[#allocation15_spill] sm:$0xff] %v3206_v41 }
  0x95   : > { %776 = vrot.lane.b32.xlu1 %v3093_v44, %s2703_s29 }
  0x99   : > { %786 = vrot.lane.b32.xlu0 %v3102_v46, %s2703_s29  ;;  %v3293_v46 = vld [vmem:[#allocation2 + $0x122] sm:$0xff] }
  0x9a   : > { %4215 = vst [vmem:[#allocation25_spill] sm:$0xff] %v3293_v46 }
  0x9b   : > { %778 = vrot.lane.b32.xlu2 %v3108_v48, %s2703_s29 }
  0x9d   : > { %782 = vrot.lane.b32.xlu1 %v3118_v51, %s2703_s29  ;;  %v588_v53 = vpop.permute.xlu2 %587  ;;  %v3314_v51 = vld [vmem:[#allocation2 + $0x172] sm:$0xff] }
  0x9e   : > { %680 = vst.msk [vmem:[#allocation3 + $0x20] sm:$0xff] %vm675_vm3, %v588_v53 }
  0x9f   : > { %4217 = vst [vmem:[#allocation27_spill] sm:$0xff] %v3314_v51 }
  0xa1   : > { %792 = vrot.lane.b32.xlu0 %v3128_v55, %s2703_s29  ;;  %v3266_v55 = vld [vmem:[#allocation2 + $0xfa] sm:$0xff] }
  0xa2   : > { %4212 = vst [vmem:[#allocation22_spill] sm:$0xff] %v3266_v55 }
  0xa3   : > { %784 = vrot.lane.b32.xlu2 %v3133_v56, %s2703_s29 }
  0xa5   : > { %788 = vrot.lane.b32.xlu1 %v3143_v60, %s2703_s29  ;;  %v590_v62 = vpop.permute.xlu2 %589  ;;  %v3287_v60 = vld [vmem:[#allocation2 + $0x152] sm:$0xff] }
  0xa6   : > { %681 = vst.msk [vmem:[#allocation3 + $0x28] sm:$0xff] %vm675_vm3, %v590_v62  ;;  %v3212_v62 = vld [vmem:[#allocation2 + $0xb2] sm:$0xff] }
  0xa7   : > { %4206 = vst [vmem:[#allocation16_spill] sm:$0xff] %v3212_v62 }
  0xa8   : > { %4214 = vst [vmem:[#allocation24_spill] sm:$0xff] %v3287_v60 }
  0xa9   : > { %798 = vrot.lane.b32.xlu0 %v3153_v0, %s2703_s29  ;;  %v3241_v0 = vld [vmem:[#allocation2 + $0x110] sm:$0xff] }
  0xaa   : > { %506 = vst.msk [vmem:[#allocation3 + $0xb8] sm:$0xff] %vm372_vm0, %v3241_v0 }
  0xab   : > { %v582_v9 = vpop.permute.xlu0 %581  ;;  %790 = vrot.lane.b32.xlu2 %v3158_v3, %s2703_s29 }
  0xac   : > { %677 = vst.msk [vmem:[#allocation3 + $0x8] sm:$0xff] %vm675_vm3, %v582_v9  ;;  %v3214_v9 = vld [vmem:[#allocation2 + $0xf0] sm:$0xff] }
  0xad   : > { %794 = vrot.lane.b32.xlu1 %v3168_v8, %s2703_s29  ;;  %v596_v11 = vpop.permute.xlu2 %595  ;;  %503 = vst.msk [vmem:[#allocation3 + $0xa0] sm:$0xff] %vm372_vm0, %v3214_v9  ;;  %v3260_v8 = vld [vmem:[#allocation2 + $0x12a] sm:$0xff] }
  0xae   : > { %684 = vst.msk [vmem:[#allocation3 + $0x40] sm:$0xff] %vm675_vm3, %v596_v11  ;;  %v3220_v11 = vld [vmem:[#allocation2 + $0xf8] sm:$0xff] }
  0xaf   : > { %v584_v16 = vpop.permute.xlu1 %583  ;;  %504 = vst.msk [vmem:[#allocation3 + $0xa8] sm:$0xff] %vm372_vm0, %v3220_v11 }
  0xb0   : > { %678 = vst.msk [vmem:[#allocation3 + $0x10] sm:$0xff] %vm675_vm3, %v584_v16  ;;  %v3222_v16 = vld [vmem:[#allocation2 + $0xca] sm:$0xff] }
  0xb1   : > { %804 = vrot.lane.b32.xlu0 %v3179_v13, %s2703_s29  ;;  %4207 = vst [vmem:[#allocation17_spill] sm:$0xff] %v3222_v16 }
  0xb2   : > { %4211 = vst [vmem:[#allocation21_spill] sm:$0xff] %v3260_v8 }
  0xb3   : > { %v592_v34 = vpop.permute.xlu0 %591  ;;  %796 = vrot.lane.b32.xlu2 %v3185_v18, %s2703_s29 }
  0xb4   : > { %682 = vst.msk [vmem:[#allocation3 + $0x30] sm:$0xff] %vm675_vm3, %v592_v34 }
  0xb5   : > { %800 = vrot.lane.b32.xlu1 %v3195_v31, %s2703_s29  ;;  %v602_v35 = vpop.permute.xlu2 %601  ;;  %v3239_v31 = vld [vmem:[#allocation2 + $0xda] sm:$0xff] }
  0xb6   : > { %687 = vst.msk [vmem:[#allocation3 + $0x58] sm:$0xff] %vm675_vm3, %v602_v35 }
  0xb7   : > { %v586_v53 = vpop.permute.xlu1 %585  ;;  %4209 = vst [vmem:[#allocation19_spill] sm:$0xff] %v3239_v31 }
  0xb8   : > { %679 = vst.msk [vmem:[#allocation3 + $0x18] sm:$0xff] %vm675_vm3, %v586_v53  ;;  %v3231_v53 = vld [vmem:[#allocation2 + $0xe0] sm:$0xff] }
  0xb9   : > { %810 = vrot.lane.b32.xlu0 %v3206_v41, %s2703_s29  ;;  %v3233_v41 = vld [vmem:[#allocation2 + $0x10a] sm:$0xff]  ;;  %502 = vst.msk [vmem:[#allocation3 + $0x98] sm:$0xff] %vm372_vm0, %v3231_v53 }
  0xba   : > { %4208 = vst [vmem:[#allocation18_spill] sm:$0xff] %v3233_v41 }
  0xbb   : > { %v598_v34 = vpop.permute.xlu0 %597  ;;  %802 = vrot.lane.b32.xlu2 %v3212_v62, %s2703_s29 }
  0xbc   : > { %685 = vst.msk [vmem:[#allocation3 + $0x48] sm:$0xff] %vm675_vm3, %v598_v34  ;;  %v3247_v34 = vld [vmem:[#allocation2 + $0x120] sm:$0xff] }
  0xbd   : > { %806 = vrot.lane.b32.xlu1 %v3222_v16, %s2703_s29  ;;  %v608_v35 = vpop.permute.xlu2 %607  ;;  %v3249_v16 = vld [vmem:[#allocation2 + $0xf2] sm:$0xff]  ;;  %507 = vst.msk [vmem:[#allocation3 + $0xc0] sm:$0xff] %vm372_vm0, %v3247_v34 }
  0xbe   : > { %690 = vst.msk [vmem:[#allocation3 + $0x70] sm:$0xff] %vm675_vm3, %v608_v35 }
  0xbf   : > { %v594_v13 = vpop.permute.xlu1 %593  ;;  %4210 = vst [vmem:[#allocation20_spill] sm:$0xff] %v3249_v16 }
  0xc0   : > { %683 = vst.msk [vmem:[#allocation3 + $0x38] sm:$0xff] %vm675_vm3, %v594_v13 }
  0xc1   : > { %816 = vrot.lane.b32.xlu0 %v3233_v41, %s2703_s29  ;;  %v3258_v41 = vld [vmem:[#allocation2 + $0x108] sm:$0xff] }
  0xc2   : > { %505 = vst.msk [vmem:[#allocation3 + $0xb0] sm:$0xff] %vm372_vm0, %v3258_v41 }
  0xc3   : > { %v604_v35 = vpop.permute.xlu0 %603  ;;  %808 = vrot.lane.b32.xlu2 %v3239_v31, %s2703_s29  ;;  %v3268_v31 = vld [vmem:[#allocation2 + $0x138] sm:$0xff] }
  0xc4   : > { %688 = vst.msk [vmem:[#allocation3 + $0x60] sm:$0xff] %vm675_vm3, %v604_v35  ;;  %v3274_v35 = vld [vmem:[#allocation2 + $0x140] sm:$0xff] }
  0xc5   : > { %812 = vrot.lane.b32.xlu1 %v3249_v16, %s2703_s29  ;;  %v614_v13 = vpop.permute.xlu2 %613  ;;  %509 = vst.msk [vmem:[#allocation3 + $0xd0] sm:$0xff] %vm372_vm0, %v3268_v31  ;;  %v3276_v16 = vld [vmem:[#allocation2 + $0x112] sm:$0xff] }
  0xc6   : > { %693 = vst.msk [vmem:[#allocation3 + $0x88] sm:$0xff] %vm675_vm3, %v614_v13 }
  0xc7   : > { %v600_v62 = vpop.permute.xlu1 %599  ;;  %4213 = vst [vmem:[#allocation23_spill] sm:$0xff] %v3276_v16 }
  0xc8   : > { %686 = vst.msk [vmem:[#allocation3 + $0x50] sm:$0xff] %vm675_vm3, %v600_v62 }
  0xc9   : > { %822 = vrot.lane.b32.xlu0 %v3260_v8, %s2703_s29  ;;  %510 = vst.msk [vmem:[#allocation3 + $0xd8] sm:$0xff] %vm372_vm0, %v3274_v35  ;;  %v3285_v8 = vld [vmem:[#allocation2 + $0x128] sm:$0xff] }
  0xca   : > { %508 = vst.msk [vmem:[#allocation3 + $0xc8] sm:$0xff] %vm372_vm0, %v3285_v8 }
  0xcb   : > { %v610_v13 = vpop.permute.xlu0 %609  ;;  %814 = vrot.lane.b32.xlu2 %v3266_v55, %s2703_s29  ;;  %v3295_v55 = vld [vmem:[#allocation2 + $0x158] sm:$0xff] }
  0xcc   : > { %691 = vst.msk [vmem:[#allocation3 + $0x78] sm:$0xff] %vm675_vm3, %v610_v13  ;;  %v3301_v13 = vld [vmem:[#allocation2 + $0x168] sm:$0xff] }
  0xcd   : > { %818 = vrot.lane.b32.xlu1 %v3276_v16, %s2703_s29  ;;  %v620_v62 = vpop.permute.xlu2 %619  ;;  %512 = vst.msk [vmem:[#allocation3 + $0xe8] sm:$0xff] %vm372_vm0, %v3295_v55  ;;  %v3303_v16 = vld [vmem:[#allocation2 + $0x13a] sm:$0xff] }
  0xce   : > { %696 = vst.msk [vmem:[#allocation3 + $0xa0] sm:$0xff] %vm675_vm3, %v620_v62 }
  0xcf   : > { %v606_v18 = vpop.permute.xlu1 %605  ;;  %4216 = vst [vmem:[#allocation26_spill] sm:$0xff] %v3303_v16 }
  0xd0   : > { %689 = vst.msk [vmem:[#allocation3 + $0x68] sm:$0xff] %vm675_vm3, %v606_v18 }
  0xd1   : > { %828 = vrot.lane.b32.xlu0 %v3287_v60, %s2703_s29  ;;  %513 = vst.msk [vmem:[#allocation3 + $0xf0] sm:$0xff] %vm372_vm0, %v3301_v13  ;;  %v3312_v60 = vld [vmem:[#allocation2 + $0x150] sm:$0xff] }
  0xd2   : > { %511 = vst.msk [vmem:[#allocation3 + $0xe0] sm:$0xff] %vm372_vm0, %v3312_v60 }
  0xd3   : > { %v616_v62 = vpop.permute.xlu0 %615  ;;  %820 = vrot.lane.b32.xlu2 %v3293_v46, %s2703_s29  ;;  %v3331_v46 = vld [vmem:[#allocation2 + $0x170] sm:$0xff] }
  0xd4   : > { %694 = vst.msk [vmem:[#allocation3 + $0x90] sm:$0xff] %vm675_vm3, %v616_v62  ;;  %v3324_v62 = vld [vmem:[#allocation2 + $0x15a] sm:$0xff] }
  0xd5   : > { %824 = vrot.lane.b32.xlu1 %v3303_v16, %s2703_s29  ;;  %v626_v18 = vpop.permute.xlu2 %625  ;;  %4218 = vst [vmem:[#allocation28_spill] sm:$0xff] %v3324_v62 }
  0xd6   : > { %699 = vst.msk [vmem:[#allocation3 + $0xb8] sm:$0xff] %vm675_vm3, %v626_v18 }
  0xd7   : > { %v612_v3 = vpop.permute.xlu1 %611  ;;  %514 = vst.msk [vmem:[#allocation3 + $0xf8] sm:$0xff] %vm372_vm0, %v3331_v46 }
  0xd8   : > { %692 = vst.msk [vmem:[#allocation3 + $0x80] sm:$0xff] %vm675_vm3, %v612_v3 }
  0xd9   : > { %834 = vrot.lane.b32.xlu0 %v3314_v51, %s2703_s29  ;;  %v3337_v51 = vld [vmem:[#allocation2 + $0x16a] sm:$0xff] }
  0xdb   : > { %v622_v16 = vpop.permute.xlu0 %621  ;;  %826 = vrot.lane.b32.xlu2 %v3320_v39, %s2703_s29 }
  0xdc   : > { %697 = vst.msk [vmem:[#allocation3 + $0xa8] sm:$0xff] %vm675_vm3, %v622_v16 }
  0xdd   : > { %830 = vrot.lane.b32.xlu1 %v3324_v62, %s2703_s29  ;;  %v632_v18 = vpop.permute.xlu2 %631 }
  0xde   : > { %702 = vst.msk [vmem:[#allocation3 + $0xd0] sm:$0xff] %vm675_vm3, %v632_v18 }
  0xdf   : > { %v618_v3 = vpop.permute.xlu1 %617 }
  0xe0   : > { %695 = vst.msk [vmem:[#allocation3 + $0x98] sm:$0xff] %vm675_vm3, %v618_v3 }
  0xe1   : > { %969 = vrot.lane.b32.xlu0 %v3066_v33, %s2704_s30 }
  0xe3   : > { %v628_v16 = vpop.permute.xlu0 %627  ;;  %832 = vrot.lane.b32.xlu2 %v3337_v51, %s2703_s29 }
  0xe4   : > { %700 = vst.msk [vmem:[#allocation3 + $0xc0] sm:$0xff] %vm675_vm3, %v628_v16 }
  0xe5   : > { %965 = vrot.lane.b32.xlu1 %v3083_v40, %s2704_s30  ;;  %v638_v18 = vpop.permute.xlu2 %637 }
  0xe6   : > { %705 = vst.msk [vmem:[#allocation3 + $0xe8] sm:$0xff] %vm675_vm3, %v638_v18 }
  0xe7   : > { %v624_v62 = vpop.permute.xlu1 %623 }
  0xe8   : > { %698 = vst.msk [vmem:[#allocation3 + $0xb0] sm:$0xff] %vm675_vm3, %v624_v62 }
  0xe9   : > { %975 = vrot.lane.b32.xlu0 %v3126_v54, %s2704_s30 }
  0xeb   : > { %v634_v3 = vpop.permute.xlu0 %633  ;;  %967 = vrot.lane.b32.xlu2 %v3104_v47, %s2704_s30 }
  0xec   : > { %703 = vst.msk [vmem:[#allocation3 + $0xd8] sm:$0xff] %vm675_vm3, %v634_v3 }
  0xed   : > { %971 = vrot.lane.b32.xlu1 %v3087_v43, %s2704_s30  ;;  %v773_v33 = vpop.permute.xlu2 %772 }
  0xee   : > { %869 = vst.msk [vmem:[#allocation3] sm:$0xff] %vm868_vm4, %v773_v33 }
  0xef   : > { %v630_v40 = vpop.permute.xlu1 %629 }
  0xf0   : > { %701 = vst.msk [vmem:[#allocation3 + $0xc8] sm:$0xff] %vm675_vm3, %v630_v40 }
  0xf1   : > { %981 = vrot.lane.b32.xlu0 %v3151_v63, %s2704_s30 }
  0xf3   : > { %v640_v54 = vpop.permute.xlu0 %639  ;;  %973 = vrot.lane.b32.xlu2 %v3096_v45, %s2704_s30 }
  0xf4   : > { %706 = vst.msk [vmem:[#allocation3 + $0xf0] sm:$0xff] %vm675_vm3, %v640_v54  ;;  %v267_v54 = vld [vmem:[%s2805_s24 + $0xf8] sm:$0xff] }
  0xf5   : > { %977 = vrot.lane.b32.xlu1 %v3110_v49, %s2704_s30  ;;  %v779_v47 = vpop.permute.xlu2 %778 }
  0xf6   : > { %872 = vst.msk [vmem:[#allocation3 + $0x18] sm:$0xff] %vm868_vm4, %v779_v47  ;;  %v303_v47 = vmul.f32 %v2814_v2, %v267_v54 }
  0xf7   : > { %v636_v43 = vpop.permute.xlu1 %635 }
  0xf8   : > { %704 = vst.msk [vmem:[#allocation3 + $0xe0] sm:$0xff] %vm675_vm3, %v636_v43 }
  0xf9   : > { %987 = vrot.lane.b32.xlu0 %v3177_v12, %s2704_s30 }
  0xfb   : > { %v775_v63 = vpop.permute.xlu0 %774  ;;  %979 = vrot.lane.b32.xlu2 %v3116_v50, %s2704_s30 }
  0xfc   : > { %870 = vst.msk [vmem:[#allocation3 + $0x8] sm:$0xff] %vm868_vm4, %v775_v63 }
  0xfd   : > { %983 = vrot.lane.b32.xlu1 %v3135_v58, %s2704_s30  ;;  %v785_v45 = vpop.permute.xlu2 %784  ;;  %v266_v58 = vld [vmem:[%s2805_s24 + $0xf0] sm:$0xff] }
  0xfe   : > { %875 = vst.msk [vmem:[#allocation3 + $0x30] sm:$0xff] %vm868_vm4, %v785_v45  ;;  %v302_v18 = vmul.f32 %v2814_v2, %v266_v58 }
  0xff   : > { %v642_v49 = vpop.permute.xlu1 %641 }
 0x100   : > { %707 = vst.msk [vmem:[#allocation3 + $0xf8] sm:$0xff] %vm675_vm3, %v642_v49 }
 0x101   : > { %993 = vrot.lane.b32.xlu0 %v3204_v37, %s2704_s30  ;;  %v338_v37 = vadd.f32 %v2830_v6, %v302_v18  ;;  %v3466_v18 = vld [vmem:[#allocation2 + $0x51] sm:$0xff] }
 0x103   : > { %v781_v62 = vpop.permute.xlu0 %780  ;;  %985 = vrot.lane.b32.xlu2 %v3141_v59, %s2704_s30  ;;  %v370_v33 = vmax.f32 %v338_v37, 0.0 }
 0x104   : > { %873 = vst.msk [vmem:[#allocation3 + $0x20] sm:$0xff] %vm868_vm4, %v781_v62 }
 0x105   : > { %989 = vrot.lane.b32.xlu1 %v3160_v4, %s2704_s30  ;;  %v791_v50 = vpop.permute.xlu2 %790  ;;  %449 = vst.msk [vmem:[#allocation2 + $0x181] sm:$0xff] %vm372_vm0, %v370_v33 }
 0x106   : > { %878 = vst.msk [vmem:[#allocation3 + $0x48] sm:$0xff] %vm868_vm4, %v791_v50  ;;  %v3453_v50 = vld [vmem:[#allocation2 + $0x31] sm:$0xff] }
 0x107   : > { %v777_v16 = vpop.permute.xlu1 %776 }
 0x108   : > { %871 = vst.msk [vmem:[#allocation3 + $0x10] sm:$0xff] %vm868_vm4, %v777_v16 }
 0x109   : > { %999 = vrot.lane.b32.xlu0 %v3231_v53, %s2704_s30 }
 0x10b   : > { %v787_v3 = vpop.permute.xlu0 %786  ;;  %991 = vrot.lane.b32.xlu2 %v3166_v5, %s2704_s30 }
 0x10c   : > { %876 = vst.msk [vmem:[#allocation3 + $0x38] sm:$0xff] %vm868_vm4, %v787_v3 }
 0x10d   : > { %995 = vrot.lane.b32.xlu1 %v3187_v20, %s2704_s30  ;;  %v797_v4 = vpop.permute.xlu2 %796 }
 0x10e   : > { %881 = vst.msk [vmem:[#allocation3 + $0x60] sm:$0xff] %vm868_vm4, %v797_v4  ;;  %v3479_v4 = vld [vmem:[#allocation2 + $0x79] sm:$0xff] }
 0x10f   : > { %v783_v40 = vpop.permute.xlu1 %782 }
 0x110   : > { %874 = vst.msk [vmem:[#allocation3 + $0x28] sm:$0xff] %vm868_vm4, %v783_v40 }
 0x111   : > { %1005 = vrot.lane.b32.xlu0 %v3258_v41, %s2704_s30  ;;  %v339_v41 = vadd.f32 %v2830_v6, %v303_v47 }
 0x113   : > { %v793_v53 = vpop.permute.xlu0 %792  ;;  %997 = vrot.lane.b32.xlu2 %v3193_v21, %s2704_s30  ;;  %v371_v43 = vmax.f32 %v339_v41, 0.0 }
 0x114   : > { %879 = vst.msk [vmem:[#allocation3 + $0x50] sm:$0xff] %vm868_vm4, %v793_v53 }
 0x115   : > { %1001 = vrot.lane.b32.xlu1 %v3214_v9, %s2704_s30  ;;  %v803_v5 = vpop.permute.xlu2 %802  ;;  %450 = vst.msk [vmem:[#allocation2 + $0x189] sm:$0xff] %vm372_vm0, %v371_v43 }
 0x116   : > { %884 = vst.msk [vmem:[#allocation3 + $0x78] sm:$0xff] %vm868_vm4, %v803_v5 }
 0x117   : > { %v789_v20 = vpop.permute.xlu1 %788 }
 0x118   : > { %877 = vst.msk [vmem:[#allocation3 + $0x40] sm:$0xff] %vm868_vm4, %v789_v20  ;;  %v3492_v20 = vld [vmem:[#allocation2 + $0x99] sm:$0xff] }
 0x119   : > { %1011 = vrot.lane.b32.xlu0 %v3285_v8, %s2704_s30 }
 0x11b   : > { %v799_v21 = vpop.permute.xlu0 %798  ;;  %1003 = vrot.lane.b32.xlu2 %v3220_v11, %s2704_s30 }
 0x11c   : > { %882 = vst.msk [vmem:[#allocation3 + $0x68] sm:$0xff] %vm868_vm4, %v799_v21  ;;  %v932_v49 = vld [vmem:[#allocation2 + $0x188] sm:$0xff] }
 0x11d   : > { %1007 = vrot.lane.b32.xlu1 %v3241_v0, %s2704_s30  ;;  %v809_v63 = vpop.permute.xlu2 %808 }
 0x11e   : > { %887 = vst.msk [vmem:[#allocation3 + $0x90] sm:$0xff] %vm868_vm4, %v809_v63 }
 0x11f   : > { %v795_v45 = vpop.permute.xlu1 %794 }
 0x120   : > { %880 = vst.msk [vmem:[#allocation3 + $0x58] sm:$0xff] %vm868_vm4, %v795_v45 }
 0x121   : > { %1017 = vrot.lane.b32.xlu0 %v3312_v60, %s2704_s30 }
 0x123   : > { %v805_v2 = vpop.permute.xlu0 %804  ;;  %1009 = vrot.lane.b32.xlu2 %v3247_v34, %s2704_s30 }
 0x124   : > { %885 = vst.msk [vmem:[#allocation3 + $0x80] sm:$0xff] %vm868_vm4, %v805_v2 }
 0x125   : > { %1013 = vrot.lane.b32.xlu1 %v3268_v31, %s2704_s30  ;;  %v815_v6 = vpop.permute.xlu2 %814 }
 0x126   : > { %890 = vst.msk [vmem:[#allocation3 + $0xa8] sm:$0xff] %vm868_vm4, %v815_v6  ;;  %v4220_v6 = vld [vmem:[#allocation10_spill] sm:$0xff] }
 0x127   : > { %v801_v0 = vpop.permute.xlu1 %800 }
 0x128   : > { %883 = vst.msk [vmem:[#allocation3 + $0x70] sm:$0xff] %vm868_vm4, %v801_v0 }
 0x129   : > { %1023 = vrot.lane.b32.xlu0 %v3331_v46, %s2704_s30  ;;  %v931_v46 = vld [vmem:[#allocation2 + $0x180] sm:$0xff] }
 0x12b   : > { %v811_v8 = vpop.permute.xlu0 %810  ;;  %1015 = vrot.lane.b32.xlu2 %v3274_v35, %s2704_s30 }
 0x12c   : > { %888 = vst.msk [vmem:[#allocation3 + $0x98] sm:$0xff] %vm868_vm4, %v811_v8 }
 0x12d   : > { %1019 = vrot.lane.b32.xlu1 %v3295_v55, %s2704_s30  ;;  %v821_v11 = vpop.permute.xlu2 %820 }
 0x12e   : > { %893 = vst.msk [vmem:[#allocation3 + $0xc0] sm:$0xff] %vm868_vm4, %v821_v11 }
 0x12f   : > { %v807_v31 = vpop.permute.xlu1 %806 }
 0x130   : > { %886 = vst.msk [vmem:[#allocation3 + $0x88] sm:$0xff] %vm868_vm4, %v807_v31  ;;  %v4223_v31 = vld [vmem:[#allocation13_spill] sm:$0xff] }
 0x131   : > { %1158 = vrot.lane.b32.xlu0 %v2906_v61, %s2705_s6 }
 0x133   : > { %v817_v34 = vpop.permute.xlu0 %816  ;;  %1021 = vrot.lane.b32.xlu2 %v3301_v13, %s2704_s30 }
 0x134   : > { %891 = vst.msk [vmem:[#allocation3 + $0xb0] sm:$0xff] %vm868_vm4, %v817_v34  ;;  %v4224_v34 = vld [vmem:[#allocation8_spill] sm:$0xff] }
 0x135   : > { %1025 = vrot.lane.b32.xlu1 %v931_v46, %s2704_s30  ;;  %v827_v55 = vpop.permute.xlu2 %826 }
 0x136   : > { %896 = vst.msk [vmem:[#allocation3 + $0xd8] sm:$0xff] %vm868_vm4, %v827_v55  ;;  %v4225_v55 = vld [vmem:[#allocation7_spill] sm:$0xff] }
 0x137   : > { %v813_v35 = vpop.permute.xlu1 %812 }
 0x138   : > { %889 = vst.msk [vmem:[#allocation3 + $0xa0] sm:$0xff] %vm868_vm4, %v813_v35 }
 0x139   : > { %1164 = vrot.lane.b32.xlu0 %v2942_v27, %s2705_s6  ;;  %v3457_v27 = vld [vmem:[#allocation2 + $0x49] sm:$0xff] }
 0x13b   : > { %v823_v61 = vpop.permute.xlu0 %822  ;;  %1027 = vrot.lane.b32.xlu2 %v932_v49, %s2704_s30 }
 0x13c   : > { %894 = vst.msk [vmem:[#allocation3 + $0xc8] sm:$0xff] %vm868_vm4, %v823_v61  ;;  %v4226_v61 = vld [vmem:[#allocation16_spill] sm:$0xff] }
 0x13d   : > { %1160 = vrot.lane.b32.xlu1 %v2924_v14, %s2705_s6  ;;  %v833_v13 = vpop.permute.xlu2 %832 }
 0x13e   : > { %899 = vst.msk [vmem:[#allocation3 + $0xf0] sm:$0xff] %vm868_vm4, %v833_v13 }
 0x13f   : > { %v819_v62 = vpop.permute.xlu1 %818 }
 0x140   : > { %892 = vst.msk [vmem:[#allocation3 + $0xb8] sm:$0xff] %vm868_vm4, %v819_v62  ;;  %v4227_v62 = vld [vmem:[#allocation11_spill] sm:$0xff] }
 0x141   : > { %1170 = vrot.lane.b32.xlu0 %v2960_v42, %s2705_s6  ;;  %v3470_v42 = vld [vmem:[#allocation2 + $0x69] sm:$0xff] }
 0x143   : > { %v829_v58 = vpop.permute.xlu0 %828  ;;  %1162 = vrot.lane.b32.xlu2 %v3453_v50, %s2705_s6 }
 0x144   : > { %897 = vst.msk [vmem:[#allocation3 + $0xe0] sm:$0xff] %vm868_vm4, %v829_v58  ;;  %v4228_v58 = vld [vmem:[#allocation9_spill] sm:$0xff] }
 0x145   : > { %1166 = vrot.lane.b32.xlu1 %v3457_v27, %s2705_s6  ;;  %v968_v14 = vpop.permute.xlu2 %967 }
 0x146   : > { %1063 = vst.msk [vmem:[#allocation3 + $0x8] sm:$0xff] %vm1061_vm5, %v968_v14 }
 0x147   : > { %v825_v16 = vpop.permute.xlu1 %824 }
 0x148   : > { %895 = vst.msk [vmem:[#allocation3 + $0xd0] sm:$0xff] %vm868_vm4, %v825_v16 }
 0x149   : > { %1176 = vrot.lane.b32.xlu0 %v2980_v57, %s2705_s6  ;;  %v3483_v57 = vld [vmem:[#allocation2 + $0x91] sm:$0xff] }
 0x14b   : > { %v835_v37 = vpop.permute.xlu0 %834  ;;  %1168 = vrot.lane.b32.xlu2 %v3466_v18, %s2705_s6 }
 0x14c   : > { %900 = vst.msk [vmem:[#allocation3 + $0xf8] sm:$0xff] %vm868_vm4, %v835_v37  ;;  %v4229_v37 = vld [vmem:[#allocation19_spill] sm:$0xff] }
 0x14d   : > { %1172 = vrot.lane.b32.xlu1 %v3470_v42, %s2705_s6  ;;  %v974_v3 = vpop.permute.xlu2 %973 }
 0x14e   : > { %1066 = vst.msk [vmem:[#allocation3 + $0x20] sm:$0xff] %vm1061_vm5, %v974_v3 }
 0x14f   : > { %v831_v33 = vpop.permute.xlu1 %830 }
 0x150   : > { %898 = vst.msk [vmem:[#allocation3 + $0xe8] sm:$0xff] %vm868_vm4, %v831_v33  ;;  %v4230_v33 = vld [vmem:[#allocation14_spill] sm:$0xff] }
 0x151   : > { %1182 = vrot.lane.b32.xlu0 %v2998_v7, %s2705_s6 }
 0x153   : > { %v970_v40 = vpop.permute.xlu0 %969  ;;  %1174 = vrot.lane.b32.xlu2 %v3479_v4, %s2705_s6 }
 0x154   : > { %1064 = vst.msk [vmem:[#allocation3 + $0x10] sm:$0xff] %vm1061_vm5, %v970_v40  ;;  %v4231_v40 = vld [vmem:[#allocation12_spill] sm:$0xff] }
 0x155   : > { %1178 = vrot.lane.b32.xlu1 %v3483_v57, %s2705_s6  ;;  %v980_v53 = vpop.permute.xlu2 %979 }
 0x156   : > { %1069 = vst.msk [vmem:[#allocation3 + $0x38] sm:$0xff] %vm1061_vm5, %v980_v53 }
 0x157   : > { %v966_v5 = vpop.permute.xlu1 %965 }
 0x158   : > { %1062 = vst.msk [vmem:[#allocation3] sm:$0xff] %vm1061_vm5, %v966_v5 }
 0x159   : > { %1188 = vrot.lane.b32.xlu0 %v3016_v17, %s2705_s6 }
 0x15b   : > { %v976_v7 = vpop.permute.xlu0 %975  ;;  %1180 = vrot.lane.b32.xlu2 %v3492_v20, %s2705_s6 }
 0x15c   : > { %1067 = vst.msk [vmem:[#allocation3 + $0x28] sm:$0xff] %vm1061_vm5, %v976_v7  ;;  %v4232_v7 = vld [vmem:[#allocation22_spill] sm:$0xff] }
 0x15d   : > { %1184 = vrot.lane.b32.xlu1 %v2974_v52, %s2705_s6  ;;  %v986_v54 = vpop.permute.xlu2 %985 }
 0x15e   : > { %1072 = vst.msk [vmem:[#allocation3 + $0x50] sm:$0xff] %vm1061_vm5, %v986_v54 }
 0x15f   : > { %v972_v47 = vpop.permute.xlu1 %971 }
 0x160   : > { %1065 = vst.msk [vmem:[#allocation3 + $0x18] sm:$0xff] %vm1061_vm5, %v972_v47  ;;  %v4233_v47 = vld [vmem:[#allocation17_spill] sm:$0xff] }
 0x161   : > { %1194 = vrot.lane.b32.xlu0 %v3031_v23, %s2705_s6 }
 0x163   : > { %v982_v41 = vpop.permute.xlu0 %981  ;;  %1186 = vrot.lane.b32.xlu2 %v3004_v10, %s2705_s6 }
 0x164   : > { %1070 = vst.msk [vmem:[#allocation3 + $0x40] sm:$0xff] %vm1061_vm5, %v982_v41  ;;  %v4234_v41 = vld [vmem:[#allocation15_spill] sm:$0xff] }
 0x165   : > { %1190 = vrot.lane.b32.xlu1 %v2992_v1, %s2705_s6  ;;  %v992_v17 = vpop.permute.xlu2 %991 }
 0x166   : > { %1075 = vst.msk [vmem:[#allocation3 + $0x68] sm:$0xff] %vm1061_vm5, %v992_v17 }
 0x167   : > { %v978_v52 = vpop.permute.xlu1 %977 }
 0x168   : > { %1068 = vst.msk [vmem:[#allocation3 + $0x30] sm:$0xff] %vm1061_vm5, %v978_v52 }
 0x169   : > { %1200 = vrot.lane.b32.xlu0 %v3043_v26, %s2705_s6 }
 0x16b   : > { %v988_v21 = vpop.permute.xlu0 %987  ;;  %1192 = vrot.lane.b32.xlu2 %v3021_v19, %s2705_s6 }
 0x16c   : > { %1073 = vst.msk [vmem:[#allocation3 + $0x58] sm:$0xff] %vm1061_vm5, %v988_v21  ;;  %v4235_v21 = vld [vmem:[#allocation25_spill] sm:$0xff] }
 0x16d   : > { %1196 = vrot.lane.b32.xlu1 %v3012_v15, %s2705_s6  ;;  %v998_v10 = vpop.permute.xlu2 %997 }
 0x16e   : > { %1078 = vst.msk [vmem:[#allocation3 + $0x80] sm:$0xff] %vm1061_vm5, %v998_v10 }
 0x16f   : > { %v984_v1 = vpop.permute.xlu1 %983 }
 0x170   : > { %1071 = vst.msk [vmem:[#allocation3 + $0x48] sm:$0xff] %vm1061_vm5, %v984_v1  ;;  %v4236_v1 = vld [vmem:[#allocation20_spill] sm:$0xff] }
 0x171   : > { %1206 = vrot.lane.b32.xlu0 %v3055_v30, %s2705_s6 }
 0x173   : > { %v994_v23 = vpop.permute.xlu0 %993  ;;  %1198 = vrot.lane.b32.xlu2 %v3035_v24, %s2705_s6 }
 0x174   : > { %1076 = vst.msk [vmem:[#allocation3 + $0x70] sm:$0xff] %vm1061_vm5, %v994_v23  ;;  %v4237_v23 = vld [vmem:[#allocation18_spill] sm:$0xff] }
 0x175   : > { %1202 = vrot.lane.b32.xlu1 %v3028_v22, %s2705_s6  ;;  %v1004_v19 = vpop.permute.xlu2 %1003  ;;  %v1124_v22 = vld [vmem:[#allocation2 + $0x181] sm:$0xff] }
 0x176   : > { %1081 = vst.msk [vmem:[#allocation3 + $0x98] sm:$0xff] %vm1061_vm5, %v1004_v19 }
 0x177   : > { %v990_v15 = vpop.permute.xlu1 %989 }
 0x178   : > { %1074 = vst.msk [vmem:[#allocation3 + $0x60] sm:$0xff] %vm1061_vm5, %v990_v15 }
 0x179   : > { %1212 = vrot.lane.b32.xlu0 %v3070_v36, %s2705_s6  ;;  %v1125_v36 = vld [vmem:[#allocation2 + $0x189] sm:$0xff] }
 0x17b   : > { %v1000_v26 = vpop.permute.xlu0 %999  ;;  %1204 = vrot.lane.b32.xlu2 %v3047_v28, %s2705_s6 }
 0x17c   : > { %1079 = vst.msk [vmem:[#allocation3 + $0x88] sm:$0xff] %vm1061_vm5, %v1000_v26 }
 0x17d   : > { %1208 = vrot.lane.b32.xlu1 %v3041_v25, %s2705_s6  ;;  %v1010_v24 = vpop.permute.xlu2 %1009 }
 0x17e   : > { %1084 = vst.msk [vmem:[#allocation3 + $0xb0] sm:$0xff] %vm1061_vm5, %v1010_v24  ;;  %v4238_v24 = vld [vmem:[#allocation23_spill] sm:$0xff] }
 0x17f   : > { %v996_v30 = vpop.permute.xlu1 %995 }
 0x180   : > { %1077 = vst.msk [vmem:[#allocation3 + $0x78] sm:$0xff] %vm1061_vm5, %v996_v30 }
 0x181   : > { %1218 = vrot.lane.b32.xlu0 %v1124_v22, %s2705_s6  ;;  %v4239_v22 = vld [vmem:[#allocation21_spill] sm:$0xff] }
 0x183   : > { %v1006_v43 = vpop.permute.xlu0 %1005  ;;  %1210 = vrot.lane.b32.xlu2 %v3059_v32, %s2705_s6 }
 0x184   : > { %1082 = vst.msk [vmem:[#allocation3 + $0xa0] sm:$0xff] %vm1061_vm5, %v1006_v43 }
 0x185   : > { %1214 = vrot.lane.b32.xlu1 %v3053_v29, %s2705_s6  ;;  %v1016_v28 = vpop.permute.xlu2 %1015 }
 0x186   : > { %1087 = vst.msk [vmem:[#allocation3 + $0xc8] sm:$0xff] %vm1061_vm5, %v1016_v28 }
 0x187   : > { %v1002_v25 = vpop.permute.xlu1 %1001 }
 0x188   : > { %1080 = vst.msk [vmem:[#allocation3 + $0x90] sm:$0xff] %vm1061_vm5, %v1002_v25  ;;  %v4241_v25 = vld [vmem:[#allocation24_spill] sm:$0xff] }
 0x189   : > { %1353 = vrot.lane.b32.xlu0 %v3108_v48, %s2706_s7 }
 0x18b   : > { %v1012_v63 = vpop.permute.xlu0 %1011  ;;  %1216 = vrot.lane.b32.xlu2 %v3074_v38, %s2705_s6  ;;  %v4219_v38 = vld [vmem:[#allocation4_spill] sm:$0xff] }
 0x18c   : > { %1085 = vst.msk [vmem:[#allocation3 + $0xb8] sm:$0xff] %vm1061_vm5, %v1012_v63 }
 0x18d   : > { %1220 = vrot.lane.b32.xlu1 %v1125_v36, %s2705_s6  ;;  %v1022_v29 = vpop.permute.xlu2 %1021 }
 0x18e   : > { %1090 = vst.msk [vmem:[#allocation3 + $0xe0] sm:$0xff] %vm1061_vm5, %v1022_v29  ;;  %v4242_v29 = vld [vmem:[#allocation28_spill] sm:$0xff] }
 0x18f   : > { %v1008_v32 = vpop.permute.xlu1 %1007 }
 0x190   : > { %1083 = vst.msk [vmem:[#allocation3 + $0xa8] sm:$0xff] %vm1061_vm5, %v1008_v32  ;;  %v4243_v32 = vld [vmem:[#allocation27_spill] sm:$0xff] }
 0x191   : > { %1359 = vrot.lane.b32.xlu0 %v3133_v56, %s2706_s7  ;;  %v4221_v56 = vld [vmem:[#allocation6_spill] sm:$0xff] }
 0x193   : > { %v1018_v45 = vpop.permute.xlu0 %1017  ;;  %1351 = vrot.lane.b32.xlu2 %v3093_v44, %s2706_s7  ;;  %v4222_v44 = vld [vmem:[#allocation5_spill] sm:$0xff] }
 0x194   : > { %1088 = vst.msk [vmem:[#allocation3 + $0xd0] sm:$0xff] %vm1061_vm5, %v1018_v45 }
 0x195   : > { %1355 = vrot.lane.b32.xlu1 %v4219_v38, %s2706_s7  ;;  %v1028_v48 = vpop.permute.xlu2 %1027  ;;  %v1675_v38 = vld [vmem:[#allocation2 + $0x39] sm:$0xff] }
 0x196   : > { %1093 = vst.msk [vmem:[#allocation3 + $0xf8] sm:$0xff] %vm1061_vm5, %v1028_v48 }
 0x197   : > { %v1014_v2 = vpop.permute.xlu1 %1013 }
 0x198   : > { %1086 = vst.msk [vmem:[#allocation3 + $0xc0] sm:$0xff] %vm1061_vm5, %v1014_v2  ;;  %v1481_v2 = vld [vmem:[#allocation2 + $0x30] sm:$0xff] }
 0x199   : > { %1365 = vrot.lane.b32.xlu0 %v4220_v6, %s2706_s7 }
 0x19b   : > { %v1024_v0 = vpop.permute.xlu0 %1023  ;;  %1357 = vrot.lane.b32.xlu2 %v4221_v56, %s2706_s7 }
 0x19c   : > { %1091 = vst.msk [vmem:[#allocation3 + $0xe8] sm:$0xff] %vm1061_vm5, %v1024_v0 }
 0x19d   : > { %1361 = vrot.lane.b32.xlu1 %v4222_v44, %s2706_s7  ;;  %v1163_v8 = vpop.permute.xlu2 %1162  ;;  %v1482_v44 = vld [vmem:[#allocation2 + $0x38] sm:$0xff] }
 0x19e   : > { %1257 = vst.msk [vmem:[#allocation3 + $0x10] sm:$0xff] %vm1254_vm6, %v1163_v8  ;;  %v1868_v8 = vld [vmem:[#allocation2 + $0x3a] sm:$0xff] }
 0x19f   : > { %v1020_v11 = vpop.permute.xlu1 %1019 }
 0x1a0   : > { %1089 = vst.msk [vmem:[#allocation3 + $0xd8] sm:$0xff] %vm1061_vm5, %v1020_v11 }
 0x1a1   : > { %1371 = vrot.lane.b32.xlu0 %v4223_v31, %s2706_s7 }
 0x1a3   : > { %v1159_v46 = vpop.permute.xlu0 %1158  ;;  %1363 = vrot.lane.b32.xlu2 %v4224_v34, %s2706_s7 }
 0x1a4   : > { %1255 = vst.msk [vmem:[#allocation3] sm:$0xff] %vm1254_vm6, %v1159_v46  ;;  %v1869_v46 = vld [vmem:[#allocation2 + $0x4a] sm:$0xff] }
 0x1a5   : > { %1367 = vrot.lane.b32.xlu1 %v4225_v55, %s2706_s7  ;;  %v1169_v35 = vpop.permute.xlu2 %1168  ;;  %v1483_v55 = vld [vmem:[#allocation2 + $0x48] sm:$0xff] }
 0x1a6   : > { %1260 = vst.msk [vmem:[#allocation3 + $0x28] sm:$0xff] %vm1254_vm6, %v1169_v35 }
 0x1a7   : > { %v1026_v49 = vpop.permute.xlu1 %1025 }
 0x1a8   : > { %1092 = vst.msk [vmem:[#allocation3 + $0xf0] sm:$0xff] %vm1061_vm5, %v1026_v49 }
 0x1a9   : > { %1377 = vrot.lane.b32.xlu0 %v4226_v61, %s2706_s7  ;;  %v1875_v61 = vld [vmem:[#allocation2 + $0x92] sm:$0xff] }
 0x1ab   : > { %v1165_v13 = vpop.permute.xlu0 %1164  ;;  %1369 = vrot.lane.b32.xlu2 %v4227_v62, %s2706_s7 }
 0x1ac   : > { %1258 = vst.msk [vmem:[#allocation3 + $0x18] sm:$0xff] %vm1254_vm6, %v1165_v13 }
 0x1ad   : > { %1373 = vrot.lane.b32.xlu1 %v4228_v58, %s2706_s7  ;;  %v1175_v14 = vpop.permute.xlu2 %1174  ;;  %v1484_v58 = vld [vmem:[#allocation2 + $0x50] sm:$0xff] }
 0x1ae   : > { %1263 = vst.msk [vmem:[#allocation3 + $0x40] sm:$0xff] %vm1254_vm6, %v1175_v14  ;;  %v1690_v14 = vld [vmem:[#allocation2 + $0xf1] sm:$0xff] }
 0x1af   : > { %v1161_v16 = vpop.permute.xlu1 %1160 }
 0x1b0   : > { %1256 = vst.msk [vmem:[#allocation3 + $0x8] sm:$0xff] %vm1254_vm6, %v1161_v16 }
 0x1b1   : > { %1383 = vrot.lane.b32.xlu0 %v4229_v37, %s2706_s7  ;;  %v1870_v37 = vld [vmem:[#allocation2 + $0x52] sm:$0xff] }
 0x1b3   : > { %v1171_v3 = vpop.permute.xlu0 %1170  ;;  %1375 = vrot.lane.b32.xlu2 %v4230_v33, %s2706_s7 }
 0x1b4   : > { %1261 = vst.msk [vmem:[#allocation3 + $0x30] sm:$0xff] %vm1254_vm6, %v1171_v3 }
 0x1b5   : > { %1379 = vrot.lane.b32.xlu1 %v4231_v40, %s2706_s7  ;;  %v1181_v53 = vpop.permute.xlu2 %1180  ;;  %v1876_v40 = vld [vmem:[#allocation2 + $0x9a] sm:$0xff] }
 0x1b6   : > { %1266 = vst.msk [vmem:[#allocation3 + $0x58] sm:$0xff] %vm1254_vm6, %v1181_v53  ;;  %v1883_v53 = vld [vmem:[#allocation2 + $0xf2] sm:$0xff] }
 0x1b7   : > { %v1167_v5 = vpop.permute.xlu1 %1166 }
 0x1b8   : > { %1259 = vst.msk [vmem:[#allocation3 + $0x20] sm:$0xff] %vm1254_vm6, %v1167_v5 }
 0x1b9   : > { %1389 = vrot.lane.b32.xlu0 %v4232_v7, %s2706_s7  ;;  %v1498_v7 = vld [vmem:[#allocation2 + $0xf8] sm:$0xff] }
 0x1bb   : > { %v1177_v54 = vpop.permute.xlu0 %1176  ;;  %1381 = vrot.lane.b32.xlu2 %v4233_v47, %s2706_s7  ;;  %v1485_v47 = vld [vmem:[#allocation2 + $0x60] sm:$0xff] }
 0x1bc   : > { %1264 = vst.msk [vmem:[#allocation3 + $0x48] sm:$0xff] %vm1254_vm6, %v1177_v54 }
 0x1bd   : > { %1385 = vrot.lane.b32.xlu1 %v4234_v41, %s2706_s7  ;;  %v1187_v17 = vpop.permute.xlu2 %1186  ;;  %v1678_v41 = vld [vmem:[#allocation2 + $0x61] sm:$0xff] }
 0x1be   : > { %1269 = vst.msk [vmem:[#allocation3 + $0x70] sm:$0xff] %vm1254_vm6, %v1187_v17 }
 0x1bf   : > { %v1173_v52 = vpop.permute.xlu1 %1172 }
 0x1c0   : > { %1262 = vst.msk [vmem:[#allocation3 + $0x38] sm:$0xff] %vm1254_vm6, %v1173_v52 }
 0x1c1   : > { %1395 = vrot.lane.b32.xlu0 %v4235_v21, %s2706_s7  ;;  %v1691_v21 = vld [vmem:[#allocation2 + $0xf9] sm:$0xff] }
 0x1c3   : > { %v1183_v10 = vpop.permute.xlu0 %1182  ;;  %1387 = vrot.lane.b32.xlu2 %v4236_v1, %s2706_s7  ;;  %v1684_v1 = vld [vmem:[#allocation2 + $0xa9] sm:$0xff] }
 0x1c4   : > { %1267 = vst.msk [vmem:[#allocation3 + $0x60] sm:$0xff] %vm1254_vm6, %v1183_v10 }
 0x1c5   : > { %1391 = vrot.lane.b32.xlu1 %v4237_v23, %s2706_s7  ;;  %v1193_v19 = vpop.permute.xlu2 %1192  ;;  %v1871_v23 = vld [vmem:[#allocation2 + $0x62] sm:$0xff] }
 0x1c6   : > { %1272 = vst.msk [vmem:[#allocation3 + $0x88] sm:$0xff] %vm1254_vm6, %v1193_v19 }
 0x1c7   : > { %v1179_v15 = vpop.permute.xlu1 %1178 }
 0x1c8   : > { %1265 = vst.msk [vmem:[#allocation3 + $0x50] sm:$0xff] %vm1254_vm6, %v1179_v15 }
 0x1c9   : > { %1401 = vrot.lane.b32.xlu0 %v3320_v39, %s2706_s7  ;;  %v4240_v39 = vld [vmem:[#allocation26_spill] sm:$0xff] }
 0x1cb   : > { %v1189_v26 = vpop.permute.xlu0 %1188  ;;  %1393 = vrot.lane.b32.xlu2 %v4238_v24, %s2706_s7 }
 0x1cc   : > { %1270 = vst.msk [vmem:[#allocation3 + $0x78] sm:$0xff] %vm1254_vm6, %v1189_v26  ;;  %v1492_v26 = vld [vmem:[#allocation2 + $0xb0] sm:$0xff] }
 0x1cd   : > { %1397 = vrot.lane.b32.xlu1 %v4239_v22, %s2706_s7  ;;  %v1199_v30 = vpop.permute.xlu2 %1198  ;;  %v1877_v22 = vld [vmem:[#allocation2 + $0xaa] sm:$0xff] }
 0x1ce   : > { %1275 = vst.msk [vmem:[#allocation3 + $0xa0] sm:$0xff] %vm1254_vm6, %v1199_v30  ;;  %v1884_v30 = vld [vmem:[#allocation2 + $0xfa] sm:$0xff] }
 0x1cf   : > { %v1185_v43 = vpop.permute.xlu1 %1184 }
 0x1d0   : > { %1268 = vst.msk [vmem:[#allocation3 + $0x68] sm:$0xff] %vm1254_vm6, %v1185_v43 }
 0x1d1   : > { %1407 = vrot.lane.b32.xlu0 %v3337_v51, %s2706_s7 }
 0x1d3   : > { %v1195_v28 = vpop.permute.xlu0 %1194  ;;  %1399 = vrot.lane.b32.xlu2 %v4240_v39, %s2706_s7  ;;  %v2100_v39 = vld [vmem:[%s4164_s1 + $0x40] sm:$0xff] }
 0x1d4   : > { %1273 = vst.msk [vmem:[#allocation3 + $0x90] sm:$0xff] %vm1254_vm6, %v1195_v28  ;;  %2205 = vmatpush.msra.mxu0 %v2100_v39  ;;  %2647 = vmatpush.msra.mxu1 %v2100_v39 }
 0x1d5   : > { %1403 = vrot.lane.b32.xlu1 %v4241_v25, %s2706_s7  ;;  %v1205_v36 = vpop.permute.xlu2 %1204  ;;  %v1499_v25 = vld [vmem:[#allocation2 + $0x108] sm:$0xff]  ;;  %2648 = vmatpush.msra.mxu2 %v2100_v39 }
 0x1d6   : > { %1278 = vst.msk [vmem:[#allocation3 + $0xb8] sm:$0xff] %vm1254_vm6, %v1205_v36  ;;  %2649 = vmatpush.msra.mxu3 %v2100_v39 }
 0x1d7   : > { %v1191_v63 = vpop.permute.xlu1 %1190 }
 0x1d8   : > { %1271 = vst.msk [vmem:[#allocation3 + $0x80] sm:$0xff] %vm1254_vm6, %v1191_v63  ;;  %v1486_v63 = vld [vmem:[#allocation2 + $0x68] sm:$0xff] }
 0x1d9   : > { %1738 = vrot.lane.b32.xlu0 %v3453_v50, %s2707_s8  ;;  %v1867_v50 = vld [vmem:[#allocation2 + $0x32] sm:$0xff] }
 0x1db   : > { %v1201_v51 = vpop.permute.xlu0 %1200  ;;  %1405 = vrot.lane.b32.xlu2 %v4242_v29, %s2706_s7  ;;  %v2098_v29 = vld [vmem:[%s4164_s1 + $0x30] sm:$0xff] }
 0x1dc   : > { %1276 = vst.msk [vmem:[#allocation3 + $0xa8] sm:$0xff] %vm1254_vm6, %v1201_v51  ;;  %v2099_v51 = vld [vmem:[%s4164_s1 + $0x38] sm:$0xff] }
 0x1dd   : > { %1409 = vrot.lane.b32.xlu1 %v4243_v32, %s2706_s7  ;;  %v1211_v45 = vpop.permute.xlu2 %1210  ;;  %2206 = vmatpush.msra.mxu0 %v2099_v51 }
 0x1de   : > { %1281 = vst.msk [vmem:[#allocation3 + $0xd0] sm:$0xff] %vm1254_vm6, %v1211_v45  ;;  %2650 = vmatpush.msra.mxu1 %v2099_v51  ;;  %2651 = vmatpush.msra.mxu2 %v2099_v51  ;;  %v2097_v45 = vld [vmem:[%s4164_s1 + $0x28] sm:$0xff] }
 0x1df   : > { %v1197_v48 = vpop.permute.xlu1 %1196  ;;  %2207 = vmatpush.msra.mxu0 %v2098_v29  ;;  %2652 = vmatpush.msra.mxu3 %v2099_v51 }
 0x1e0   : > { %1274 = vst.msk [vmem:[#allocation3 + $0x98] sm:$0xff] %vm1254_vm6, %v1197_v48  ;;  %2653 = vmatpush.msra.mxu1 %v2098_v29  ;;  %2654 = vmatpush.msra.mxu2 %v2098_v29  ;;  %v2096_v48 = vld [vmem:[%s4164_s1 + $0x20] sm:$0xff] }
 0x1e1   : > { %1740 = vrot.lane.b32.xlu0 %v1675_v38, %s2707_s8  ;;  %2208 = vmatpush.msra.mxu0 %v2097_v45 }
 0x1e2   : > { %2656 = vmatpush.msra.mxu1 %v2097_v45  ;;  %2657 = vmatpush.msra.mxu2 %v2097_v45 }
 0x1e3   : > { %v1207_v6 = vpop.permute.xlu0 %1206  ;;  %1545 = vrot.lane.b32.xlu2 %v1481_v2, %s2708_s9  ;;  %v1878_v2 = vld [vmem:[#allocation2 + $0xb2] sm:$0xff]  ;;  %2209 = vmatpush.msra.mxu0 %v2096_v48 }
 0x1e4   : > { %1279 = vst.msk [vmem:[#allocation3 + $0xc0] sm:$0xff] %vm1254_vm6, %v1207_v6  ;;  %v1685_v6 = vld [vmem:[#allocation2 + $0xb1] sm:$0xff]  ;;  %2659 = vmatpush.msra.mxu1 %v2096_v48  ;;  %2660 = vmatpush.msra.mxu2 %v2096_v48 }
 0x1e5   : > { %1931 = vrot.lane.b32.xlu1 %v1867_v50, %s2709_s10  ;;  %v1217_v0 = vpop.permute.xlu2 %1216  ;;  %2655 = vmatpush.msra.mxu3 %v2098_v29 }
 0x1e6   : > { %1284 = vst.msk [vmem:[#allocation3 + $0xe8] sm:$0xff] %vm1254_vm6, %v1217_v0  ;;  %v2094_v0 = vld [vmem:[%s4164_s1 + $0x10] sm:$0xff] }
 0x1e7   : > { %v1203_v56 = vpop.permute.xlu1 %1202  ;;  %2658 = vmatpush.msra.mxu3 %v2097_v45  ;;  %v1887_v45 = vld [vmem:[#allocation2 + $0x122] sm:$0xff] }
 0x1e8   : > { %1277 = vst.msk [vmem:[#allocation3 + $0xb0] sm:$0xff] %vm1254_vm6, %v1203_v56 }
 0x1e9   : > { %1561 = vrot.lane.b32.xlu0 %v3141_v59, %s2708_s9  ;;  %2661 = vmatpush.msra.mxu3 %v2096_v48  ;;  %v1874_v48 = vld [vmem:[#allocation2 + $0x82] sm:$0xff] }
 0x1eb   : > { %v1213_v11 = vpop.permute.xlu0 %1212  ;;  %1547 = vrot.lane.b32.xlu2 %v1482_v44, %s2708_s9  ;;  %v2093_v44 = vld [vmem:[%s4164_s1 + $0x8] sm:$0xff] }
 0x1ec   : > { %1282 = vst.msk [vmem:[#allocation3 + $0xd8] sm:$0xff] %vm1254_vm6, %v1213_v11  ;;  %v2092_v11 = vld [vmem:[%s4164_s1] sm:$0xff] }
 0x1ed   : > { %1933 = vrot.lane.b32.xlu1 %v1868_v8, %s2709_s10  ;;  %v1352_v31 = vpop.permute.xlu2 %1351 }
 0x1ee   : > { %1448 = vst.msk [vmem:[#allocation3] sm:$0xff] %vm1447_vm7, %v1352_v31  ;;  %v1885_v31 = vld [vmem:[#allocation2 + $0x10a] sm:$0xff] }
 0x1ef   : > { %v1209_v34 = vpop.permute.xlu1 %1208 }
 0x1f0   : > { %1280 = vst.msk [vmem:[#allocation3 + $0xc8] sm:$0xff] %vm1254_vm6, %v1209_v34  ;;  %v1872_v34 = vld [vmem:[#allocation2 + $0x6a] sm:$0xff] }
 0x1f1   : > { %1935 = vrot.lane.b32.xlu0 %v1869_v46, %s2709_s10 }
 0x1f3   : > { %v1219_v59 = vpop.permute.xlu0 %1218  ;;  %1549 = vrot.lane.b32.xlu2 %v1483_v55, %s2708_s9 }
 0x1f4   : > { %1285 = vst.msk [vmem:[#allocation3 + $0xf0] sm:$0xff] %vm1254_vm6, %v1219_v59 }
 0x1f5   : > { %1742 = vrot.lane.b32.xlu1 %v3457_v27, %s2707_s8  ;;  %v1358_v35 = vpop.permute.xlu2 %1357 }
 0x1f6   : > { %1451 = vst.msk [vmem:[#allocation3 + $0x18] sm:$0xff] %vm1447_vm7, %v1358_v35  ;;  %v1493_v35 = vld [vmem:[#allocation2 + $0xc0] sm:$0xff] }
 0x1f7   : > { %v1215_v49 = vpop.permute.xlu1 %1214 }
 0x1f8   : > { %1283 = vst.msk [vmem:[#allocation3 + $0xe0] sm:$0xff] %vm1254_vm6, %v1215_v49 }
 0x1f9   : > { %1563 = vrot.lane.b32.xlu0 %v3177_v12, %s2708_s9 }
 0x1fb   : > { %v1354_v13 = vpop.permute.xlu0 %1353  ;;  %1754 = vrot.lane.b32.xlu2 %v3483_v57, %s2707_s8 }
 0x1fc   : > { %1449 = vst.msk [vmem:[#allocation3 + $0x8] sm:$0xff] %vm1447_vm7, %v1354_v13  ;;  %v1891_v13 = vld [vmem:[#allocation2 + $0x152] sm:$0xff] }
 0x1fd   : > { %1947 = vrot.lane.b32.xlu1 %v1875_v61, %s2709_s10  ;;  %v1364_v62 = vpop.permute.xlu2 %1363  ;;  %v1698_v61 = vld [vmem:[#allocation2 + $0x151] sm:$0xff] }
 0x1fe   : > { %1454 = vst.msk [vmem:[#allocation3 + $0x30] sm:$0xff] %vm1447_vm7, %v1364_v62 }
 0x1ff   : > { %v1221_v27 = vpop.permute.xlu1 %1220 }
 0x200   : > { %1286 = vst.msk [vmem:[#allocation3 + $0xf8] sm:$0xff] %vm1254_vm6, %v1221_v27 }
 0x201   : > { %1577 = vrot.lane.b32.xlu0 %v3214_v9, %s2708_s9 }
 0x203   : > { %v1360_v12 = vpop.permute.xlu0 %1359  ;;  %1551 = vrot.lane.b32.xlu2 %v1484_v58, %s2708_s9  ;;  %v1500_v58 = vld [vmem:[#allocation2 + $0x110] sm:$0xff] }
 0x204   : > { %1452 = vst.msk [vmem:[#allocation3 + $0x20] sm:$0xff] %vm1447_vm7, %v1360_v12 }
 0x205   : > { %1744 = vrot.lane.b32.xlu1 %v3466_v18, %s2707_s8  ;;  %v1370_v57 = vpop.permute.xlu2 %1369  ;;  %v1491_v18 = vld [vmem:[#allocation2 + $0xa8] sm:$0xff] }
 0x206   : > { %1457 = vst.msk [vmem:[#allocation3 + $0x48] sm:$0xff] %vm1447_vm7, %v1370_v57  ;;  %v1487_v57 = vld [vmem:[#allocation2 + $0x78] sm:$0xff] }
 0x207   : > { %v1356_v16 = vpop.permute.xlu1 %1355 }
 0x208   : > { %1450 = vst.msk [vmem:[#allocation3 + $0x10] sm:$0xff] %vm1447_vm7, %v1356_v16 }
 0x209   : > { %1770 = vrot.lane.b32.xlu0 %v1690_v14, %s2707_s8 }
 0x20b   : > { %v1366_v3 = vpop.permute.xlu0 %1365  ;;  %1756 = vrot.lane.b32.xlu2 %v3492_v20, %s2707_s8 }
 0x20c   : > { %1455 = vst.msk [vmem:[#allocation3 + $0x38] sm:$0xff] %vm1447_vm7, %v1366_v3 }
 0x20d   : > { %1937 = vrot.lane.b32.xlu1 %v1870_v37, %s2709_s10  ;;  %v1376_v9 = vpop.permute.xlu2 %1375  ;;  %v1879_v37 = vld [vmem:[#allocation2 + $0xc2] sm:$0xff] }
 0x20e   : > { %1460 = vst.msk [vmem:[#allocation3 + $0x60] sm:$0xff] %vm1447_vm7, %v1376_v9  ;;  %v1686_v9 = vld [vmem:[#allocation2 + $0xc1] sm:$0xff] }
 0x20f   : > { %v1362_v33 = vpop.permute.xlu1 %1361 }
 0x210   : > { %1453 = vst.msk [vmem:[#allocation3 + $0x28] sm:$0xff] %vm1447_vm7, %v1362_v33 }
 0x211   : > { %1565 = vrot.lane.b32.xlu0 %v1491_v18, %s2708_s9  ;;  %v1506_v18 = vld [vmem:[#allocation2 + $0x158] sm:$0xff] }
 0x213   : > { %v1372_v5 = vpop.permute.xlu0 %1371  ;;  %1949 = vrot.lane.b32.xlu2 %v1876_v40, %s2709_s10  ;;  %v1886_v40 = vld [vmem:[#allocation2 + $0x112] sm:$0xff] }
 0x214   : > { %1458 = vst.msk [vmem:[#allocation3 + $0x50] sm:$0xff] %vm1447_vm7, %v1372_v5 }
 0x215   : > { %1963 = vrot.lane.b32.xlu1 %v1883_v53, %s2709_s10  ;;  %v1382_v20 = vpop.permute.xlu2 %1381 }
 0x216   : > { %1463 = vst.msk [vmem:[#allocation3 + $0x78] sm:$0xff] %vm1447_vm7, %v1382_v20  ;;  %v1873_v20 = vld [vmem:[#allocation2 + $0x7a] sm:$0xff] }
 0x217   : > { %v1368_v54 = vpop.permute.xlu1 %1367 }
 0x218   : > { %1456 = vst.msk [vmem:[#allocation3 + $0x40] sm:$0xff] %vm1447_vm7, %v1368_v54 }
 0x219   : > { %1579 = vrot.lane.b32.xlu0 %v1498_v7, %s2708_s9  ;;  %v1693_v7 = vld [vmem:[#allocation2 + $0x111] sm:$0xff] }
 0x21b   : > { %v1378_v17 = vpop.permute.xlu0 %1377  ;;  %1553 = vrot.lane.b32.xlu2 %v1485_v47, %s2708_s9 }
 0x21c   : > { %1461 = vst.msk [vmem:[#allocation3 + $0x68] sm:$0xff] %vm1447_vm7, %v1378_v17 }
 0x21d   : > { %1746 = vrot.lane.b32.xlu1 %v1678_v41, %s2707_s8  ;;  %v1388_v52 = vpop.permute.xlu2 %1387  ;;  %v1494_v41 = vld [vmem:[#allocation2 + $0xc8] sm:$0xff] }
 0x21e   : > { %1466 = vst.msk [vmem:[#allocation3 + $0x90] sm:$0xff] %vm1447_vm7, %v1388_v52 }
 0x21f   : > { %v1374_v10 = vpop.permute.xlu1 %1373 }
 0x220   : > { %1459 = vst.msk [vmem:[#allocation3 + $0x58] sm:$0xff] %vm1447_vm7, %v1374_v10  ;;  %v1892_v10 = vld [vmem:[#allocation2 + $0x15a] sm:$0xff] }
 0x221   : > { %1772 = vrot.lane.b32.xlu0 %v1691_v21, %s2707_s8  ;;  %v1699_v21 = vld [vmem:[#allocation2 + $0x159] sm:$0xff] }
 0x223   : > { %v1384_v19 = vpop.permute.xlu0 %1383  ;;  %1758 = vrot.lane.b32.xlu2 %v1684_v1, %s2707_s8 }
 0x224   : > { %1464 = vst.msk [vmem:[#allocation3 + $0x80] sm:$0xff] %vm1447_vm7, %v1384_v19  ;;  %v1501_v19 = vld [vmem:[#allocation2 + $0x120] sm:$0xff] }
 0x225   : > { %1939 = vrot.lane.b32.xlu1 %v1871_v23, %s2709_s10  ;;  %v1394_v15 = vpop.permute.xlu2 %1393 }
 0x226   : > { %1469 = vst.msk [vmem:[#allocation3 + $0xa8] sm:$0xff] %vm1447_vm7, %v1394_v15 }
 0x227   : > { %v1380_v24 = vpop.permute.xlu1 %1379 }
 0x228   : > { %1462 = vst.msk [vmem:[#allocation3 + $0x70] sm:$0xff] %vm1447_vm7, %v1380_v24  ;;  %v1488_v24 = vld [vmem:[#allocation2 + $0x80] sm:$0xff] }
 0x229   : > { %1567 = vrot.lane.b32.xlu0 %v1492_v26, %s2708_s9 }
 0x22b   : > { %v1390_v43 = vpop.permute.xlu0 %1389  ;;  %1951 = vrot.lane.b32.xlu2 %v1877_v22, %s2709_s10  ;;  %v1681_v22 = vld [vmem:[#allocation2 + $0x81] sm:$0xff] }
 0x22c   : > { %1467 = vst.msk [vmem:[#allocation3 + $0x98] sm:$0xff] %vm1447_vm7, %v1390_v43 }
 0x22d   : > { %1965 = vrot.lane.b32.xlu1 %v1884_v30, %s2709_s10  ;;  %v1400_v28 = vpop.permute.xlu2 %1399 }
 0x22e   : > { %1472 = vst.msk [vmem:[#allocation3 + $0xc0] sm:$0xff] %vm1447_vm7, %v1400_v28  ;;  %v1880_v28 = vld [vmem:[#allocation2 + $0xca] sm:$0xff] }
 0x22f   : > { %v1386_v36 = vpop.permute.xlu1 %1385 }
 0x230   : > { %1465 = vst.msk [vmem:[#allocation3 + $0x88] sm:$0xff] %vm1447_vm7, %v1386_v36  ;;  %v1687_v36 = vld [vmem:[#allocation2 + $0xc9] sm:$0xff] }
 0x231   : > { %1581 = vrot.lane.b32.xlu0 %v1499_v25, %s2708_s9 }
 0x233   : > { %v1396_v32 = vpop.permute.xlu0 %1395  ;;  %1555 = vrot.lane.b32.xlu2 %v1486_v63, %s2708_s9  ;;  %v1507_v63 = vld [vmem:[#allocation2 + $0x168] sm:$0xff] }
 0x234   : > { %1470 = vst.msk [vmem:[#allocation3 + $0xb0] sm:$0xff] %vm1447_vm7, %v1396_v32 }
 0x235   : > { %1748 = vrot.lane.b32.xlu1 %v3470_v42, %s2707_s8  ;;  %v1406_v38 = vpop.permute.xlu2 %1405  ;;  %v2095_v42 = vld [vmem:[%s4164_s1 + $0x18] sm:$0xff] }
 0x236   : > { %1475 = vst.msk [vmem:[#allocation3 + $0xd8] sm:$0xff] %vm1447_vm7, %v1406_v38  ;;  %2210 = vmatpush.msra.mxu0 %v2095_v42  ;;  %2662 = vmatpush.msra.mxu1 %v2095_v42 }
 0x237   : > { %v1392_v50 = vpop.permute.xlu1 %1391  ;;  %2663 = vmatpush.msra.mxu2 %v2095_v42  ;;  %2664 = vmatpush.msra.mxu3 %v2095_v42  ;;  %v1688_v42 = vld [vmem:[#allocation2 + $0xd9] sm:$0xff] }
 0x238   : > { %1468 = vst.msk [vmem:[#allocation3 + $0xa0] sm:$0xff] %vm1447_vm7, %v1392_v50  ;;  %2211 = vmatpush.msra.mxu0 %v2094_v0  ;;  %2665 = vmatpush.msra.mxu1 %v2094_v0 }
 0x239   : > { %1953 = vrot.lane.b32.xlu0 %v1878_v2, %s2709_s10  ;;  %2666 = vmatpush.msra.mxu2 %v2094_v0  ;;  %v1694_v2 = vld [vmem:[#allocation2 + $0x121] sm:$0xff] }
 0x23a   : > { %2212 = vmatpush.msra.mxu0 %v2093_v44  ;;  %2668 = vmatpush.msra.mxu1 %v2093_v44 }
 0x23b   : > { %v1402_v56 = vpop.permute.xlu0 %1401  ;;  %1760 = vrot.lane.b32.xlu2 %v1685_v6, %s2707_s8  ;;  %2669 = vmatpush.msra.mxu2 %v2093_v44 }
 0x23c   : > { %1473 = vst.msk [vmem:[#allocation3 + $0xc8] sm:$0xff] %vm1447_vm7, %v1402_v56  ;;  %2213 = vmatpush.msra.mxu0 %v2092_v11  ;;  %2671 = vmatpush.msra.mxu1 %v2092_v11 }
 0x23d   : > { %1593 = vrot.lane.b32.xlu1 %v3312_v60, %s2708_s9  ;;  %v1546_v8 = vpop.permute.xlu2 %1545  ;;  %2672 = vmatpush.msra.mxu2 %v2092_v11  ;;  %v1692_v60 = vld [vmem:[#allocation2 + $0x109] sm:$0xff] }
 0x23e   : > { %1642 = vst.msk [vmem:[#allocation3] sm:$0xff] %vm1641_vm8, %v1546_v8  ;;  %2667 = vmatpush.msra.mxu3 %v2094_v0  ;;  %v1893_v8 = vld [vmem:[#allocation2 + $0x16a] sm:$0xff] }
 0x23f   : > { %v1398_v46 = vpop.permute.xlu1 %1397 }
 0x240   : > { %1471 = vst.msk [vmem:[#allocation3 + $0xb8] sm:$0xff] %vm1447_vm7, %v1398_v46  ;;  %2670 = vmatpush.msra.mxu3 %v2093_v44  ;;  %v1700_v44 = vld [vmem:[#allocation2 + $0x169] sm:$0xff] }
 0x241   : > { %1967 = vrot.lane.b32.xlu0 %v1885_v31, %s2709_s10 }
 0x242   : > { %2673 = vmatpush.msra.mxu3 %v2092_v11 }
 0x243   : > { %v1408_v55 = vpop.permute.xlu0 %1407  ;;  %1941 = vrot.lane.b32.xlu2 %v1872_v34, %s2709_s10  ;;  %v1881_v34 = vld [vmem:[#allocation2 + $0xda] sm:$0xff] }
 0x244   : > { %1476 = vst.msk [vmem:[#allocation3 + $0xe0] sm:$0xff] %vm1447_vm7, %v1408_v55 }
 0x245   : > { %1774 = vrot.lane.b32.xlu1 %v1692_v60, %s2707_s8  ;;  %v1548_v59 = vpop.permute.xlu2 %1547 }
 0x246   : > { %1643 = vst.msk [vmem:[#allocation3 + $0x8] sm:$0xff] %vm1641_vm8, %v1548_v59  ;;  %v1495_v59 = vld [vmem:[#allocation2 + $0xd8] sm:$0xff] }
 0x247   : > { %v1404_v49 = vpop.permute.xlu1 %1403 }
 0x248   : > { %1474 = vst.msk [vmem:[#allocation3 + $0xd0] sm:$0xff] %vm1447_vm7, %v1404_v49 }
 0x249   : > { %1569 = vrot.lane.b32.xlu0 %v1493_v35, %s2708_s9  ;;  %v1502_v35 = vld [vmem:[#allocation2 + $0x128] sm:$0xff] }
 0x24b   : > { %v1739_v62 = vpop.permute.xlu0 %1738  ;;  %1786 = vrot.lane.b32.xlu2 %v1698_v61, %s2707_s8 }
 0x24c   : > { %1835 = vst.msk [vmem:[#allocation3] sm:$0xff] %vm1834_vm9, %v1739_v62 }
 0x24d   : > { %1979 = vrot.lane.b32.xlu1 %v1891_v13, %s2709_s10  ;;  %v1550_v27 = vpop.permute.xlu2 %1549  ;;  %v1888_v13 = vld [vmem:[#allocation2 + $0x12a] sm:$0xff] }
 0x24e   : > { %1644 = vst.msk [vmem:[#allocation3 + $0x10] sm:$0xff] %vm1641_vm8, %v1550_v27  ;;  %v1508_v27 = vld [vmem:[#allocation2 + $0x170] sm:$0xff] }
 0x24f   : > { %v1410_v12 = vpop.permute.xlu1 %1409 }
 0x250   : > { %1477 = vst.msk [vmem:[#allocation3 + $0xe8] sm:$0xff] %vm1447_vm7, %v1410_v12 }
 0x251   : > { %1583 = vrot.lane.b32.xlu0 %v1500_v58, %s2708_s9  ;;  %v1695_v58 = vld [vmem:[#allocation2 + $0x129] sm:$0xff] }
 0x253   : > { %v1741_v14 = vpop.permute.xlu0 %1740  ;;  %1557 = vrot.lane.b32.xlu2 %v1487_v57, %s2708_s9 }
 0x254   : > { %1836 = vst.msk [vmem:[#allocation3 + $0x8] sm:$0xff] %vm1834_vm9, %v1741_v14  ;;  %v1689_v14 = vld [vmem:[#allocation2 + $0xe1] sm:$0xff] }
 0x255   : > { %1750 = vrot.lane.b32.xlu1 %v3479_v4, %s2707_s8  ;;  %v1755_v16 = vpop.permute.xlu2 %1754 }
 0x257   : > { %v1932_v3 = vpop.permute.xlu1 %1931 }
 0x258   : > { %2028 = vst.msk [vmem:[#allocation3] sm:$0xff] %vm2027_vm10, %v1932_v3  ;;  %v1701_v3 = vld [vmem:[#allocation2 + $0x171] sm:$0xff] }
 0x259   : > { %1955 = vrot.lane.b32.xlu0 %v1879_v37, %s2709_s10 }
 0x25b   : > { %v1562_v33 = vpop.permute.xlu0 %1561  ;;  %1762 = vrot.lane.b32.xlu2 %v1686_v9, %s2707_s8  ;;  %v1894_v9 = vld [vmem:[#allocation2 + $0x172] sm:$0xff] }
 0x25c   : > { %1650 = vst.msk [vmem:[#allocation3 + $0x40] sm:$0xff] %vm1641_vm8, %v1562_v33 }
 0x25d   : > { %1595 = vrot.lane.b32.xlu1 %v1506_v18, %s2708_s9  ;;  %1843 = vst.msk [vmem:[#allocation3 + $0x40] sm:$0xff] %vm1834_vm9, %v1755_v16  ;;  %v1552_v4 = vpop.permute.xlu2 %1551 }
 0x25e   : > { %1645 = vst.msk [vmem:[#allocation3 + $0x18] sm:$0xff] %vm1641_vm8, %v1552_v4  ;;  %v1882_v4 = vld [vmem:[#allocation2 + $0xe2] sm:$0xff] }
 0x25f   : > { %v1934_v53 = vpop.permute.xlu1 %1933  ;;  %v2060_v5 = vld [vmem:[#allocation3] sm:$0xff] }
 0x260   : > { %2029 = vst.msk [vmem:[#allocation3 + $0x8] sm:$0xff] %vm2027_vm10, %v1934_v53  ;;  %2611 = vmatmul.msk.f32.vlgmr.msra.gmra.mxu0 %vm2101_vm11, %v2060_v5  ;;  %v1496_v5 = vld [vmem:[#allocation2 + $0xe0] sm:$0xff] }
 0x261   : > { %1969 = vrot.lane.b32.xlu0 %v1886_v40, %s2709_s10 }
 0x263   : > { %v1936_v54 = vpop.permute.xlu0 %1935  ;;  %1943 = vrot.lane.b32.xlu2 %v1873_v20, %s2709_s10  ;;  %v1503_v20 = vld [vmem:[#allocation2 + $0x138] sm:$0xff] }
 0x265   : > { %1776 = vrot.lane.b32.xlu1 %v1693_v7, %s2707_s8  ;;  %v1757_v47 = vpop.permute.xlu2 %1756 }
 0x267   : > { %v1743_v17 = vpop.permute.xlu1 %1742  ;;  %v2061_v52 = vld [vmem:[#allocation3 + $0x8] sm:$0xff] }
 0x268   : > { %1837 = vst.msk [vmem:[#allocation3 + $0x10] sm:$0xff] %vm1834_vm9, %v1743_v17  ;;  %2612 = vmatmul.msk.f32.gmra.mxu0 %vm2101_vm11, %v2061_v52  ;;  %v1509_v52 = vld [vmem:[#allocation2 + $0x180] sm:$0xff] }
 0x269   : > { %2030 = vst.msk [vmem:[#allocation3 + $0x10] sm:$0xff] %vm2027_vm10, %v1936_v54  ;;  %1571 = vrot.lane.b32.xlu0 %v1494_v41, %s2708_s9 }
 0x26b   : > { %v1564_v1 = vpop.permute.xlu0 %1563  ;;  %1788 = vrot.lane.b32.xlu2 %v1699_v21, %s2707_s8  ;;  %v1696_v21 = vld [vmem:[#allocation2 + $0x139] sm:$0xff] }
 0x26c   : > { %1651 = vst.msk [vmem:[#allocation3 + $0x48] sm:$0xff] %vm1641_vm8, %v1564_v1 }
 0x26d   : > { %1981 = vrot.lane.b32.xlu1 %v1892_v10, %s2709_s10  ;;  %1844 = vst.msk [vmem:[#allocation3 + $0x48] sm:$0xff] %vm1834_vm9, %v1757_v47  ;;  %v1950_v23 = vpop.permute.xlu2 %1949  ;;  %v1889_v47 = vld [vmem:[#allocation2 + $0x13a] sm:$0xff] }
 0x26e   : > { %2037 = vst.msk [vmem:[#allocation3 + $0x48] sm:$0xff] %vm2027_vm10, %v1950_v23 }
 0x26f   : > { %v1948_v15 = vpop.permute.xlu1 %1947 }
 0x270   : > { %2036 = vst.msk [vmem:[#allocation3 + $0x40] sm:$0xff] %vm2027_vm10, %v1948_v15  ;;  %v2062_v26 = vld [vmem:[#allocation3 + $0x10] sm:$0xff] }
 0x271   : > { %1585 = vrot.lane.b32.xlu0 %v1501_v19, %s2708_s9  ;;  %2613 = vmatmul.msk.f32.gmra.mxu0 %vm2101_vm11, %v2062_v26  ;;  %v1510_v19 = vld [vmem:[#allocation2 + $0x188] sm:$0xff] }
 0x272   : > { %v1702_v26 = vld [vmem:[#allocation2 + $0x181] sm:$0xff] }
 0x273   : > { %v1578_v30 = vpop.permute.xlu0 %1577  ;;  %1559 = vrot.lane.b32.xlu2 %v1488_v24, %s2708_s9  ;;  %v1895_v24 = vld [vmem:[#allocation2 + $0x182] sm:$0xff] }
 0x274   : > { %1658 = vst.msk [vmem:[#allocation3 + $0x80] sm:$0xff] %vm1641_vm8, %v1578_v30 }
 0x275   : > { %1752 = vrot.lane.b32.xlu1 %v1681_v22, %s2707_s8  ;;  %v1554_v43 = vpop.permute.xlu2 %1553  ;;  %v2069_v32 = vld [vmem:[#allocation3 + $0x48] sm:$0xff] }
 0x276   : > { %1646 = vst.msk [vmem:[#allocation3 + $0x20] sm:$0xff] %vm1641_vm8, %v1554_v43  ;;  %v1890_v43 = vld [vmem:[#allocation2 + $0x142] sm:$0xff] }
 0x277   : > { %v1745_v39 = vpop.permute.xlu1 %1744  ;;  %v2068_v25 = vld [vmem:[#allocation3 + $0x40] sm:$0xff] }
 0x278   : > { %1838 = vst.msk [vmem:[#allocation3 + $0x18] sm:$0xff] %vm1834_vm9, %v1745_v39  ;;  %2619 = vmatmul.msk.f32.vlgmr.msra.gmra.mxu1 %vm2101_vm11, %v2068_v25  ;;  %v1504_v25 = vld [vmem:[#allocation2 + $0x140] sm:$0xff] }
 0x279   : > { %1957 = vrot.lane.b32.xlu0 %v1880_v28, %s2709_s10 }
 0x27b   : > { %v1771_v51 = vpop.permute.xlu0 %1770  ;;  %1764 = vrot.lane.b32.xlu2 %v1687_v36, %s2707_s8  ;;  %v1697_v36 = vld [vmem:[#allocation2 + $0x141] sm:$0xff] }
 0x27c   : > { %1851 = vst.msk [vmem:[#allocation3 + $0x80] sm:$0xff] %vm1834_vm9, %v1771_v51 }
 0x27d   : > { %1597 = vrot.lane.b32.xlu1 %v1507_v63, %s2708_s9  ;;  %v1759_v29 = vpop.permute.xlu2 %1758 }
 0x27f   : > { %v1938_v38 = vpop.permute.xlu1 %1937 }
 0x280   : > { %2031 = vst.msk [vmem:[#allocation3 + $0x18] sm:$0xff] %vm2027_vm10, %v1938_v38  ;;  %2620 = vmatmul.msk.f32.gmra.mxu1 %vm2101_vm11, %v2069_v32  ;;  %v1703_v38 = vld [vmem:[#allocation2 + $0x189] sm:$0xff] }
 0x281   : > { %1971 = vrot.lane.b32.xlu0 %v1887_v45, %s2709_s10 }
 0x283   : > { %v1566_v50 = vpop.permute.xlu0 %1565  ;;  %1945 = vrot.lane.b32.xlu2 %v1874_v48, %s2709_s10  ;;  %v1896_v48 = vld [vmem:[#allocation2 + $0x18a] sm:$0xff] }
 0x284   : > { %1652 = vst.msk [vmem:[#allocation3 + $0x50] sm:$0xff] %vm1641_vm8, %v1566_v50 }
 0x285   : > { %1778 = vrot.lane.b32.xlu1 %v1694_v2, %s2707_s8  ;;  %1845 = vst.msk [vmem:[#allocation3 + $0x50] sm:$0xff] %vm1834_vm9, %v1759_v29  ;;  %v1952_v6 = vpop.permute.xlu2 %1951  ;;  %v1511_v29 = vld [vmem:[#allocation2 + $0x198] sm:$0xff] }
 0x286   : > { %2038 = vst.msk [vmem:[#allocation3 + $0x50] sm:$0xff] %vm2027_vm10, %v1952_v6 }
 0x287   : > { %v1964_v0 = vpop.permute.xlu1 %1963  ;;  %v2063_v56 = vld [vmem:[#allocation3 + $0x18] sm:$0xff] }
 0x288   : > { %2044 = vst.msk [vmem:[#allocation3 + $0x80] sm:$0xff] %vm2027_vm10, %v1964_v0  ;;  %2614 = vmatmul.msk.f32.gmra.mxu0 %vm2101_vm11, %v2063_v56  ;;  %v1704_v0 = vld [vmem:[#allocation2 + $0x199] sm:$0xff] }
 0x289   : > { %1766 = vrot.lane.b32.xlu0 %v1688_v42, %s2707_s8 }
 0x28b   : > { %v1580_v11 = vpop.permute.xlu0 %1579  ;;  %1790 = vrot.lane.b32.xlu2 %v1700_v44, %s2707_s8 }
 0x28c   : > { %1659 = vst.msk [vmem:[#allocation3 + $0x88] sm:$0xff] %vm1641_vm8, %v1580_v11  ;;  %v1898_v11 = vld [vmem:[#allocation2 + $0x1a2] sm:$0xff] }
 0x28d   : > { %1983 = vrot.lane.b32.xlu1 %v1893_v8, %s2709_s10  ;;  %v1556_v31 = vpop.permute.xlu2 %1555  ;;  %v2070_v46 = vld [vmem:[#allocation3 + $0x50] sm:$0xff] }
 0x28e   : > { %1647 = vst.msk [vmem:[#allocation3 + $0x28] sm:$0xff] %vm1641_vm8, %v1556_v31  ;;  %2621 = vmatmul.msk.f32.gmra.mxu1 %vm2101_vm11, %v2070_v46  ;;  %v1897_v46 = vld [vmem:[#allocation2 + $0x19a] sm:$0xff] }
 0x28f   : > { %v1747_v60 = vpop.permute.xlu1 %1746  ;;  %v2076_v55 = vld [vmem:[#allocation3 + $0x80] sm:$0xff] }
 0x290   : > { %1839 = vst.msk [vmem:[#allocation3 + $0x20] sm:$0xff] %vm1834_vm9, %v1747_v60  ;;  %2627 = vmatmul.msk.f32.vlgmr.msra.gmra.mxu2 %vm2101_vm11, %v2076_v55 }
 0x291   : > { %1959 = vrot.lane.b32.xlu0 %v1881_v34, %s2709_s10  ;;  %v1512_v34 = vld [vmem:[#allocation2 + $0x1a0] sm:$0xff] }
 0x293   : > { %v1773_v49 = vpop.permute.xlu0 %1772  ;;  %1573 = vrot.lane.b32.xlu2 %v1495_v59, %s2708_s9 }
 0x294   : > { %1852 = vst.msk [vmem:[#allocation3 + $0x88] sm:$0xff] %vm1834_vm9, %v1773_v49 }
 0x295   : > { %1587 = vrot.lane.b32.xlu1 %v1502_v35, %s2708_s9  ;;  %v1761_v61 = vpop.permute.xlu2 %1760 }
 0x297   : > { %v1940_v62 = vpop.permute.xlu1 %1939 }
 0x298   : > { %2032 = vst.msk [vmem:[#allocation3 + $0x20] sm:$0xff] %vm2027_vm10, %v1940_v62 }
 0x299   : > { %1973 = vrot.lane.b32.xlu0 %v1888_v13, %s2709_s10 }
 0x29b   : > { %v1568_v12 = vpop.permute.xlu0 %1567  ;;  %1599 = vrot.lane.b32.xlu2 %v1508_v27, %s2708_s9 }
 0x29c   : > { %1653 = vst.msk [vmem:[#allocation3 + $0x58] sm:$0xff] %vm1641_vm8, %v1568_v12 }
 0x29d   : > { %1780 = vrot.lane.b32.xlu1 %v1695_v58, %s2707_s8  ;;  %1846 = vst.msk [vmem:[#allocation3 + $0x58] sm:$0xff] %vm1834_vm9, %v1761_v61  ;;  %v1942_v57 = vpop.permute.xlu2 %1941  ;;  %v1705_v61 = vld [vmem:[#allocation2 + $0x1a1] sm:$0xff] }
 0x29f   : > { %v1966_v16 = vpop.permute.xlu1 %1965  ;;  %v2064_v37 = vld [vmem:[#allocation3 + $0x20] sm:$0xff] }
 0x2a0   : > { %2045 = vst.msk [vmem:[#allocation3 + $0x88] sm:$0xff] %vm2027_vm10, %v1966_v16  ;;  %2615 = vmatmul.msk.f32.gmra.mxu0 %vm2101_vm11, %v2064_v37 }
 0x2a1   : > { %1768 = vrot.lane.b32.xlu0 %v1689_v14, %s2707_s8 }
 0x2a3   : > { %v1582_v18 = vpop.permute.xlu0 %1581  ;;  %1792 = vrot.lane.b32.xlu2 %v1701_v3, %s2707_s8 }
 0x2a4   : > { %1660 = vst.msk [vmem:[#allocation3 + $0x90] sm:$0xff] %vm1641_vm8, %v1582_v18 }
 0x2a5   : > { %1985 = vrot.lane.b32.xlu1 %v1894_v9, %s2709_s10  ;;  %v1787_v33 = vpop.permute.xlu2 %1786 }
 0x2a7   : > { %v1749_v40 = vpop.permute.xlu1 %1748  ;;  %v2077_v53 = vld [vmem:[#allocation3 + $0x88] sm:$0xff] }
 0x2a8   : > { %1840 = vst.msk [vmem:[#allocation3 + $0x28] sm:$0xff] %vm1834_vm9, %v1749_v40  ;;  %2628 = vmatmul.msk.f32.gmra.mxu2 %vm2101_vm11, %v2077_v53 }
 0x2a9   : > { %2033 = vst.msk [vmem:[#allocation3 + $0x28] sm:$0xff] %vm2027_vm10, %v1942_v57  ;;  %1961 = vrot.lane.b32.xlu0 %v1882_v4, %s2709_s10 }
 0x2ab   : > { %v1954_v7 = vpop.permute.xlu0 %1953  ;;  %1575 = vrot.lane.b32.xlu2 %v1496_v5, %s2708_s9 }
 0x2ac   : > { %2039 = vst.msk [vmem:[#allocation3 + $0x58] sm:$0xff] %vm2027_vm10, %v1954_v7 }
 0x2ad   : > { %1589 = vrot.lane.b32.xlu1 %v1503_v20, %s2708_s9  ;;  %v1558_v54 = vpop.permute.xlu2 %1557 }
 0x2ae   : > { %1648 = vst.msk [vmem:[#allocation3 + $0x30] sm:$0xff] %vm1641_vm8, %v1558_v54 }
 0x2af   : > { %v1594_v41 = vpop.permute.xlu1 %1593 }
 0x2b0   : > { %1666 = vst.msk [vmem:[#allocation3 + $0xc0] sm:$0xff] %vm1641_vm8, %v1594_v41  ;;  %v2065_v17 = vld [vmem:[#allocation3 + $0x28] sm:$0xff] }
 0x2b1   : > { %1859 = vst.msk [vmem:[#allocation3 + $0xc0] sm:$0xff] %vm1834_vm9, %v1787_v33  ;;  %2616 = vmatmul.msk.f32.gmra.mxu0 %vm2101_vm11, %v2065_v17  ;;  %1975 = vrot.lane.b32.xlu0 %v1889_v47, %s2709_s10 }
 0x2b3   : > { %v1968_v10 = vpop.permute.xlu0 %1967  ;;  %v2071_v1 = vld [vmem:[#allocation3 + $0x58] sm:$0xff]  ;;  %1601 = vrot.lane.b32.xlu2 %v1509_v52, %s2708_s9 }
 0x2b4   : > { %2622 = vmatmul.msk.f32.gmra.mxu1 %vm2101_vm11, %v2071_v1 }
 0x2b5   : > { %1782 = vrot.lane.b32.xlu1 %v1696_v21, %s2707_s8  ;;  %v1763_v23 = vpop.permute.xlu2 %1762 }
 0x2b7   : > { %v1775_v15 = vpop.permute.xlu1 %1774 }
 0x2b8   : > { %1853 = vst.msk [vmem:[#allocation3 + $0x90] sm:$0xff] %vm1834_vm9, %v1775_v15 }
 0x2b9   : > { %2046 = vst.msk [vmem:[#allocation3 + $0x90] sm:$0xff] %vm2027_vm10, %v1968_v10  ;;  %1603 = vrot.lane.b32.xlu0 %v1510_v19, %s2708_s9 }
 0x2bb   : > { %v1570_v22 = vpop.permute.xlu0 %1569  ;;  %1794 = vrot.lane.b32.xlu2 %v1702_v26, %s2707_s8 }
 0x2bc   : > { %1654 = vst.msk [vmem:[#allocation3 + $0x60] sm:$0xff] %vm1641_vm8, %v1570_v22 }
 0x2bd   : > { %1987 = vrot.lane.b32.xlu1 %v1895_v24, %s2709_s10  ;;  %1847 = vst.msk [vmem:[#allocation3 + $0x60] sm:$0xff] %vm1834_vm9, %v1763_v23  ;;  %v1944_v30 = vpop.permute.xlu2 %1943 }
 0x2bf   : > { %v1980_v28 = vpop.permute.xlu1 %1979 }
 0x2c0   : > { %2052 = vst.msk [vmem:[#allocation3 + $0xc0] sm:$0xff] %vm2027_vm10, %v1980_v28  ;;  %v2078_v39 = vld [vmem:[#allocation3 + $0x90] sm:$0xff] }
 0x2c1   : > { %2629 = vmatmul.msk.f32.gmra.mxu2 %vm2101_vm11, %v2078_v39  ;;  %1977 = vrot.lane.b32.xlu0 %v1890_v43, %s2709_s10 }
 0x2c3   : > { %v1584_v63 = vpop.permute.xlu0 %1583  ;;  %1591 = vrot.lane.b32.xlu2 %v1504_v25, %s2708_s9 }
 0x2c4   : > { %1661 = vst.msk [vmem:[#allocation3 + $0x98] sm:$0xff] %vm1641_vm8, %v1584_v63 }
 0x2c5   : > { %1784 = vrot.lane.b32.xlu1 %v1697_v36, %s2707_s8  ;;  %v1789_v51 = vpop.permute.xlu2 %1788 }
 0x2c7   : > { %v1751_v32 = vpop.permute.xlu1 %1750  ;;  %v2084_v45 = vld [vmem:[#allocation3 + $0xc0] sm:$0xff] }
 0x2c8   : > { %1841 = vst.msk [vmem:[#allocation3 + $0x30] sm:$0xff] %vm1834_vm9, %v1751_v32  ;;  %2635 = vmatmul.msk.f32.vlgmr.msra.gmra.mxu3 %vm2101_vm11, %v2084_v45 }
 0x2c9   : > { %2034 = vst.msk [vmem:[#allocation3 + $0x30] sm:$0xff] %vm2027_vm10, %v1944_v30  ;;  %1605 = vrot.lane.b32.xlu0 %v1511_v29, %s2708_s9 }
 0x2cb   : > { %v1956_v2 = vpop.permute.xlu0 %1955  ;;  %1796 = vrot.lane.b32.xlu2 %v1703_v38, %s2707_s8 }
 0x2cc   : > { %2040 = vst.msk [vmem:[#allocation3 + $0x60] sm:$0xff] %vm2027_vm10, %v1956_v2 }
 0x2cd   : > { %1989 = vrot.lane.b32.xlu1 %v1896_v48, %s2709_s10  ;;  %v1560_v50 = vpop.permute.xlu2 %1559 }
 0x2ce   : > { %1649 = vst.msk [vmem:[#allocation3 + $0x38] sm:$0xff] %vm1641_vm8, %v1560_v50 }
 0x2cf   : > { %v1596_v6 = vpop.permute.xlu1 %1595 }
 0x2d0   : > { %1667 = vst.msk [vmem:[#allocation3 + $0xc8] sm:$0xff] %vm1641_vm8, %v1596_v6  ;;  %v2066_v42 = vld [vmem:[#allocation3 + $0x30] sm:$0xff] }
 0x2d1   : > { %1860 = vst.msk [vmem:[#allocation3 + $0xc8] sm:$0xff] %vm1834_vm9, %v1789_v51  ;;  %2617 = vmatmul.msk.f32.gmra.mxu0 %vm2101_vm11, %v2066_v42  ;;  %1413 = vrot.lane.b32.xlu0 %v1896_v48, %s2706_s7 }
 0x2d3   : > { %v1970_v56 = vpop.permute.xlu0 %1969  ;;  %v2072_v44 = vld [vmem:[#allocation3 + $0x60] sm:$0xff]  ;;  %1411 = vrot.lane.b32.xlu2 %v1895_v24, %s2706_s7  ;;  %s3889_s7 = scalar_lea.vmem %s4167_s4, %s2645_s21  ;;  %s2610_s21 = sshll.u32 %s4245_s19, 1 }
 0x2d4   : > { %2623 = vmatmul.msk.f32.gmra.mxu1 %vm2101_vm11, %v2072_v44 }
 0x2d5   : > { %1798 = vrot.lane.b32.xlu1 %v1704_v0, %s2707_s8  ;;  %v1765_v8 = vpop.permute.xlu2 %1764 }
 0x2d7   : > { %v1777_v31 = vpop.permute.xlu1 %1776 }
 0x2d8   : > { %1854 = vst.msk [vmem:[#allocation3 + $0x98] sm:$0xff] %vm1834_vm9, %v1777_v31 }
 0x2d9   : > { %2047 = vst.msk [vmem:[#allocation3 + $0x98] sm:$0xff] %vm2027_vm10, %v1970_v56  ;;  %1993 = vrot.lane.b32.xlu0 %v1898_v11, %s2709_s10 }
 0x2db   : > { %v1572_v60 = vpop.permute.xlu0 %1571  ;;  %1991 = vrot.lane.b32.xlu2 %v1897_v46, %s2709_s10  ;;  %s235_s10 = scalar_lea.vmem %s4168_s5, %s2610_s21 }
 0x2dc   : > { %1655 = vst.msk [vmem:[#allocation3 + $0x68] sm:$0xff] %vm1641_vm8, %v1572_v60 }
 0x2dd   : > { %1607 = vrot.lane.b32.xlu1 %v1512_v34, %s2708_s9  ;;  %v2215_v55 = vpop.f32.mrf.mxu0  ;;  %1848 = vst.msk [vmem:[#allocation3 + $0x68] sm:$0xff] %vm1834_vm9, %v1765_v8  ;;  %v1946_v59 = vpop.permute.xlu2 %1945 }
 0x2de   : > { %2311 = vst.msk [vmem:[%s3889_s7] sm:$0xff] %vm372_vm0, %v2215_v55  ;;  %v2413_v62 = vmul.f32 %v2215_v55, %v2215_v55  ;;  %v2343_v12 = vsel %vm372_vm0, %v2215_v55, 0.0 }
 0x2df   : > { %v1982_v35 = vpop.permute.xlu1 %1981 }
 0x2e0   : > { %2053 = vst.msk [vmem:[#allocation3 + $0xc8] sm:$0xff] %vm2027_vm10, %v1982_v35  ;;  %v2079_v49 = vld [vmem:[#allocation3 + $0x98] sm:$0xff]  ;;  %v2445_v9 = vsel %vm372_vm0, %v2413_v62, 0.0 }
 0x2e1   : > { %2630 = vmatmul.msk.f32.gmra.mxu2 %vm2101_vm11, %v2079_v49 }
 0x2e3   : > { %v1586_v13 = vpop.permute.xlu0 %1585  ;;  %1800 = vrot.lane.b32.xlu2 %v1705_v61, %s2707_s8 }
 0x2e4   : > { %1662 = vst.msk [vmem:[#allocation3 + $0xa0] sm:$0xff] %vm1641_vm8, %v1586_v13 }
 0x2e5   : > { %v2218_v27 = vpop.f32.mrf.mxu0  ;;  %v1791_v58 = vpop.permute.xlu2 %1790 }
 0x2e6   : > { %2312 = vst.msk [vmem:[%s3889_s7 + $0x8] sm:$0xff] %vm372_vm0, %v2218_v27  ;;  %v2344_v57 = vsel %vm372_vm0, %v2218_v27, 0.0  ;;  %v2414_v14 = vmul.f32 %v2218_v27, %v2218_v27 }
 0x2e7   : > { %v2345_v16 = vadd.f32 %v2344_v57, %v2343_v12  ;;  %v1753_v37 = vpop.permute.xlu1 %1752  ;;  %v2085_v3 = vld [vmem:[#allocation3 + $0xc8] sm:$0xff] }
 0x2e8   : > { %v2446_v18 = vsel %vm372_vm0, %v2414_v14, 0.0  ;;  %1842 = vst.msk [vmem:[#allocation3 + $0x38] sm:$0xff] %vm1834_vm9, %v1753_v37  ;;  %2636 = vmatmul.msk.f32.gmra.mxu3 %vm2101_vm11, %v2085_v3 }
 0x2e9   : > { %v2447_v33 = vadd.f32 %v2446_v18, %v2445_v9  ;;  %2035 = vst.msk [vmem:[#allocation3 + $0x38] sm:$0xff] %vm2027_vm10, %v1946_v59 }
 0x2eb   : > { %v1958_v4 = vpop.permute.xlu0 %1957 }
 0x2ec   : > { %2041 = vst.msk [vmem:[#allocation3 + $0x68] sm:$0xff] %vm2027_vm10, %v1958_v4 }
 0x2ed   : > { %v1574_v40 = vpop.permute.xlu2 %1573 }
 0x2ee   : > { %v2221_v53 = vpop.f32.mrf.mxu0  ;;  %1656 = vst.msk [vmem:[#allocation3 + $0x70] sm:$0xff] %vm1641_vm8, %v1574_v40 }
 0x2ef   : > { %2313 = vst.msk [vmem:[%s3889_s7 + $0x10] sm:$0xff] %vm372_vm0, %v2221_v53  ;;  %v2346_v5 = vsel %vm372_vm0, %v2221_v53, 0.0  ;;  %v2415_v20 = vmul.f32 %v2221_v53, %v2221_v53  ;;  %v1598_v7 = vpop.permute.xlu1 %1597 }
 0x2f0   : > { %v2347_v54 = vadd.f32 %v2346_v5, %v2345_v16  ;;  %1668 = vst.msk [vmem:[#allocation3 + $0xd0] sm:$0xff] %vm1641_vm8, %v1598_v7  ;;  %v2067_v47 = vld [vmem:[#allocation3 + $0x38] sm:$0xff] }
 0x2f1   : > { %v2448_v41 = vsel %vm372_vm0, %v2415_v20, 0.0  ;;  %2618 = vmatmul.msk.f32.gmra.mxu0 %vm2101_vm11, %v2067_v47  ;;  %1861 = vst.msk [vmem:[#allocation3 + $0xd0] sm:$0xff] %vm1834_vm9, %v1791_v58 }
 0x2f2   : > { %v2449_v17 = vadd.f32 %v2448_v41, %v2447_v33 }
 0x2f3   : > { %v1972_v52 = vpop.permute.xlu0 %1971  ;;  %v2073_v21 = vld [vmem:[#allocation3 + $0x68] sm:$0xff] }
 0x2f4   : > { %2624 = vmatmul.msk.f32.gmra.mxu1 %vm2101_vm11, %v2073_v21 }
 0x2f5   : > { %v3920_v10 = vpop.f32.mrf.mxu1  ;;  %v1600_v1 = vpop.permute.xlu2 %1599 }
 0x2f6   : > { %2319 = vst.msk [vmem:[%s3889_s7 + $0x40] sm:$0xff] %vm372_vm0, %v3920_v10 }
 0x2f7   : > { %v1779_v23 = vpop.permute.xlu1 %1778  ;;  %1669 = vst.msk [vmem:[#allocation3 + $0xd8] sm:$0xff] %vm1641_vm8, %v1600_v1 }
 0x2f8   : > { %1855 = vst.msk [vmem:[#allocation3 + $0xa0] sm:$0xff] %vm1834_vm9, %v1779_v23 }
 0x2f9   : > { %2048 = vst.msk [vmem:[#allocation3 + $0xa0] sm:$0xff] %vm2027_vm10, %v1972_v52 }
 0x2fb   : > { %v1767_v19 = vpop.permute.xlu0 %1766 }
 0x2fc   : > { %1849 = vst.msk [vmem:[#allocation3 + $0x70] sm:$0xff] %vm1834_vm9, %v1767_v19 }
 0x2fd   : > { %v3929_v15 = vpop.f32.mrf.mxu1  ;;  %v1793_v26 = vpop.permute.xlu2 %1792 }
 0x2fe   : > { %2320 = vst.msk [vmem:[%s3889_s7 + $0x48] sm:$0xff] %vm372_vm0, %v3929_v15 }
 0x2ff   : > { %v1984_v24 = vpop.permute.xlu1 %1983  ;;  %1862 = vst.msk [vmem:[#allocation3 + $0xd8] sm:$0xff] %vm1834_vm9, %v1793_v26 }
 0x300   : > { %2054 = vst.msk [vmem:[#allocation3 + $0xd0] sm:$0xff] %vm2027_vm10, %v1984_v24  ;;  %v2080_v22 = vld [vmem:[#allocation3 + $0xa0] sm:$0xff] }
 0x301   : > { %2631 = vmatmul.msk.f32.gmra.mxu2 %vm2101_vm11, %v2080_v22 }
 0x303   : > { %v1960_v30 = vpop.permute.xlu0 %1959 }
 0x304   : > { %2042 = vst.msk [vmem:[#allocation3 + $0x70] sm:$0xff] %vm2027_vm10, %v1960_v30 }
 0x305   : > { %v2224_v43 = vpop.f32.mrf.mxu0  ;;  %v1576_v28 = vpop.permute.xlu2 %1575 }
 0x306   : > { %2314 = vst.msk [vmem:[%s3889_s7 + $0x18] sm:$0xff] %vm372_vm0, %v2224_v43  ;;  %v2348_v39 = vsel %vm372_vm0, %v2224_v43, 0.0  ;;  %v2416_v25 = vmul.f32 %v2224_v43, %v2224_v43 }
 0x307   : > { %v2349_v36 = vadd.f32 %v2348_v39, %v2347_v54  ;;  %v1588_v63 = vpop.permute.xlu1 %1587  ;;  %v2086_v51 = vld [vmem:[#allocation3 + $0xd0] sm:$0xff]  ;;  %1657 = vst.msk [vmem:[#allocation3 + $0x78] sm:$0xff] %vm1641_vm8, %v1576_v28 }
 0x308   : > { %v2450_v29 = vsel %vm372_vm0, %v2416_v25, 0.0  ;;  %1663 = vst.msk [vmem:[#allocation3 + $0xa8] sm:$0xff] %vm1641_vm8, %v1588_v63  ;;  %2637 = vmatmul.msk.f32.gmra.mxu3 %vm2101_vm11, %v2086_v51 }
 0x309   : > { %v2451_v32 = vadd.f32 %v2450_v29, %v2449_v17 }
 0x30b   : > { %v1974_v45 = vpop.permute.xlu0 %1973  ;;  %v2074_v38 = vld [vmem:[#allocation3 + $0x70] sm:$0xff]  ;;  %v3945_v48 = vpop.f32.mrf.mxu1 }
 0x30c   : > { %2625 = vmatmul.msk.f32.gmra.mxu1 %vm2101_vm11, %v2074_v38  ;;  %2321 = vst.msk [vmem:[%s3889_s7 + $0x50] sm:$0xff] %vm372_vm0, %v3945_v48  ;;  %v2421_v38 = vmul.f32 %v3920_v10, %v3920_v10 }
 0x30d   : > { %v1602_v2 = vpop.permute.xlu2 %1601 }
 0x30e   : > { %1670 = vst.msk [vmem:[#allocation3 + $0xe0] sm:$0xff] %vm1641_vm8, %v1602_v2 }
 0x30f   : > { %v1781_v50 = vpop.permute.xlu1 %1780 }
 0x310   : > { %1856 = vst.msk [vmem:[#allocation3 + $0xa8] sm:$0xff] %vm1834_vm9, %v1781_v50 }
 0x311   : > { %2049 = vst.msk [vmem:[#allocation3 + $0xa8] sm:$0xff] %vm2027_vm10, %v1974_v45 }
 0x313   : > { %v1769_v6 = vpop.permute.xlu0 %1768  ;;  %v3954_v42 = vpop.f32.mrf.mxu2 }
 0x314   : > { %2327 = vst.msk [vmem:[%s3889_s7 + $0x80] sm:$0xff] %vm372_vm0, %v3954_v42 }
 0x315   : > { %1850 = vst.msk [vmem:[#allocation3 + $0x78] sm:$0xff] %vm1834_vm9, %v1769_v6  ;;  %v1795_v0 = vpop.permute.xlu2 %1794 }
 0x316   : > { %1863 = vst.msk [vmem:[#allocation3 + $0xe0] sm:$0xff] %vm1834_vm9, %v1795_v0  ;;  %v2358_v0 = vsel %vm372_vm0, %v3920_v10, 0.0 }
 0x317   : > { %v1986_v56 = vpop.permute.xlu1 %1985 }
 0x318   : > { %2055 = vst.msk [vmem:[#allocation3 + $0xd8] sm:$0xff] %vm2027_vm10, %v1986_v56  ;;  %v2081_v44 = vld [vmem:[#allocation3 + $0xa8] sm:$0xff]  ;;  %v2422_v56 = vmul.f32 %v3929_v15, %v3929_v15 }
 0x319   : > { %2632 = vmatmul.msk.f32.gmra.mxu2 %vm2101_vm11, %v2081_v44 }
 0x31b   : > { %v1962_v8 = vpop.permute.xlu0 %1961 }
 0x31c   : > { %2043 = vst.msk [vmem:[#allocation3 + $0x78] sm:$0xff] %vm2027_vm10, %v1962_v8 }
 0x31d   : > { %v2227_v11 = vpop.f32.mrf.mxu0  ;;  %v1592_v31 = vpop.permute.xlu2 %1591 }
 0x31e   : > { %2315 = vst.msk [vmem:[%s3889_s7 + $0x20] sm:$0xff] %vm372_vm0, %v2227_v11  ;;  %v2350_v46 = vsel %vm372_vm0, %v2227_v11, 0.0  ;;  %v2417_v34 = vmul.f32 %v2227_v11, %v2227_v11 }
 0x31f   : > { %v2351_v60 = vadd.f32 %v2350_v46, %v2349_v36  ;;  %v1590_v55 = vpop.permute.xlu1 %1589  ;;  %v2087_v59 = vld [vmem:[#allocation3 + $0xd8] sm:$0xff]  ;;  %1665 = vst.msk [vmem:[#allocation3 + $0xb8] sm:$0xff] %vm1641_vm8, %v1592_v31  ;;  %v2460_v46 = vsel %vm372_vm0, %v2421_v38, 0.0 }
 0x320   : > { %v2452_v35 = vsel %vm372_vm0, %v2417_v34, 0.0  ;;  %1664 = vst.msk [vmem:[#allocation3 + $0xb0] sm:$0xff] %vm1641_vm8, %v1590_v55  ;;  %2638 = vmatmul.msk.f32.gmra.mxu3 %vm2101_vm11, %v2087_v59  ;;  %v2360_v34 = vsel %vm372_vm0, %v3929_v15, 0.0  ;;  %v2462_v59 = vsel %vm372_vm0, %v2422_v56, 0.0 }
 0x321   : > { %v2453_v49 = vadd.f32 %v2452_v35, %v2451_v32  ;;  %v2362_v35 = vsel %vm372_vm0, %v3945_v48, 0.0 }
 0x323   : > { %v2075_v61 = vld [vmem:[#allocation3 + $0x78] sm:$0xff]  ;;  %v1976_v13 = vpop.permute.xlu0 %1975 }
 0x324   : > { %2626 = vmatmul.msk.f32.gmra.mxu1 %vm2101_vm11, %v2075_v61 }
 0x325   : > { %v1797_v62 = vpop.permute.xlu2 %1796 }
 0x327   : > { %v1783_v27 = vpop.permute.xlu1 %1782 }
 0x328   : > { %1857 = vst.msk [vmem:[#allocation3 + $0xb0] sm:$0xff] %vm1834_vm9, %v1783_v27 }
 0x329   : > { %2050 = vst.msk [vmem:[#allocation3 + $0xb0] sm:$0xff] %vm2027_vm10, %v1976_v13 }
 0x32b   : > { %v3974_v58 = vpop.f32.mrf.mxu2  ;;  %v1604_v12 = vpop.permute.xlu0 %1603 }
 0x32c   : > { %2328 = vst.msk [vmem:[%s3889_s7 + $0x88] sm:$0xff] %vm372_vm0, %v3974_v58 }
 0x32d   : > { %1671 = vst.msk [vmem:[#allocation3 + $0xe8] sm:$0xff] %vm1641_vm8, %v1604_v12  ;;  %v1412_v14 = vpop.permute.xlu2 %1411 }
 0x32e   : > { %v2230_v57 = vpop.f32.mrf.mxu0  ;;  %1864 = vst.msk [vmem:[#allocation3 + $0xe8] sm:$0xff] %vm1834_vm9, %v1797_v62 }
 0x32f   : > { %2316 = vst.msk [vmem:[%s3889_s7 + $0x28] sm:$0xff] %vm372_vm0, %v2230_v57  ;;  %v2352_v16 = vsel %vm372_vm0, %v2230_v57, 0.0  ;;  %v2418_v37 = vmul.f32 %v2230_v57, %v2230_v57  ;;  %v1988_v3 = vpop.permute.xlu1 %1987 }
 0x330   : > { %v2353_v9 = vadd.f32 %v2352_v16, %v2351_v60  ;;  %2056 = vst.msk [vmem:[#allocation3 + $0xe0] sm:$0xff] %vm2027_vm10, %v1988_v3  ;;  %v2082_v18 = vld [vmem:[#allocation3 + $0xb0] sm:$0xff]  ;;  %v2423_v60 = vmul.f32 %v3945_v48, %v3945_v48 }
 0x331   : > { %v2454_v33 = vsel %vm372_vm0, %v2418_v37, 0.0  ;;  %2633 = vmatmul.msk.f32.gmra.mxu2 %vm2101_vm11, %v2082_v18  ;;  %v3987_v4 = vpop.f32.mrf.mxu1  ;;  %1478 = vst.msk [vmem:[#allocation3 + $0xf0] sm:$0xff] %vm1447_vm7, %v1412_v14 }
 0x332   : > { %v2455_v40 = vadd.f32 %v2454_v33, %v2453_v49  ;;  %2322 = vst.msk [vmem:[%s3889_s7 + $0x58] sm:$0xff] %vm372_vm0, %v3987_v4  ;;  %v2424_v49 = vmul.f32 %v3987_v4, %v3987_v4  ;;  %v2464_v62 = vsel %vm372_vm0, %v2423_v60, 0.0  ;;  %v2364_v15 = vsel %vm372_vm0, %v3987_v4, 0.0 }
 0x333   : > { %v1978_v53 = vpop.permute.xlu0 %1977 }
 0x334   : > { %v2466_v14 = vsel %vm372_vm0, %v2424_v49, 0.0 }
 0x335   : > { %v1992_v52 = vpop.permute.xlu2 %1991 }
 0x337   : > { %v1785_v5 = vpop.permute.xlu1 %1784  ;;  %v2088_v20 = vld [vmem:[#allocation3 + $0xe0] sm:$0xff] }
 0x338   : > { %1858 = vst.msk [vmem:[#allocation3 + $0xb8] sm:$0xff] %vm1834_vm9, %v1785_v5  ;;  %2639 = vmatmul.msk.f32.gmra.mxu3 %vm2101_vm11, %v2088_v20 }
 0x339   : > { %2051 = vst.msk [vmem:[#allocation3 + $0xb8] sm:$0xff] %vm2027_vm10, %v1978_v53 }
 0x33b   : > { %v1606_v7 = vpop.permute.xlu0 %1605 }
 0x33c   : > { %1672 = vst.msk [vmem:[#allocation3 + $0xf0] sm:$0xff] %vm1641_vm8, %v1606_v7 }
 0x33d   : > { %v1801_v26 = vpop.permute.xlu2 %1800 }
 0x33f   : > { %v1990_v54 = vpop.permute.xlu1 %1989 }
 0x340   : > { %2057 = vst.msk [vmem:[#allocation3 + $0xe8] sm:$0xff] %vm2027_vm10, %v1990_v54  ;;  %v2083_v47 = vld [vmem:[#allocation3 + $0xb8] sm:$0xff] }
 0x341   : > { %2634 = vmatmul.msk.f32.gmra.mxu2 %vm2101_vm11, %v2083_v47 }
 0x343   : > { %v1414_v41 = vpop.permute.xlu0 %1413 }
 0x344   : > { %v3999_v17 = vpop.f32.mrf.mxu2  ;;  %1479 = vst.msk [vmem:[#allocation3 + $0xf8] sm:$0xff] %vm1447_vm7, %v1414_v41 }
 0x345   : > { %2329 = vst.msk [vmem:[%s3889_s7 + $0x90] sm:$0xff] %vm372_vm0, %v3999_v17  ;;  %v2431_v38 = vmul.f32 %v3999_v17, %v3999_v17 }
 0x347   : > { %v1799_v21 = vpop.permute.xlu1 %1798  ;;  %v2089_v1 = vld [vmem:[#allocation3 + $0xe8] sm:$0xff] }
 0x348   : > { %1865 = vst.msk [vmem:[#allocation3 + $0xf0] sm:$0xff] %vm1834_vm9, %v1799_v21  ;;  %2640 = vmatmul.msk.f32.gmra.mxu3 %vm2101_vm11, %v2089_v1 }
 0x349   : > { %2058 = vst.msk [vmem:[#allocation3 + $0xf0] sm:$0xff] %vm2027_vm10, %v1992_v52 }
 0x34b   : > { %v4008_v23 = vpop.f32.mrf.mxu3  ;;  %v1994_v43 = vpop.permute.xlu0 %1993 }
 0x34c   : > { %2335 = vst.msk [vmem:[%s3889_s7 + $0xc0] sm:$0xff] %vm372_vm0, %v4008_v23 }
 0x34e   : > { %v2233_v19 = vpop.f32.mrf.mxu0 }
 0x34f   : > { %2317 = vst.msk [vmem:[%s3889_s7 + $0x30] sm:$0xff] %vm372_vm0, %v2233_v19  ;;  %v2354_v24 = vsel %vm372_vm0, %v2233_v19, 0.0  ;;  %v2419_v22 = vmul.f32 %v2233_v19, %v2233_v19  ;;  %v1608_v30 = vpop.permute.xlu1 %1607  ;;  %v2429_v19 = vmul.f32 %v3954_v42, %v3954_v42 }
 0x350   : > { %v2355_v28 = vadd.f32 %v2354_v24, %v2353_v9  ;;  %1673 = vst.msk [vmem:[#allocation3 + $0xf8] sm:$0xff] %vm1641_vm8, %v1608_v30  ;;  %v2090_v39 = vld [vmem:[#allocation3 + $0xf0] sm:$0xff] }
 0x351   : > { %v2456_v25 = vsel %vm372_vm0, %v2419_v22, 0.0  ;;  %1866 = vst.msk [vmem:[#allocation3 + $0xf8] sm:$0xff] %vm1834_vm9, %v1801_v26  ;;  %2641 = vmatmul.msk.f32.gmra.mxu3 %vm2101_vm11, %v2090_v39  ;;  %v2251_v36 = vpop.f32.mrf.mxu1  ;;  %v2430_v39 = vmul.f32 %v3974_v58, %v3974_v58 }
 0x352   : > { %v2457_v63 = vadd.f32 %v2456_v25, %v2455_v40  ;;  %2059 = vst.msk [vmem:[#allocation3 + $0xf8] sm:$0xff] %vm2027_vm10, %v1994_v43  ;;  %v2425_v27 = vmul.f32 %v2251_v36, %v2251_v36  ;;  %v2366_v48 = vsel %vm372_vm0, %v2251_v36, 0.0 }
 0x353   : > { %2323 = vst.msk [vmem:[%s3889_s7 + $0x60] sm:$0xff] %vm372_vm0, %v2251_v36 }
 0x354   : > { %v2468_v9 = vsel %vm372_vm0, %v2425_v27, 0.0 }
 0x359   : > { %v2091_v51 = vld [vmem:[#allocation3 + $0xf8] sm:$0xff] }
 0x35a   : > { %2642 = vmatmul.msk.f32.gmra.mxu3 %vm2101_vm11, %v2091_v51  ;;  %v2476_v51 = vsel %vm372_vm0, %v2429_v19, 0.0 }
 0x364   : > { %v4024_v29 = vpop.f32.mrf.mxu2 }
 0x365   : > { %2330 = vst.msk [vmem:[%s3889_s7 + $0x98] sm:$0xff] %vm372_vm0, %v4024_v29 }
 0x36b   : > { %v4029_v32 = vpop.f32.mrf.mxu3 }
 0x36c   : > { %2336 = vst.msk [vmem:[%s3889_s7 + $0xc8] sm:$0xff] %vm372_vm0, %v4029_v32 }
 0x36e   : > { %v2236_v45 = vpop.f32.mrf.mxu0 }
 0x36f   : > { %2318 = vst.msk [vmem:[%s3889_s7 + $0x38] sm:$0xff] %vm372_vm0, %v2236_v45  ;;  %v2356_v2 = vsel %vm372_vm0, %v2236_v45, 0.0  ;;  %v2420_v50 = vmul.f32 %v2236_v45, %v2236_v45  ;;  %v2376_v45 = vsel %vm372_vm0, %v3974_v58, 0.0  ;;  %v2380_v58 = vsel %vm372_vm0, %v4024_v29, 0.0 }
 0x370   : > { %v2357_v6 = vadd.f32 %v2356_v2, %v2355_v28  ;;  %v2374_v28 = vsel %vm372_vm0, %v3954_v42, 0.0 }
 0x371   : > { %v2458_v44 = vsel %vm372_vm0, %v2420_v50, 0.0  ;;  %v2254_v8 = vpop.f32.mrf.mxu1  ;;  %v2478_v50 = vsel %vm372_vm0, %v2430_v39, 0.0 }
 0x372   : > { %v2359_v11 = vadd.f32 %v2358_v0, %v2357_v6  ;;  %v2459_v31 = vadd.f32 %v2458_v44, %v2457_v63  ;;  %2324 = vst.msk [vmem:[%s3889_s7 + $0x68] sm:$0xff] %vm372_vm0, %v2254_v8  ;;  %v2426_v16 = vmul.f32 %v2254_v8, %v2254_v8  ;;  %v2368_v18 = vsel %vm372_vm0, %v2254_v8, 0.0 }
 0x373   : > { %v2378_v6 = vsel %vm372_vm0, %v3999_v17, 0.0  ;;  %v2432_v0 = vmul.f32 %v4024_v29, %v4024_v29  ;;  %v2480_v8 = vsel %vm372_vm0, %v2431_v38, 0.0 }
 0x374   : > { %v2361_v55 = vadd.f32 %v2360_v34, %v2359_v11  ;;  %v2461_v10 = vadd.f32 %v2460_v46, %v2459_v31  ;;  %v2470_v40 = vsel %vm372_vm0, %v2426_v16, 0.0  ;;  %v2437_v16 = vmul.f32 %v4008_v23, %v4008_v23 }
 0x375   : > { %v2482_v34 = vsel %vm372_vm0, %v2432_v0, 0.0 }
 0x376   : > { %v2363_v61 = vadd.f32 %v2362_v35, %v2361_v55  ;;  %v2463_v13 = vadd.f32 %v2462_v59, %v2461_v10 }
 0x378   : > { %v2465_v12 = vadd.f32 %v2464_v62, %v2463_v13  ;;  %v2365_v57 = vadd.f32 %v2364_v15, %v2363_v61 }
 0x37a   : > { %v2367_v37 = vadd.f32 %v2366_v48, %v2365_v57  ;;  %v2467_v3 = vadd.f32 %v2466_v14, %v2465_v12 }
 0x37c   : > { %v2369_v33 = vadd.f32 %v2368_v18, %v2367_v37  ;;  %v2469_v4 = vadd.f32 %v2468_v9, %v2467_v3 }
 0x37e   : > { %v2471_v53 = vadd.f32 %v2470_v40, %v2469_v4  ;;  %v2438_v4 = vmul.f32 %v4029_v32, %v4029_v32 }
 0x384   : > { %v2275_v5 = vpop.f32.mrf.mxu2 }
 0x385   : > { %2331 = vst.msk [vmem:[%s3889_s7 + $0xa0] sm:$0xff] %vm372_vm0, %v2275_v5  ;;  %v2433_v11 = vmul.f32 %v2275_v5, %v2275_v5  ;;  %v2382_v60 = vsel %vm372_vm0, %v2275_v5, 0.0 }
 0x387   : > { %v2484_v10 = vsel %vm372_vm0, %v2433_v11, 0.0 }
 0x389   : > { %v2257_v20 = vpop.f32.mrf.mxu1 }
 0x38a   : > { %2325 = vst.msk [vmem:[%s3889_s7 + $0x70] sm:$0xff] %vm372_vm0, %v2257_v20  ;;  %v2427_v54 = vmul.f32 %v2257_v20, %v2257_v20  ;;  %v2370_v41 = vsel %vm372_vm0, %v2257_v20, 0.0  ;;  %v2492_v20 = vsel %vm372_vm0, %v2437_v16, 0.0 }
 0x38b   : > { %v4068_v7 = vpop.f32.mrf.mxu3  ;;  %v2371_v21 = vadd.f32 %v2370_v41, %v2369_v33  ;;  %v2390_v33 = vsel %vm372_vm0, %v4008_v23, 0.0  ;;  %v2494_v23 = vsel %vm372_vm0, %v2438_v4, 0.0 }
 0x38c   : > { %2337 = vst.msk [vmem:[%s3889_s7 + $0xd0] sm:$0xff] %vm372_vm0, %v4068_v7  ;;  %v2472_v52 = vsel %vm372_vm0, %v2427_v54, 0.0  ;;  %v2392_v54 = vsel %vm372_vm0, %v4029_v32, 0.0 }
 0x38d   : > { %v2473_v22 = vadd.f32 %v2472_v52, %v2471_v53 }
 0x39c   : > { %v2278_v47 = vpop.f32.mrf.mxu2 }
 0x39d   : > { %2332 = vst.msk [vmem:[%s3889_s7 + $0xa8] sm:$0xff] %vm372_vm0, %v2278_v47  ;;  %v2434_v29 = vmul.f32 %v2278_v47, %v2278_v47  ;;  %v2384_v13 = vsel %vm372_vm0, %v2278_v47, 0.0  ;;  %v2439_v47 = vmul.f32 %v4068_v7, %v4068_v7 }
 0x39f   : > { %v2486_v27 = vsel %vm372_vm0, %v2434_v29, 0.0 }
 0x3a1   : > { %v2260_v1 = vpop.f32.mrf.mxu1 }
 0x3a2   : > { %2326 = vst.msk [vmem:[%s3889_s7 + $0x78] sm:$0xff] %vm372_vm0, %v2260_v1  ;;  %v2372_v26 = vsel %vm372_vm0, %v2260_v1, 0.0  ;;  %v2428_v24 = vmul.f32 %v2260_v1, %v2260_v1 }
 0x3a3   : > { %v2373_v30 = vadd.f32 %v2372_v26, %v2371_v21  ;;  %v4082_v43 = vpop.f32.mrf.mxu3  ;;  %v2394_v21 = vsel %vm372_vm0, %v4068_v7, 0.0 }
 0x3a4   : > { %v2474_v25 = vsel %vm372_vm0, %v2428_v24, 0.0  ;;  %2338 = vst.msk [vmem:[%s3889_s7 + $0xd8] sm:$0xff] %vm372_vm0, %v4082_v43  ;;  %v2496_v24 = vsel %vm372_vm0, %v2439_v47, 0.0  ;;  %v2440_v32 = vmul.f32 %v4082_v43, %v4082_v43 }
 0x3a5   : > { %v2375_v36 = vadd.f32 %v2374_v28, %v2373_v30  ;;  %v2475_v63 = vadd.f32 %v2474_v25, %v2473_v22  ;;  %v2396_v30 = vsel %vm372_vm0, %v4082_v43, 0.0 }
 0x3a6   : > { %v2498_v39 = vsel %vm372_vm0, %v2440_v32, 0.0 }
 0x3a7   : > { %v2377_v2 = vadd.f32 %v2376_v45, %v2375_v36  ;;  %v2477_v42 = vadd.f32 %v2476_v51, %v2475_v63 }
 0x3a9   : > { %v2379_v56 = vadd.f32 %v2378_v6, %v2377_v2  ;;  %v2479_v44 = vadd.f32 %v2478_v50, %v2477_v42 }
 0x3ab   : > { %v2481_v31 = vadd.f32 %v2480_v8, %v2479_v44  ;;  %v2381_v46 = vadd.f32 %v2380_v58, %v2379_v56 }
 0x3ad   : > { %v2383_v17 = vadd.f32 %v2382_v60, %v2381_v46  ;;  %v2483_v55 = vadd.f32 %v2482_v34, %v2481_v31 }
 0x3af   : > { %v2485_v59 = vadd.f32 %v2484_v10, %v2483_v55  ;;  %v2385_v15 = vadd.f32 %v2384_v13, %v2383_v17 }
 0x3b1   : > { %v2487_v14 = vadd.f32 %v2486_v27, %v2485_v59 }
 0x3b4   : > { %v2281_v35 = vpop.f32.mrf.mxu2 }
 0x3b5   : > { %2333 = vst.msk [vmem:[%s3889_s7 + $0xb0] sm:$0xff] %vm372_vm0, %v2281_v35  ;;  %v2435_v61 = vmul.f32 %v2281_v35, %v2281_v35  ;;  %v2386_v62 = vsel %vm372_vm0, %v2281_v35, 0.0 }
 0x3b6   : > { %v2387_v57 = vadd.f32 %v2386_v62, %v2385_v15 }
 0x3b7   : > { %v2488_v12 = vsel %vm372_vm0, %v2435_v61, 0.0 }
 0x3b8   : > { %v2489_v9 = vadd.f32 %v2488_v12, %v2487_v14 }
 0x3bb   : > { %v2299_v49 = vpop.f32.mrf.mxu3 }
 0x3bc   : > { %2339 = vst.msk [vmem:[%s3889_s7 + $0xe0] sm:$0xff] %vm372_vm0, %v2299_v49  ;;  %v2441_v25 = vmul.f32 %v2299_v49, %v2299_v49  ;;  %v2398_v63 = vsel %vm372_vm0, %v2299_v49, 0.0 }
 0x3be   : > { %v2500_v45 = vsel %vm372_vm0, %v2441_v25, 0.0 }
 0x3c4   : > { %v2284_v48 = vpop.f32.mrf.mxu2 }
 0x3c5   : > { %2334 = vst.msk [vmem:[%s3889_s7 + $0xb8] sm:$0xff] %vm372_vm0, %v2284_v48  ;;  %v2388_v37 = vsel %vm372_vm0, %v2284_v48, 0.0  ;;  %v2436_v3 = vmul.f32 %v2284_v48, %v2284_v48 }
 0x3c6   : > { %v2389_v18 = vadd.f32 %v2388_v37, %v2387_v57 }
 0x3c7   : > { %v2490_v40 = vsel %vm372_vm0, %v2436_v3, 0.0 }
 0x3c8   : > { %v2391_v53 = vadd.f32 %v2390_v33, %v2389_v18  ;;  %v2491_v5 = vadd.f32 %v2490_v40, %v2489_v9 }
 0x3ca   : > { %v2393_v41 = vadd.f32 %v2392_v54, %v2391_v53  ;;  %v2493_v52 = vadd.f32 %v2492_v20, %v2491_v5 }
 0x3cb   : > { %v2302_v1 = vpop.f32.mrf.mxu3 }
 0x3cc   : > { %v2395_v19 = vadd.f32 %v2394_v21, %v2393_v41  ;;  %v2495_v26 = vadd.f32 %v2494_v23, %v2493_v52  ;;  %2340 = vst.msk [vmem:[%s3889_s7 + $0xe8] sm:$0xff] %vm372_vm0, %v2302_v1  ;;  %v2442_v38 = vmul.f32 %v2302_v1, %v2302_v1  ;;  %v2400_v50 = vsel %vm372_vm0, %v2302_v1, 0.0 }
 0x3ce   : > { %v2497_v22 = vadd.f32 %v2496_v24, %v2495_v26  ;;  %v2397_v28 = vadd.f32 %v2396_v30, %v2395_v19  ;;  %v2502_v0 = vsel %vm372_vm0, %v2442_v38, 0.0 }
 0x3d0   : > { %v2499_v7 = vadd.f32 %v2498_v39, %v2497_v22  ;;  %v2399_v51 = vadd.f32 %v2398_v63, %v2397_v28 }
 0x3d2   : > { %v2501_v42 = vadd.f32 %v2500_v45, %v2499_v7  ;;  %v2401_v6 = vadd.f32 %v2400_v50, %v2399_v51 }
 0x3d4   : > { %v2305_v36 = vpop.f32.mrf.mxu3  ;;  %v2503_v44 = vadd.f32 %v2502_v0, %v2501_v42 }
 0x3d5   : > { %2341 = vst.msk [vmem:[%s3889_s7 + $0xf0] sm:$0xff] %vm372_vm0, %v2305_v36  ;;  %v2443_v2 = vmul.f32 %v2305_v36, %v2305_v36  ;;  %v2402_v43 = vsel %vm372_vm0, %v2305_v36, 0.0 }
 0x3d6   : > { %v2403_v8 = vadd.f32 %v2402_v43, %v2401_v6 }
 0x3d7   : > { %v2504_v56 = vsel %vm372_vm0, %v2443_v2, 0.0 }
 0x3d8   : > { %v2505_v46 = vadd.f32 %v2504_v56, %v2503_v44 }
 0x3dd   : > { %v2308_v58 = vpop.f32.mrf.mxu3 }
 0x3de   : > { %2342 = vst.msk [vmem:[%s3889_s7 + $0xf8] sm:$0xff] %vm372_vm0, %v2308_v58  ;;  %v2404_v11 = vsel %vm372_vm0, %v2308_v58, 0.0  ;;  %v2444_v31 = vmul.f32 %v2308_v58, %v2308_v58 }
 0x3df   : > { %v2405_v34 = vadd.f32 %v2404_v11, %v2403_v8 }
 0x3e0   : > { %v2506_v60 = vsel %vm372_vm0, %v2444_v31, 0.0 }
 0x3e1   : > { %v2406_v17 = vrot.slane %v2405_v34, 4  ;;  %v2507_v55 = vadd.f32 %v2506_v60, %v2505_v46 }
 0x3e3   : > { %v2407_v10 = vadd.f32 %v2406_v17, %v2405_v34  ;;  %v2508_v59 = vrot.slane %v2507_v55, 4 }
 0x3e5   : > { %v2408_v35 = vrot.slane %v2407_v10, 2  ;;  %v2509_v49 = vadd.f32 %v2508_v59, %v2507_v55 }
 0x3e7   : > { %v2409_v29 = vadd.f32 %v2408_v35, %v2407_v10  ;;  %v2510_v61 = vrot.slane %v2509_v49, 2 }
 0x3e9   : > { %v2410_v13 = vrot.slane %v2409_v29, 1  ;;  %v2511_v62 = vadd.f32 %v2510_v61, %v2509_v49 }
 0x3eb   : > { %v2411_v15 = vadd.f32 %v2410_v13, %v2409_v29  ;;  %v2512_v27 = vrot.slane %v2511_v62, 1 }
 0x3ed   : > { %2412 = vst.msk [vmem:[%s235_s10] sm:$0x1] %vm381_vm1, %v2411_v15  ;;  %v2513_v12 = vadd.f32 %v2512_v27, %v2511_v62 }
 0x3ef   : > { %2514 = vst.msk [vmem:[%s235_s10 + $0x1] sm:$0x1] %vm381_vm1, %v2513_v12 }
 0x3f0 PF: > { %s16_s18 = sadd.s32 1, %s2699_s18  }
 0x3f1   : > { %p13_p4 = scmp.ge.s32.totalorder %s16_s18, 4  }
 0x3f3   :  { %15 = sbr.rel (!%p13_p4) target bundleno = 1 (0x1), region = 81 }

</bundles_post_ra>
